<compile_context>
chip_gen: v5e
topology: v5e:2x2
jax: 0.10.0
libtpu: 0.0.40
codegen_flags: <defaults>
</compile_context>

<pallas_src>
import functools

import jax
import jax.numpy as jnp
from jax.experimental import pallas as pl
from jax.experimental.pallas import tpu as pltpu

LEAKY_SLOPE = 0.01   # nn.LeakyReLU() default
BN_EPS = 1e-5        # nn.BatchNorm2d default


def _leaky(x, slope):
    # LeakyReLU as mul+max (one fewer VALU op than cmp+select); valid for 0<slope<1.
    return jnp.maximum(x, x * slope)


def _bn_rows(h, g, b, eps):
    """Training-mode BatchNorm over rows (rows = B*Ho*Wo) of a resident f32 block.

    Single pass sum / sum-of-squares, biased variance (matches PyTorch's
    normalization in train mode)."""
    inv_m = 1.0 / h.shape[0]
    mean = jnp.sum(h, axis=0, keepdims=True) * inv_m
    var = jnp.sum(h * h, axis=0, keepdims=True) * inv_m - mean * mean
    inv_std = jax.lax.rsqrt(var + eps)          # EUP rsqrt
    return (h - mean) * (inv_std * g) + b


# ----------------------------------------------------------------------------
# Pallas kernels
# ----------------------------------------------------------------------------
def _mm_lrelu_kernel(a_ref, w_ref, o_ref, *, slope):
    """out = LeakyReLU(A @ W); bf16 MXU operands, f32 accumulate."""
    acc = jnp.dot(a_ref[...], w_ref[...], preferred_element_type=jnp.float32)
    o_ref[...] = _leaky(acc, slope).astype(o_ref.dtype)


def _mm_lrelu_bn_kernel(a_ref, w_ref, g_ref, b_ref, o_ref, *, slope, eps):
    """out = BN(LeakyReLU(A @ W)) with batch statistics computed in-kernel."""
    h = _leaky(jnp.dot(a_ref[...], w_ref[...], preferred_element_type=jnp.float32), slope)
    o_ref[...] = _bn_rows(h, g_ref[...], b_ref[...], eps).astype(o_ref.dtype)


def _conv4_bn_head_kernel(a_ref, w_ref, g_ref, b_ref, wh_ref, o_ref, *, slope, eps, batch):
    """conv4 matmul + LeakyReLU + BN + folded (conv5 ∘ Linear) head, fused.

    The conv4 f32 accumulator (B*16, 128) stays resident; the folded head weight
    wh (16, 128) is applied as a VPU multiply + reduce:
        out[b] = sum_{r,c} BN(LReLU(A4 @ W4))[b*16+r, c] * wh[r, c]
    """
    h = _leaky(jnp.dot(a_ref[...], w_ref[...], preferred_element_type=jnp.float32), slope)
    hn = _bn_rows(h, g_ref[...], b_ref[...], eps)          # (B*16, 128) f32
    rows_per_img = hn.shape[0] // batch
    t = hn.reshape(batch, rows_per_img, hn.shape[1]) * wh_ref[...][None, :, :]
    out = jnp.sum(jnp.sum(t, axis=2), axis=1, keepdims=True)   # (B, 1)
    o_ref[...] = out.astype(o_ref.dtype)


# ----------------------------------------------------------------------------
# Pallas wrappers
# ----------------------------------------------------------------------------
def _pick_tm(M):
    """Largest tile that divides M while keeping >=2 grid steps (v7x megacore)."""
    for tm in (4096, 2048, 1024, 512, 256, 128):
        if M % tm == 0 and M // tm >= 2:
            return tm
    return M


def _vmem_limit_bytes(n_bytes):
    """Scoped-VMEM hint for the single-block kernels (footprint scales with batch).

    2x margin, floored at the v6e/v7x default (32 MiB), capped at 48 MiB to stay
    below v7x's 64 MiB physical VMEM."""
    return int(min(max(2 * n_bytes, 32 << 20), 48 << 20))


def conv_lrelu(a, w):
    """M-tiled, 'parallel' gridded matmul + LeakyReLU (conv1)."""
    M, K = a.shape
    _, N = w.shape
    tm = _pick_tm(M)
    kernel = functools.partial(_mm_lrelu_kernel, slope=LEAKY_SLOPE)
    return pl.pallas_call(
        kernel,
        out_shape=jax.ShapeDtypeStruct((M, N), jnp.bfloat16),
        grid=(M // tm,),
        in_specs=[
            pl.BlockSpec((tm, K), lambda i: (i, 0)),
            pl.BlockSpec((K, N), lambda i: (0, 0)),
        ],
        out_specs=pl.BlockSpec((tm, N), lambda i: (i, 0)),
        compiler_params=pltpu.CompilerParams(dimension_semantics=("parallel",)),
    )(a, w)


def conv_lrelu_bn(a, w, gamma, beta):
    """Fused matmul + LeakyReLU + BatchNorm (conv2/conv3).

    Single block: BN batch statistics need all rows (B*Ho*Wo) resident. At these
    layer sizes the block is ~0.2 MiB per image; the explicit vmem limit hint
    documents the batch-scaling headroom (see TODO for the tiled two-pass BN)."""
    M, K = a.shape
    _, N = w.shape
    kernel = functools.partial(_mm_lrelu_bn_kernel, slope=LEAKY_SLOPE, eps=BN_EPS)
    needed = (a.size * a.dtype.itemsize + w.size * w.dtype.itemsize
              + M * N * (2 + 4) + (gamma.size + beta.size) * 4)
    return pl.pallas_call(
        kernel,
        out_shape=jax.ShapeDtypeStruct((M, N), jnp.bfloat16),
        in_specs=[
            pl.BlockSpec((M, K), lambda: (0, 0)),
            pl.BlockSpec((K, N), lambda: (0, 0)),
            pl.BlockSpec((1, N), lambda: (0, 0)),
            pl.BlockSpec((1, N), lambda: (0, 0)),
        ],
        out_specs=pl.BlockSpec((M, N), lambda: (0, 0)),
        compiler_params=pltpu.CompilerParams(vmem_limit_bytes=_vmem_limit_bytes(needed)),
    )(a, w, gamma, beta)


def conv4_bn_head(a, w, gamma, beta, w_head, *, batch):
    """Fused conv4 matmul + LeakyReLU + BN + folded conv5∘Linear head -> (B, 1)."""
    M, K = a.shape
    _, N = w.shape
    assert M == batch * 16, (M, batch)
    assert w_head.shape == (16, N), w_head.shape
    kernel = functools.partial(_conv4_bn_head_kernel, slope=LEAKY_SLOPE, eps=BN_EPS,
                               batch=batch)
    needed = (a.size * a.dtype.itemsize + w.size * w.dtype.itemsize
              + M * N * 4 + (gamma.size + beta.size + w_head.size) * 4 + batch * 4)
    return pl.pallas_call(
        kernel,
        out_shape=jax.ShapeDtypeStruct((batch, 1), jnp.float32),
        in_specs=[
            pl.BlockSpec((M, K), lambda: (0, 0)),
            pl.BlockSpec((K, N), lambda: (0, 0)),
            pl.BlockSpec((1, N), lambda: (0, 0)),
            pl.BlockSpec((1, N), lambda: (0, 0)),
            pl.BlockSpec((16, N), lambda: (0, 0)),
        ],
        out_specs=pl.BlockSpec((batch, 1), lambda: (0, 0)),
        compiler_params=pltpu.CompilerParams(vmem_limit_bytes=_vmem_limit_bytes(needed)),
    )(a, w, gamma, beta, w_head)


# ----------------------------------------------------------------------------
# Glue: im2col (XLA) between the fused layer kernels
# TODO(synk): move patch extraction inside the kernels (strided pl.ds reads on a
#             VMEM-resident activation) so the whole forward is one pallas_call.
# ----------------------------------------------------------------------------
def _im2col_nhwc(x, k, stride, pad):
    if pad:
        x = jnp.pad(x, ((0, 0), (pad, pad), (pad, pad), (0, 0)))
    B, H, W, C = x.shape
    Ho = (H - k) // stride + 1
    Wo = (W - k) // stride + 1
    cols = []
    for i in range(k):
        for j in range(k):
            cols.append(x[:, i:i + stride * Ho:stride, j:j + stride * Wo:stride, :])
    patches = jnp.concatenate(cols, axis=-1)                 # (B, Ho, Wo, k*k*C)
    return patches.reshape(B * Ho * Wo, k * k * C), (B, Ho, Wo)


# ----------------------------------------------------------------------------
# Discriminator forward (expects prepared params: see prepare_params)
# ----------------------------------------------------------------------------
def discriminator_forward(x_nchw, p):
    x = jnp.transpose(x_nchw, (0, 2, 3, 1)).astype(jnp.bfloat16)       # NCHW -> NHWC, bf16

    a, (B, Ho, Wo) = _im2col_nhwc(x, 3, 1, 1)
    x = conv_lrelu(a, p["w1"]).reshape(B, Ho, Wo, 16)                  # (B,32,32,16)

    a, (B, Ho, Wo) = _im2col_nhwc(x, 4, 2, 1)
    x = conv_lrelu_bn(a, p["w2"], p["g2"], p["b2"]).reshape(B, Ho, Wo, 32)   # (B,16,16,32)

    a, (B, Ho, Wo) = _im2col_nhwc(x, 4, 2, 1)
    x = conv_lrelu_bn(a, p["w3"], p["g3"], p["b3"]).reshape(B, Ho, Wo, 64)   # (B,8,8,64)

    a, (B, Ho, Wo) = _im2col_nhwc(x, 4, 2, 1)                          # (B*16, 1024), 4x4 map
    # conv4 + BN4 + folded conv5∘Linear head in one kernel: conv5 (k4,s1,p0 on
    # the 4x4 map) is exactly a flatten, and Linear is linear, so both are folded
    # into the (16, 128) f32 head weight prepared in prepare_params.
    return conv4_bn_head(a, p["w4"], p["g4"], p["b4"], p["wh"], batch=B)     # (B, 1)


# ----------------------------------------------------------------------------
# Parameters: synthetic PyTorch-layout init + one-time kernel-layout prepare
# ----------------------------------------------------------------------------
def init_params(key):
    ks = jax.random.split(key, 12)
    n = lambda k, shape, s=0.05: (s * jax.random.normal(k, shape)).astype(jnp.float32)
    return {
        "w1": n(ks[0], (16, 3, 3, 3)),
        "w2": n(ks[1], (32, 16, 4, 4)),
        "w3": n(ks[2], (64, 32, 4, 4)),
        "w4": n(ks[3], (128, 64, 4, 4)),
        "w5": n(ks[4], (256, 128, 4, 4)),
        "wl": n(ks[5], (1, 256)),
        "g2": (1.0 + 0.1 * jax.random.normal(ks[6], (1, 32))).astype(jnp.float32),
        "b2": n(ks[7], (1, 32), 0.1),
        "g3": (1.0 + 0.1 * jax.random.normal(ks[8], (1, 64))).astype(jnp.float32),
        "b3": n(ks[9], (1, 64), 0.1),
        "g4": (1.0 + 0.1 * jax.random.normal(ks[10], (1, 128))).astype(jnp.float32),
        "b4": n(ks[11], (1, 128), 0.1),
    }


def prepare_params(raw):
    """Hoist all parameter layout work out of the traced forward.

    Conv weights -> (KH*KW*Cin, Cout) bf16 matmul layout (matches the im2col
    column order kh,kw,cin).  conv5 and the Linear are folded (no nonlinearity
    between them) into a single f32 head weight reshaped to (16, 128):
        w_head[(kh*4+kw), cin] = sum_co W5[co, cin, kh, kw] * WL[0, co]
    BN affine params stay f32."""
    def conv_w(w, dtype=jnp.bfloat16):
        cout, cin, kh, kw = w.shape
        return jnp.transpose(w, (2, 3, 1, 0)).reshape(kh * kw * cin, cout).astype(dtype)

    w5_mat = conv_w(raw["w5"], jnp.float32)                   # (2048, 256) f32
    w_head = (w5_mat @ raw["wl"].T).reshape(16, 128)          # folded conv5∘Linear
    return {
        "w1": conv_w(raw["w1"]),
        "w2": conv_w(raw["w2"]),
        "w3": conv_w(raw["w3"]),
        "w4": conv_w(raw["w4"]),
        "wh": w_head.astype(jnp.float32),
        "g2": raw["g2"], "b2": raw["b2"],
        "g3": raw["g3"], "b3": raw["b3"],
        "g4": raw["g4"], "b4": raw["b4"],
    }


# ----------------------------------------------------------------------------
# Pure-JAX f32 reference (for a loose tolerance check)
# ----------------------------------------------------------------------------
def _reference_forward(x, raw):
    def conv(h, w, stride, pad):
        return jax.lax.conv_general_dilated(
            h, w, window_strides=(stride, stride),
            padding=[(pad, pad), (pad, pad)],
            dimension_numbers=("NCHW", "OIHW", "NCHW"))

    def lrelu(h):
        return jnp.where(h >= 0, h, LEAKY_SLOPE * h)

    def bn(h, g, b):
        mean = h.mean(axis=(0, 2, 3), keepdims=True)
        var = h.var(axis=(0, 2, 3), keepdims=True)            # biased
        return ((h - mean) / jnp.sqrt(var + BN_EPS)) * g.reshape(1, -1, 1, 1) \
            + b.reshape(1, -1, 1, 1)

    h = lrelu(conv(x, raw["w1"], 1, 1))
    h = bn(lrelu(conv(h, raw["w2"], 2, 1)), raw["g2"], raw["b2"])
    h = bn(lrelu(conv(h, raw["w3"], 2, 1)), raw["g3"], raw["b3"])
    h = bn(lrelu(conv(h, raw["w4"], 2, 1)), raw["g4"], raw["b4"])
    h = conv(h, raw["w5"], 1, 0)                              # (B, 256, 1, 1)
    return h.reshape(h.shape[0], -1) @ raw["wl"].T            # (B, 1)


if __name__ == "__main__":
    key = jax.random.PRNGKey(0)
    k_param, k_input = jax.random.split(key)
    raw = init_params(k_param)
    params = prepare_params(raw)

    # Input: batch=2, channels=3, 32x32 (spatial size implied by the flatten to 256).
    x = jax.random.normal(k_input, (2, 3, 32, 32), dtype=jnp.float32)

    fwd = jax.jit(discriminator_forward)
    out = jax.block_until_ready(fwd(x, params))
    assert out.shape == (2, 1), out.shape

    # Loose tolerance vs. the f32 reference: the kernel uses bf16 activations /
    # bf16 MXU operands with f32 accumulation, so expect ~1% relative deviation.
    ref = jax.block_until_ready(_reference_forward(x, raw))
    scale = float(jnp.maximum(1.0, jnp.max(jnp.abs(ref))))
    max_diff = float(jnp.max(jnp.abs(out.astype(jnp.float32) - ref)))
    assert max_diff <= 0.1 * scale + 0.05, (max_diff, scale)

    print("KERNEL_OK")
</pallas_src>

<mosaic_0001>
module attributes {stable_mosaic.version = 11 : i64} {
  func.func @_mm_lrelu_kernel(%arg0: i32, %arg1: memref<1024x27xbf16, #tpu.memory_space<vmem>>, %arg2: memref<27x16xbf16, #tpu.memory_space<vmem>>, %arg3: memref<1024x16xbf16, #tpu.memory_space<vmem>>) attributes {dimension_semantics = [#tpu.dimension_semantics<parallel>], iteration_bounds = array<i64: 2>, scalar_prefetch = 0 : i64, scratch_operands = 0 : i64, tpu.core_type = #tpu.core_type<tc>, window_params = [{transform_indices = @transform_0, window_bounds = array<i64: 1024, 27>}, {pipeline_mode = #tpu.pipeline_mode<synchronous>, transform_indices = @transform_1, window_bounds = array<i64: 27, 16>}, {transform_indices = @transform_2, window_bounds = array<i64: 1024, 16>}]} {
    %c0 = arith.constant 0 : index
    %c0_0 = arith.constant 0 : index
    %0 = vector.load %arg1[%c0, %c0_0] : memref<1024x27xbf16, #tpu.memory_space<vmem>>, vector<1024x27xbf16>
    %c0_1 = arith.constant 0 : index
    %c0_2 = arith.constant 0 : index
    %1 = vector.load %arg2[%c0_1, %c0_2] : memref<27x16xbf16, #tpu.memory_space<vmem>>, vector<27x16xbf16>
    %cst = arith.constant dense<0.000000e+00> : vector<1024x16xf32>
    %2 = tpu.matmul %0, %1, %cst {dimension_numbers = #tpu.dot_dimension_numbers<[1], [0], [0], [1], [0, 0, 1, 1], [], []>} : vector<1024x27xbf16>, vector<27x16xbf16>, vector<1024x16xf32> -> vector<1024x16xf32>
    %cst_3 = arith.constant 0.00999999977 : f32
    %3 = vector.broadcast %cst_3 : f32 to vector<1024x16xf32>
    %4 = arith.mulf %2, %3 : vector<1024x16xf32>
    %5 = arith.maximumf %2, %4 : vector<1024x16xf32>
    %6 = arith.truncf %5 : vector<1024x16xf32> to vector<1024x16xbf16>
    %c0_4 = arith.constant 0 : index
    %c0_5 = arith.constant 0 : index
    %7 = vector.load %arg3[%c0_4, %c0_5] : memref<1024x16xbf16, #tpu.memory_space<vmem>>, vector<1024x16xbf16>
    tpu.vector_store %arg3[%c0_4, %c0_5], %6 {strides = array<i32>} : memref<1024x16xbf16, #tpu.memory_space<vmem>>, vector<1024x16xbf16>,
    return
  }
  func.func @transform_0(%arg0: i32) -> (i32, i32) {
    %c0_i32 = arith.constant 0 : i32
    %c0_i32_0 = arith.constant 0 : i32
    return %arg0, %c0_i32 : i32, i32
  }
  func.func @transform_1(%arg0: i32) -> (i32, i32) {
    %c0_i32 = arith.constant 0 : i32
    %c0_i32_0 = arith.constant 0 : i32
    %c0_i32_1 = arith.constant 0 : i32
    return %c0_i32, %c0_i32_0 : i32, i32
  }
  func.func @transform_2(%arg0: i32) -> (i32, i32) {
    %c0_i32 = arith.constant 0 : i32
    %c0_i32_0 = arith.constant 0 : i32
    return %arg0, %c0_i32 : i32, i32
  }
}

module attributes {stable_mosaic.version = 11 : i64} {
  func.func @_mm_lrelu_bn_kernel(%arg0: memref<512x256xbf16, #tpu.memory_space<vmem>>, %arg1: memref<256x32xbf16, #tpu.memory_space<vmem>>, %arg2: memref<1x32xf32, #tpu.memory_space<vmem>>, %arg3: memref<1x32xf32, #tpu.memory_space<vmem>>, %arg4: memref<512x32xbf16, #tpu.memory_space<vmem>>) attributes {dimension_semantics = [], scalar_prefetch = 0 : i64, scratch_operands = 0 : i64, tpu.core_type = #tpu.core_type<tc>} {
    %c0 = arith.constant 0 : index
    %c0_0 = arith.constant 0 : index
    %0 = vector.load %arg0[%c0, %c0_0] : memref<512x256xbf16, #tpu.memory_space<vmem>>, vector<512x256xbf16>
    %c0_1 = arith.constant 0 : index
    %c0_2 = arith.constant 0 : index
    %1 = vector.load %arg1[%c0_1, %c0_2] : memref<256x32xbf16, #tpu.memory_space<vmem>>, vector<256x32xbf16>
    %cst = arith.constant dense<0.000000e+00> : vector<512x32xf32>
    %2 = tpu.matmul %0, %1, %cst {dimension_numbers = #tpu.dot_dimension_numbers<[1], [0], [0], [1], [0, 0, 1, 1], [], []>} : vector<512x256xbf16>, vector<256x32xbf16>, vector<512x32xf32> -> vector<512x32xf32>
    %cst_3 = arith.constant 0.00999999977 : f32
    %3 = vector.broadcast %cst_3 : f32 to vector<512x32xf32>
    %4 = arith.mulf %2, %3 : vector<512x32xf32>
    %5 = arith.maximumf %2, %4 : vector<512x32xf32>
    %c0_4 = arith.constant 0 : index
    %c0_5 = arith.constant 0 : index
    %6 = vector.load %arg2[%c0_4, %c0_5] : memref<1x32xf32, #tpu.memory_space<vmem>>, vector<1x32xf32>
    %c0_6 = arith.constant 0 : index
    %c0_7 = arith.constant 0 : index
    %7 = vector.load %arg3[%c0_6, %c0_7] : memref<1x32xf32, #tpu.memory_space<vmem>>, vector<1x32xf32>
    %cst_8 = arith.constant dense<0.000000e+00> : vector<32xf32>
    %8 = vector.multi_reduction <add>, %5, %cst_8 [0] : vector<512x32xf32> to vector<32xf32>
    %9 = vector.shape_cast %8 : vector<32xf32> to vector<1x32xf32>
    %cst_9 = arith.constant 0.001953125 : f32
    %10 = vector.broadcast %cst_9 : f32 to vector<1x32xf32>
    %11 = arith.mulf %9, %10 : vector<1x32xf32>
    %12 = arith.mulf %5, %5 : vector<512x32xf32>
    %cst_10 = arith.constant dense<0.000000e+00> : vector<32xf32>
    %13 = vector.multi_reduction <add>, %12, %cst_10 [0] : vector<512x32xf32> to vector<32xf32>
    %14 = vector.shape_cast %13 : vector<32xf32> to vector<1x32xf32>
    %cst_11 = arith.constant 0.001953125 : f32
    %15 = vector.broadcast %cst_11 : f32 to vector<1x32xf32>
    %16 = arith.mulf %14, %15 : vector<1x32xf32>
    %17 = arith.mulf %11, %11 : vector<1x32xf32>
    %18 = arith.subf %16, %17 : vector<1x32xf32>
    %cst_12 = arith.constant 9.99999974E-6 : f32
    %19 = vector.broadcast %cst_12 : f32 to vector<1x32xf32>
    %20 = arith.addf %18, %19 : vector<1x32xf32>
    %21 = math.rsqrt %20 : vector<1x32xf32>
    %22 = vector.broadcast %11 : vector<1x32xf32> to vector<512x32xf32>
    %23 = arith.subf %5, %22 : vector<512x32xf32>
    %24 = arith.mulf %21, %6 : vector<1x32xf32>
    %25 = vector.broadcast %24 : vector<1x32xf32> to vector<512x32xf32>
    %26 = arith.mulf %23, %25 : vector<512x32xf32>
    %27 = vector.broadcast %7 : vector<1x32xf32> to vector<512x32xf32>
    %28 = arith.addf %26, %27 : vector<512x32xf32>
    %29 = arith.truncf %28 : vector<512x32xf32> to vector<512x32xbf16>
    %c0_13 = arith.constant 0 : index
    %c0_14 = arith.constant 0 : index
    %30 = vector.load %arg4[%c0_13, %c0_14] : memref<512x32xbf16, #tpu.memory_space<vmem>>, vector<512x32xbf16>
    tpu.vector_store %arg4[%c0_13, %c0_14], %29 {strides = array<i32>} : memref<512x32xbf16, #tpu.memory_space<vmem>>, vector<512x32xbf16>,
    return
  }
}

module attributes {stable_mosaic.version = 11 : i64} {
  func.func @_mm_lrelu_bn_kernel(%arg0: memref<128x512xbf16, #tpu.memory_space<vmem>>, %arg1: memref<512x64xbf16, #tpu.memory_space<vmem>>, %arg2: memref<1x64xf32, #tpu.memory_space<vmem>>, %arg3: memref<1x64xf32, #tpu.memory_space<vmem>>, %arg4: memref<128x64xbf16, #tpu.memory_space<vmem>>) attributes {dimension_semantics = [], scalar_prefetch = 0 : i64, scratch_operands = 0 : i64, tpu.core_type = #tpu.core_type<tc>} {
    %c0 = arith.constant 0 : index
    %c0_0 = arith.constant 0 : index
    %0 = vector.load %arg0[%c0, %c0_0] : memref<128x512xbf16, #tpu.memory_space<vmem>>, vector<128x512xbf16>
    %c0_1 = arith.constant 0 : index
    %c0_2 = arith.constant 0 : index
    %1 = vector.load %arg1[%c0_1, %c0_2] : memref<512x64xbf16, #tpu.memory_space<vmem>>, vector<512x64xbf16>
    %cst = arith.constant dense<0.000000e+00> : vector<128x64xf32>
    %2 = tpu.matmul %0, %1, %cst {dimension_numbers = #tpu.dot_dimension_numbers<[1], [0], [0], [1], [0, 0, 1, 1], [], []>} : vector<128x512xbf16>, vector<512x64xbf16>, vector<128x64xf32> -> vector<128x64xf32>
    %cst_3 = arith.constant 0.00999999977 : f32
    %3 = vector.broadcast %cst_3 : f32 to vector<128x64xf32>
    %4 = arith.mulf %2, %3 : vector<128x64xf32>
    %5 = arith.maximumf %2, %4 : vector<128x64xf32>
    %c0_4 = arith.constant 0 : index
    %c0_5 = arith.constant 0 : index
    %6 = vector.load %arg2[%c0_4, %c0_5] : memref<1x64xf32, #tpu.memory_space<vmem>>, vector<1x64xf32>
    %c0_6 = arith.constant 0 : index
    %c0_7 = arith.constant 0 : index
    %7 = vector.load %arg3[%c0_6, %c0_7] : memref<1x64xf32, #tpu.memory_space<vmem>>, vector<1x64xf32>
    %cst_8 = arith.constant dense<0.000000e+00> : vector<64xf32>
    %8 = vector.multi_reduction <add>, %5, %cst_8 [0] : vector<128x64xf32> to vector<64xf32>
    %9 = vector.shape_cast %8 : vector<64xf32> to vector<1x64xf32>
    %cst_9 = arith.constant 7.812500e-03 : f32
    %10 = vector.broadcast %cst_9 : f32 to vector<1x64xf32>
    %11 = arith.mulf %9, %10 : vector<1x64xf32>
    %12 = arith.mulf %5, %5 : vector<128x64xf32>
    %cst_10 = arith.constant dense<0.000000e+00> : vector<64xf32>
    %13 = vector.multi_reduction <add>, %12, %cst_10 [0] : vector<128x64xf32> to vector<64xf32>
    %14 = vector.shape_cast %13 : vector<64xf32> to vector<1x64xf32>
    %cst_11 = arith.constant 7.812500e-03 : f32
    %15 = vector.broadcast %cst_11 : f32 to vector<1x64xf32>
    %16 = arith.mulf %14, %15 : vector<1x64xf32>
    %17 = arith.mulf %11, %11 : vector<1x64xf32>
    %18 = arith.subf %16, %17 : vector<1x64xf32>
    %cst_12 = arith.constant 9.99999974E-6 : f32
    %19 = vector.broadcast %cst_12 : f32 to vector<1x64xf32>
    %20 = arith.addf %18, %19 : vector<1x64xf32>
    %21 = math.rsqrt %20 : vector<1x64xf32>
    %22 = vector.broadcast %11 : vector<1x64xf32> to vector<128x64xf32>
    %23 = arith.subf %5, %22 : vector<128x64xf32>
    %24 = arith.mulf %21, %6 : vector<1x64xf32>
    %25 = vector.broadcast %24 : vector<1x64xf32> to vector<128x64xf32>
    %26 = arith.mulf %23, %25 : vector<128x64xf32>
    %27 = vector.broadcast %7 : vector<1x64xf32> to vector<128x64xf32>
    %28 = arith.addf %26, %27 : vector<128x64xf32>
    %29 = arith.truncf %28 : vector<128x64xf32> to vector<128x64xbf16>
    %c0_13 = arith.constant 0 : index
    %c0_14 = arith.constant 0 : index
    %30 = vector.load %arg4[%c0_13, %c0_14] : memref<128x64xbf16, #tpu.memory_space<vmem>>, vector<128x64xbf16>
    tpu.vector_store %arg4[%c0_13, %c0_14], %29 {strides = array<i32>} : memref<128x64xbf16, #tpu.memory_space<vmem>>, vector<128x64xbf16>,
    return
  }
}

module attributes {stable_mosaic.version = 11 : i64} {
  func.func @_conv4_bn_head_kernel(%arg0: memref<32x1024xbf16, #tpu.memory_space<vmem>>, %arg1: memref<1024x128xbf16, #tpu.memory_space<vmem>>, %arg2: memref<1x128xf32, #tpu.memory_space<vmem>>, %arg3: memref<1x128xf32, #tpu.memory_space<vmem>>, %arg4: memref<16x128xf32, #tpu.memory_space<vmem>>, %arg5: memref<2x1xf32, #tpu.memory_space<vmem>>) attributes {dimension_semantics = [], scalar_prefetch = 0 : i64, scratch_operands = 0 : i64, tpu.core_type = #tpu.core_type<tc>} {
    %c0 = arith.constant 0 : index
    %c0_0 = arith.constant 0 : index
    %0 = vector.load %arg0[%c0, %c0_0] : memref<32x1024xbf16, #tpu.memory_space<vmem>>, vector<32x1024xbf16>
    %c0_1 = arith.constant 0 : index
    %c0_2 = arith.constant 0 : index
    %1 = vector.load %arg1[%c0_1, %c0_2] : memref<1024x128xbf16, #tpu.memory_space<vmem>>, vector<1024x128xbf16>
    %cst = arith.constant dense<0.000000e+00> : vector<32x128xf32>
    %2 = tpu.matmul %0, %1, %cst {dimension_numbers = #tpu.dot_dimension_numbers<[1], [0], [0], [1], [0, 0, 1, 1], [], []>} : vector<32x1024xbf16>, vector<1024x128xbf16>, vector<32x128xf32> -> vector<32x128xf32>
    %cst_3 = arith.constant 0.00999999977 : f32
    %3 = vector.broadcast %cst_3 : f32 to vector<32x128xf32>
    %4 = arith.mulf %2, %3 : vector<32x128xf32>
    %5 = arith.maximumf %2, %4 : vector<32x128xf32>
    %c0_4 = arith.constant 0 : index
    %c0_5 = arith.constant 0 : index
    %6 = vector.load %arg2[%c0_4, %c0_5] : memref<1x128xf32, #tpu.memory_space<vmem>>, vector<1x128xf32>
    %c0_6 = arith.constant 0 : index
    %c0_7 = arith.constant 0 : index
    %7 = vector.load %arg3[%c0_6, %c0_7] : memref<1x128xf32, #tpu.memory_space<vmem>>, vector<1x128xf32>
    %cst_8 = arith.constant dense<0.000000e+00> : vector<128xf32>
    %8 = vector.multi_reduction <add>, %5, %cst_8 [0] : vector<32x128xf32> to vector<128xf32>
    %9 = vector.shape_cast %8 : vector<128xf32> to vector<1x128xf32>
    %cst_9 = arith.constant 3.125000e-02 : f32
    %10 = vector.broadcast %cst_9 : f32 to vector<1x128xf32>
    %11 = arith.mulf %9, %10 : vector<1x128xf32>
    %12 = arith.mulf %5, %5 : vector<32x128xf32>
    %cst_10 = arith.constant dense<0.000000e+00> : vector<128xf32>
    %13 = vector.multi_reduction <add>, %12, %cst_10 [0] : vector<32x128xf32> to vector<128xf32>
    %14 = vector.shape_cast %13 : vector<128xf32> to vector<1x128xf32>
    %cst_11 = arith.constant 3.125000e-02 : f32
    %15 = vector.broadcast %cst_11 : f32 to vector<1x128xf32>
    %16 = arith.mulf %14, %15 : vector<1x128xf32>
    %17 = arith.mulf %11, %11 : vector<1x128xf32>
    %18 = arith.subf %16, %17 : vector<1x128xf32>
    %cst_12 = arith.constant 9.99999974E-6 : f32
    %19 = vector.broadcast %cst_12 : f32 to vector<1x128xf32>
    %20 = arith.addf %18, %19 : vector<1x128xf32>
    %21 = math.rsqrt %20 : vector<1x128xf32>
    %22 = vector.broadcast %11 : vector<1x128xf32> to vector<32x128xf32>
    %23 = arith.subf %5, %22 : vector<32x128xf32>
    %24 = arith.mulf %21, %6 : vector<1x128xf32>
    %25 = vector.broadcast %24 : vector<1x128xf32> to vector<32x128xf32>
    %26 = arith.mulf %23, %25 : vector<32x128xf32>
    %27 = vector.broadcast %7 : vector<1x128xf32> to vector<32x128xf32>
    %28 = arith.addf %26, %27 : vector<32x128xf32>
    %29 = vector.shape_cast %28 : vector<32x128xf32> to vector<2x16x128xf32>
    %c0_13 = arith.constant 0 : index
    %c0_14 = arith.constant 0 : index
    %30 = vector.load %arg4[%c0_13, %c0_14] : memref<16x128xf32, #tpu.memory_space<vmem>>, vector<16x128xf32>
    %31 = vector.shape_cast %30 : vector<16x128xf32> to vector<1x16x128xf32>
    %32 = vector.broadcast %31 : vector<1x16x128xf32> to vector<2x16x128xf32>
    %33 = arith.mulf %29, %32 : vector<2x16x128xf32>
    %cst_15 = arith.constant dense<0.000000e+00> : vector<2x16xf32>
    %34 = vector.multi_reduction <add>, %33, %cst_15 [2] : vector<2x16x128xf32> to vector<2x16xf32>
    %cst_16 = arith.constant dense<0.000000e+00> : vector<2xf32>
    %35 = vector.multi_reduction <add>, %34, %cst_16 [1] : vector<2x16xf32> to vector<2xf32>
    %36 = vector.shape_cast %35 : vector<2xf32> to vector<2x1xf32>
    %c0_17 = arith.constant 0 : index
    %c0_18 = arith.constant 0 : index
    %37 = vector.load %arg5[%c0_17, %c0_18] : memref<2x1xf32, #tpu.memory_space<vmem>>, vector<2x1xf32>
    tpu.vector_store %arg5[%c0_17, %c0_18], %36 {strides = array<i32>} : memref<2x1xf32, #tpu.memory_space<vmem>>, vector<2x1xf32>,
    return
  }
}

</mosaic_0001>

<bundles_post_ra>
// kernel: discriminator_forward.4
= control target key start
LH: loop header
LB: loop body
LE: loop exit
PB: predicated region body
PF: predicated region fallthrough
CT: control target
= control target key end

     0   :  { %s2153_s9 = smov 0   ;;  %s2574_s0 = inlined_call_operand.vmem [shape: bf16[2048,27], index: 0, kind: input, shape index: {}]   ;;  %s2575_s1 = inlined_call_operand.vmem [shape: bf16[27,16], index: 1, kind: input, shape index: {}]   ;;  %s2576_s2 = inlined_call_operand.vmem [shape: bf16[2048,16], index: 2, kind: output, shape index: {}]  }
   0x1 LB: > { %s1709_s10 = sadd.s32 4294967295, %s2135_s9   ;;  %p1713_p0 = scmp.ge.s32.totalorder %s2135_s9, 1  ;;  %s2135_s9 = sphi %s2153_s9, %s12_s9  }
   0x2   : > { %p113_p1 = scmp.lt.s32.totalorder %s2135_s9, 3 }
   0x4   : > { %p114_p2 = pnand %p1713_p0, %p113_p1 }
   0x5   : > { %s1714_s15 = sshll.u32 (!%p114_p2), %s1709_s10, 7 }
   0x6   : > { %117 = sbr.rel (%p114_p2) target bundleno = 413 (0x19d), region = 28  ;;  %p136_p3 = scmp.lt.s32.totalorder (!%p114_p2), %s1714_s15, 255 }
   0xb   : > { %v1980_v0 = vld [vmem:[%s2575_s1 + $0x8] sm:$0xf]  ;;  %v2113_v1 = vld [vmem:[%s2575_s1 + $0x8] sm:$0x30]  ;;  %vm804_vm0 = vcmask 1044480   ;;  %vm805_vm1 = vcmask 1045504  }
   0xc   : > { %v1981_v2 = vor.u32 %v2113_v1, %v1980_v0  ;;  %v2137_v3 = vmov 65535   ;;  %s2578_s15 = smov (!%p136_p3, %s1714_s15), 255  ;;  %v2112_v7 = vld [vmem:[%s2575_s1] sm:$0xff]  ;;  %vm611_vm2 = vcmask 220160   ;;  %vm1524_vm3 = vcmask 125952  }
   0xd   : > { %v806_v4 = vsel %vm804_vm0, 4294967295, %v2137_v3  ;;  %s1715_s18 = sshll.u32 %s2578_s15, 2 }
   0xe   : > { %v807_v5 = vsel %vm805_vm1, %v806_v4, 0  ;;  %s2178_s21 = scalar_lea.vmem %s2574_s0, %s1715_s18  ;;  %s2255_s24 = scalar_lea.vmem %s2576_s2, %s1715_s18 }
   0xf   : > { %v809_v6 = vand.u32 %v1981_v2, %v807_v5  ;;  %v2048_v8 = vld [vmem:[%s2178_s21] sm:$0xff]  ;;  %v2049_v12 = vld [vmem:[%s2178_s21 + $0x8] sm:$0xff]  ;;  %v2050_v16 = vld [vmem:[%s2178_s21 + $0x10] sm:$0xff] }
  0x10   : > { %v2064_v9 = vld [vmem:[%s2178_s21 + $0x80] sm:$0xff]  ;;  %v2065_v13 = vld [vmem:[%s2178_s21 + $0x88] sm:$0xff]  ;;  %v2066_v17 = vld [vmem:[%s2178_s21 + $0x90] sm:$0xff] }
  0x11   : > { %817 = vmatpush.bf16.msra.mxu0 %v809_v6  ;;  %2114 = vmatpush.bf16.msra.mxu1 %v809_v6  ;;  %v2080_v10 = vld [vmem:[%s2178_s21 + $0x100] sm:$0xff]  ;;  %v2081_v14 = vld [vmem:[%s2178_s21 + $0x108] sm:$0xff]  ;;  %v2082_v18 = vld [vmem:[%s2178_s21 + $0x110] sm:$0xff] }
  0x12   : > { %2115 = vmatpush.bf16.msra.mxu2 %v809_v6  ;;  %2116 = vmatpush.bf16.msra.mxu3 %v809_v6  ;;  %v2096_v11 = vld [vmem:[%s2178_s21 + $0x180] sm:$0xff]  ;;  %v2097_v15 = vld [vmem:[%s2178_s21 + $0x188] sm:$0xff]  ;;  %v2098_v19 = vld [vmem:[%s2178_s21 + $0x190] sm:$0xff] }
  0x13   : > { %v2051_v20 = vld [vmem:[%s2178_s21 + $0x18] sm:$0xff]  ;;  %v2052_v24 = vld [vmem:[%s2178_s21 + $0x20] sm:$0xff]  ;;  %v2053_v28 = vld [vmem:[%s2178_s21 + $0x28] sm:$0xff] }
  0x14   : > { %v2067_v21 = vld [vmem:[%s2178_s21 + $0x98] sm:$0xff]  ;;  %v2068_v25 = vld [vmem:[%s2178_s21 + $0xa0] sm:$0xff]  ;;  %v2069_v29 = vld [vmem:[%s2178_s21 + $0xa8] sm:$0xff] }
  0x15   : > { %818 = vmatpush.bf16.msra.mxu0 %v2112_v7  ;;  %2117 = vmatpush.bf16.msra.mxu1 %v2112_v7  ;;  %v2083_v22 = vld [vmem:[%s2178_s21 + $0x118] sm:$0xff]  ;;  %v2084_v26 = vld [vmem:[%s2178_s21 + $0x120] sm:$0xff]  ;;  %v2085_v30 = vld [vmem:[%s2178_s21 + $0x128] sm:$0xff] }
  0x16   : > { %2118 = vmatpush.bf16.msra.mxu2 %v2112_v7  ;;  %2119 = vmatpush.bf16.msra.mxu3 %v2112_v7  ;;  %v2099_v23 = vld [vmem:[%s2178_s21 + $0x198] sm:$0xff]  ;;  %v2100_v27 = vld [vmem:[%s2178_s21 + $0x1a0] sm:$0xff]  ;;  %v2101_v31 = vld [vmem:[%s2178_s21 + $0x1a8] sm:$0xff] }
  0x17   : > { %v2054_v32 = vld [vmem:[%s2178_s21 + $0x30] sm:$0xff]  ;;  %v2055_v36 = vld [vmem:[%s2178_s21 + $0x38] sm:$0xff]  ;;  %v2056_v40 = vld [vmem:[%s2178_s21 + $0x40] sm:$0xff] }
  0x18   : > { %1982 = vmatmul.msk.bf16.vlgmr.msra.gmra.mxu0 %vm611_vm2, %v2048_v8  ;;  %1998 = vmatmul.msk.bf16.vlgmr.msra.gmra.mxu1 %vm611_vm2, %v2064_v9  ;;  %v2070_v33 = vld [vmem:[%s2178_s21 + $0xb0] sm:$0xff]  ;;  %v2071_v37 = vld [vmem:[%s2178_s21 + $0xb8] sm:$0xff]  ;;  %v2072_v41 = vld [vmem:[%s2178_s21 + $0xc0] sm:$0xff] }
  0x19   : > { %2014 = vmatmul.msk.bf16.vlgmr.msra.gmra.mxu2 %vm611_vm2, %v2080_v10  ;;  %2030 = vmatmul.msk.bf16.vlgmr.msra.gmra.mxu3 %vm611_vm2, %v2096_v11  ;;  %v2086_v34 = vld [vmem:[%s2178_s21 + $0x130] sm:$0xff]  ;;  %v2087_v38 = vld [vmem:[%s2178_s21 + $0x138] sm:$0xff]  ;;  %v2088_v44 = vld [vmem:[%s2178_s21 + $0x140] sm:$0xff] }
  0x1a   : > { %v2102_v35 = vld [vmem:[%s2178_s21 + $0x1b0] sm:$0xff]  ;;  %v2103_v39 = vld [vmem:[%s2178_s21 + $0x1b8] sm:$0xff]  ;;  %v2104_v45 = vld [vmem:[%s2178_s21 + $0x1c0] sm:$0xff] }
  0x1b   : > { %v2057_v4 = vld [vmem:[%s2178_s21 + $0x48] sm:$0xff] }
  0x1c   : > { %v2073_v7 = vld [vmem:[%s2178_s21 + $0xc8] sm:$0xff] }
  0x1d   : > { %v2089_v8 = vld [vmem:[%s2178_s21 + $0x148] sm:$0xff] }
  0x1e   : > { %v2105_v9 = vld [vmem:[%s2178_s21 + $0x1c8] sm:$0xff] }
  0x28   : > { %1983 = vmatmul.msk.bf16.gmra.mxu0 %vm611_vm2, %v2049_v12  ;;  %1999 = vmatmul.msk.bf16.gmra.mxu1 %vm611_vm2, %v2065_v13 }
  0x29   : > { %2015 = vmatmul.msk.bf16.gmra.mxu2 %vm611_vm2, %v2081_v14  ;;  %2031 = vmatmul.msk.bf16.gmra.mxu3 %vm611_vm2, %v2097_v15 }
  0x38   : > { %1984 = vmatmul.msk.bf16.gmra.mxu0 %vm611_vm2, %v2050_v16  ;;  %2000 = vmatmul.msk.bf16.gmra.mxu1 %vm611_vm2, %v2066_v17 }
  0x39   : > { %2016 = vmatmul.msk.bf16.gmra.mxu2 %vm611_vm2, %v2082_v18  ;;  %2032 = vmatmul.msk.bf16.gmra.mxu3 %vm611_vm2, %v2098_v19 }
  0x48   : > { %1985 = vmatmul.msk.bf16.gmra.mxu0 %vm611_vm2, %v2051_v20  ;;  %2001 = vmatmul.msk.bf16.gmra.mxu1 %vm611_vm2, %v2067_v21 }
  0x49   : > { %2017 = vmatmul.msk.bf16.gmra.mxu2 %vm611_vm2, %v2083_v22  ;;  %2033 = vmatmul.msk.bf16.gmra.mxu3 %vm611_vm2, %v2099_v23 }
  0x58   : > { %1986 = vmatmul.msk.bf16.gmra.mxu0 %vm611_vm2, %v2052_v24  ;;  %2002 = vmatmul.msk.bf16.gmra.mxu1 %vm611_vm2, %v2068_v25 }
  0x59   : > { %2018 = vmatmul.msk.bf16.gmra.mxu2 %vm611_vm2, %v2084_v26  ;;  %2034 = vmatmul.msk.bf16.gmra.mxu3 %vm611_vm2, %v2100_v27 }
  0x68   : > { %1987 = vmatmul.msk.bf16.gmra.mxu0 %vm611_vm2, %v2053_v28  ;;  %2003 = vmatmul.msk.bf16.gmra.mxu1 %vm611_vm2, %v2069_v29 }
  0x69   : > { %2019 = vmatmul.msk.bf16.gmra.mxu2 %vm611_vm2, %v2085_v30  ;;  %2035 = vmatmul.msk.bf16.gmra.mxu3 %vm611_vm2, %v2101_v31 }
  0x78   : > { %1988 = vmatmul.msk.bf16.gmra.mxu0 %vm611_vm2, %v2054_v32  ;;  %2004 = vmatmul.msk.bf16.gmra.mxu1 %vm611_vm2, %v2070_v33 }
  0x79   : > { %2020 = vmatmul.msk.bf16.gmra.mxu2 %vm611_vm2, %v2086_v34  ;;  %2036 = vmatmul.msk.bf16.gmra.mxu3 %vm611_vm2, %v2102_v35 }
  0x88   : > { %1989 = vmatmul.msk.bf16.gmra.mxu0 %vm611_vm2, %v2055_v36  ;;  %2005 = vmatmul.msk.bf16.gmra.mxu1 %vm611_vm2, %v2071_v37 }
  0x89   : > { %2021 = vmatmul.msk.bf16.gmra.mxu2 %vm611_vm2, %v2087_v38  ;;  %2037 = vmatmul.msk.bf16.gmra.mxu3 %vm611_vm2, %v2103_v39 }
  0x95   : > { %v820_v42 = vpop.f32.mrf.mxu0  ;;  %v900_v43 = vpop.f32.mrf.mxu1 }
  0x96   : > { %v1140_v46 = vmul.f32 0.01, %v820_v42  ;;  %v1172_v47 = vmul.f32 0.01, %v900_v43 }
  0x98   : > { %v1268_v48 = vmax.f32 %v820_v42, %v1140_v46  ;;  %v1300_v49 = vmax.f32 %v900_v43, %v1172_v47  ;;  %1990 = vmatmul.msk.bf16.gmra.mxu0 %vm611_vm2, %v2056_v40  ;;  %2006 = vmatmul.msk.bf16.gmra.mxu1 %vm611_vm2, %v2072_v41  ;;  %v2058_v40 = vld [vmem:[%s2178_s21 + $0x50] sm:$0xff] }
  0x99   : > { %2022 = vmatmul.msk.bf16.gmra.mxu2 %vm611_vm2, %v2088_v44  ;;  %2038 = vmatmul.msk.bf16.gmra.mxu3 %vm611_vm2, %v2104_v45  ;;  %v2074_v43 = vld [vmem:[%s2178_s21 + $0xd0] sm:$0xff] }
  0x9a   : > { %v1396_v50 = vpack.c.bf16 %v1268_v48, %v1268_v48  ;;  %v1428_v51 = vpack.c.bf16 %v1300_v49, %v1300_v49  ;;  %v2090_v44 = vld [vmem:[%s2178_s21 + $0x150] sm:$0xff] }
  0x9b   : > { %v2106_v45 = vld [vmem:[%s2178_s21 + $0x1d0] sm:$0xff] }
  0x9c   : > { %1525 = vst.msk [vmem:[%s2255_s24] sm:$0xf] %vm1524_vm3, %v1396_v50  ;;  %v980_v52 = vpop.f32.mrf.mxu2  ;;  %v1060_v53 = vpop.f32.mrf.mxu3 }
  0x9d   : > { %1557 = vst.msk [vmem:[%s2255_s24 + $0x80] sm:$0xf] %vm1524_vm3, %v1428_v51  ;;  %v1204_v54 = vmul.f32 0.01, %v980_v52  ;;  %v1236_v55 = vmul.f32 0.01, %v1060_v53  ;;  %v822_v56 = vpop.f32.mrf.mxu0  ;;  %v902_v57 = vpop.f32.mrf.mxu1 }
  0x9e   : > { %v1141_v58 = vmul.f32 0.01, %v822_v56  ;;  %v1173_v59 = vmul.f32 0.01, %v902_v57 }
  0x9f   : > { %v1332_v60 = vmax.f32 %v980_v52, %v1204_v54  ;;  %v1364_v61 = vmax.f32 %v1060_v53, %v1236_v55 }
  0xa0   : > { %v1269_v62 = vmax.f32 %v822_v56, %v1141_v58  ;;  %v1301_v63 = vmax.f32 %v902_v57, %v1173_v59 }
  0xa1   : > { %v1460_v0 = vpack.c.bf16 %v1332_v60, %v1332_v60  ;;  %v1492_v1 = vpack.c.bf16 %v1364_v61, %v1364_v61 }
  0xa2   : > { %v1397_v2 = vpack.c.bf16 %v1269_v62, %v1269_v62  ;;  %v1429_v3 = vpack.c.bf16 %v1301_v63, %v1301_v63 }
  0xa3   : > { %1589 = vst.msk [vmem:[%s2255_s24 + $0x100] sm:$0xf] %vm1524_vm3, %v1460_v0 }
  0xa4   : > { %1621 = vst.msk [vmem:[%s2255_s24 + $0x180] sm:$0xf] %vm1524_vm3, %v1492_v1  ;;  %v982_v5 = vpop.f32.mrf.mxu2  ;;  %v1062_v6 = vpop.f32.mrf.mxu3 }
  0xa5   : > { %1526 = vst.msk [vmem:[%s2255_s24 + $0x4] sm:$0xf] %vm1524_vm3, %v1397_v2  ;;  %v1205_v10 = vmul.f32 0.01, %v982_v5  ;;  %v1237_v11 = vmul.f32 0.01, %v1062_v6  ;;  %v825_v12 = vpop.f32.mrf.mxu0  ;;  %v905_v13 = vpop.f32.mrf.mxu1 }
  0xa6   : > { %1558 = vst.msk [vmem:[%s2255_s24 + $0x84] sm:$0xf] %vm1524_vm3, %v1429_v3  ;;  %v1142_v14 = vmul.f32 0.01, %v825_v12  ;;  %v1174_v15 = vmul.f32 0.01, %v905_v13 }
  0xa7   : > { %v1333_v16 = vmax.f32 %v982_v5, %v1205_v10  ;;  %v1365_v17 = vmax.f32 %v1062_v6, %v1237_v11 }
  0xa8   : > { %v1270_v18 = vmax.f32 %v825_v12, %v1142_v14  ;;  %v1302_v19 = vmax.f32 %v905_v13, %v1174_v15  ;;  %1991 = vmatmul.msk.bf16.gmra.mxu0 %vm611_vm2, %v2057_v4  ;;  %2007 = vmatmul.msk.bf16.gmra.mxu1 %vm611_vm2, %v2073_v7  ;;  %v2059_v12 = vld [vmem:[%s2178_s21 + $0x58] sm:$0xff] }
  0xa9   : > { %v1461_v20 = vpack.c.bf16 %v1333_v16, %v1333_v16  ;;  %v1493_v21 = vpack.c.bf16 %v1365_v17, %v1365_v17  ;;  %2023 = vmatmul.msk.bf16.gmra.mxu2 %vm611_vm2, %v2089_v8  ;;  %2039 = vmatmul.msk.bf16.gmra.mxu3 %vm611_vm2, %v2105_v9  ;;  %v2075_v15 = vld [vmem:[%s2178_s21 + $0xd8] sm:$0xff] }
  0xaa   : > { %v1398_v22 = vpack.c.bf16 %v1270_v18, %v1270_v18  ;;  %v1430_v23 = vpack.c.bf16 %v1302_v19, %v1302_v19  ;;  %v2091_v16 = vld [vmem:[%s2178_s21 + $0x158] sm:$0xff] }
  0xab   : > { %1590 = vst.msk [vmem:[%s2255_s24 + $0x104] sm:$0xf] %vm1524_vm3, %v1461_v20  ;;  %v2107_v17 = vld [vmem:[%s2178_s21 + $0x1d8] sm:$0xff] }
  0xac   : > { %1622 = vst.msk [vmem:[%s2255_s24 + $0x184] sm:$0xf] %vm1524_vm3, %v1493_v21  ;;  %v985_v24 = vpop.f32.mrf.mxu2  ;;  %v1065_v25 = vpop.f32.mrf.mxu3 }
  0xad   : > { %1527 = vst.msk [vmem:[%s2255_s24 + $0x8] sm:$0xf] %vm1524_vm3, %v1398_v22  ;;  %v1206_v26 = vmul.f32 0.01, %v985_v24  ;;  %v1238_v27 = vmul.f32 0.01, %v1065_v25  ;;  %v827_v28 = vpop.f32.mrf.mxu0  ;;  %v907_v29 = vpop.f32.mrf.mxu1 }
  0xae   : > { %1559 = vst.msk [vmem:[%s2255_s24 + $0x88] sm:$0xf] %vm1524_vm3, %v1430_v23  ;;  %v1143_v30 = vmul.f32 0.01, %v827_v28  ;;  %v1175_v31 = vmul.f32 0.01, %v907_v29 }
  0xaf   : > { %v1334_v32 = vmax.f32 %v985_v24, %v1206_v26  ;;  %v1366_v33 = vmax.f32 %v1065_v25, %v1238_v27 }
  0xb0   : > { %v1271_v34 = vmax.f32 %v827_v28, %v1143_v30  ;;  %v1303_v35 = vmax.f32 %v907_v29, %v1175_v31 }
  0xb1   : > { %v1462_v36 = vpack.c.bf16 %v1334_v32, %v1334_v32  ;;  %v1494_v37 = vpack.c.bf16 %v1366_v33, %v1366_v33 }
  0xb2   : > { %v1399_v38 = vpack.c.bf16 %v1271_v34, %v1271_v34  ;;  %v1431_v39 = vpack.c.bf16 %v1303_v35, %v1303_v35 }
  0xb3   : > { %1591 = vst.msk [vmem:[%s2255_s24 + $0x108] sm:$0xf] %vm1524_vm3, %v1462_v36 }
  0xb4   : > { %1623 = vst.msk [vmem:[%s2255_s24 + $0x188] sm:$0xf] %vm1524_vm3, %v1494_v37  ;;  %v987_v41 = vpop.f32.mrf.mxu2  ;;  %v1067_v42 = vpop.f32.mrf.mxu3 }
  0xb5   : > { %1528 = vst.msk [vmem:[%s2255_s24 + $0xc] sm:$0xf] %vm1524_vm3, %v1399_v38  ;;  %v1207_v46 = vmul.f32 0.01, %v987_v41  ;;  %v1239_v47 = vmul.f32 0.01, %v1067_v42  ;;  %v830_v48 = vpop.f32.mrf.mxu0  ;;  %v910_v49 = vpop.f32.mrf.mxu1 }
  0xb6   : > { %1560 = vst.msk [vmem:[%s2255_s24 + $0x8c] sm:$0xf] %vm1524_vm3, %v1431_v39  ;;  %v1144_v50 = vmul.f32 0.01, %v830_v48  ;;  %v1176_v51 = vmul.f32 0.01, %v910_v49 }
  0xb7   : > { %v1335_v52 = vmax.f32 %v987_v41, %v1207_v46  ;;  %v1367_v53 = vmax.f32 %v1067_v42, %v1239_v47 }
  0xb8   : > { %v1272_v54 = vmax.f32 %v830_v48, %v1144_v50  ;;  %v1304_v55 = vmax.f32 %v910_v49, %v1176_v51  ;;  %1992 = vmatmul.msk.bf16.gmra.mxu0 %vm611_vm2, %v2058_v40  ;;  %2008 = vmatmul.msk.bf16.gmra.mxu1 %vm611_vm2, %v2074_v43  ;;  %v2060_v48 = vld [vmem:[%s2178_s21 + $0x60] sm:$0xff] }
  0xb9   : > { %v1463_v56 = vpack.c.bf16 %v1335_v52, %v1335_v52  ;;  %v1495_v57 = vpack.c.bf16 %v1367_v53, %v1367_v53  ;;  %2024 = vmatmul.msk.bf16.gmra.mxu2 %vm611_vm2, %v2090_v44  ;;  %2040 = vmatmul.msk.bf16.gmra.mxu3 %vm611_vm2, %v2106_v45  ;;  %v2076_v51 = vld [vmem:[%s2178_s21 + $0xe0] sm:$0xff] }
  0xba   : > { %v1400_v58 = vpack.c.bf16 %v1272_v54, %v1272_v54  ;;  %v1432_v59 = vpack.c.bf16 %v1304_v55, %v1304_v55  ;;  %v2092_v52 = vld [vmem:[%s2178_s21 + $0x160] sm:$0xff] }
  0xbb   : > { %1592 = vst.msk [vmem:[%s2255_s24 + $0x10c] sm:$0xf] %vm1524_vm3, %v1463_v56  ;;  %v2108_v53 = vld [vmem:[%s2178_s21 + $0x1e0] sm:$0xff] }
  0xbc   : > { %1624 = vst.msk [vmem:[%s2255_s24 + $0x18c] sm:$0xf] %vm1524_vm3, %v1495_v57  ;;  %v990_v60 = vpop.f32.mrf.mxu2  ;;  %v1070_v61 = vpop.f32.mrf.mxu3 }
  0xbd   : > { %1529 = vst.msk [vmem:[%s2255_s24 + $0x10] sm:$0xf] %vm1524_vm3, %v1400_v58  ;;  %v1208_v62 = vmul.f32 0.01, %v990_v60  ;;  %v1240_v63 = vmul.f32 0.01, %v1070_v61  ;;  %v832_v0 = vpop.f32.mrf.mxu0  ;;  %v912_v1 = vpop.f32.mrf.mxu1 }
  0xbe   : > { %1561 = vst.msk [vmem:[%s2255_s24 + $0x90] sm:$0xf] %vm1524_vm3, %v1432_v59  ;;  %v1145_v2 = vmul.f32 0.01, %v832_v0  ;;  %v1177_v3 = vmul.f32 0.01, %v912_v1 }
  0xbf   : > { %v1336_v4 = vmax.f32 %v990_v60, %v1208_v62  ;;  %v1368_v5 = vmax.f32 %v1070_v61, %v1240_v63 }
  0xc0   : > { %v1273_v6 = vmax.f32 %v832_v0, %v1145_v2  ;;  %v1305_v7 = vmax.f32 %v912_v1, %v1177_v3 }
  0xc1   : > { %v1464_v8 = vpack.c.bf16 %v1336_v4, %v1336_v4  ;;  %v1496_v9 = vpack.c.bf16 %v1368_v5, %v1368_v5 }
  0xc2   : > { %v1401_v10 = vpack.c.bf16 %v1273_v6, %v1273_v6  ;;  %v1433_v11 = vpack.c.bf16 %v1305_v7, %v1305_v7 }
  0xc3   : > { %1593 = vst.msk [vmem:[%s2255_s24 + $0x110] sm:$0xf] %vm1524_vm3, %v1464_v8 }
  0xc4   : > { %1625 = vst.msk [vmem:[%s2255_s24 + $0x190] sm:$0xf] %vm1524_vm3, %v1496_v9  ;;  %v992_v13 = vpop.f32.mrf.mxu2  ;;  %v1072_v14 = vpop.f32.mrf.mxu3 }
  0xc5   : > { %1530 = vst.msk [vmem:[%s2255_s24 + $0x14] sm:$0xf] %vm1524_vm3, %v1401_v10  ;;  %v1209_v18 = vmul.f32 0.01, %v992_v13  ;;  %v1241_v19 = vmul.f32 0.01, %v1072_v14  ;;  %v835_v20 = vpop.f32.mrf.mxu0  ;;  %v915_v21 = vpop.f32.mrf.mxu1 }
  0xc6   : > { %1562 = vst.msk [vmem:[%s2255_s24 + $0x94] sm:$0xf] %vm1524_vm3, %v1433_v11  ;;  %v1146_v22 = vmul.f32 0.01, %v835_v20  ;;  %v1178_v23 = vmul.f32 0.01, %v915_v21 }
  0xc7   : > { %v1337_v24 = vmax.f32 %v992_v13, %v1209_v18  ;;  %v1369_v25 = vmax.f32 %v1072_v14, %v1241_v19 }
  0xc8   : > { %v1274_v26 = vmax.f32 %v835_v20, %v1146_v22  ;;  %v1306_v27 = vmax.f32 %v915_v21, %v1178_v23  ;;  %1993 = vmatmul.msk.bf16.gmra.mxu0 %vm611_vm2, %v2059_v12  ;;  %2009 = vmatmul.msk.bf16.gmra.mxu1 %vm611_vm2, %v2075_v15  ;;  %v2061_v20 = vld [vmem:[%s2178_s21 + $0x68] sm:$0xff] }
  0xc9   : > { %v1465_v28 = vpack.c.bf16 %v1337_v24, %v1337_v24  ;;  %v1497_v29 = vpack.c.bf16 %v1369_v25, %v1369_v25  ;;  %2025 = vmatmul.msk.bf16.gmra.mxu2 %vm611_vm2, %v2091_v16  ;;  %2041 = vmatmul.msk.bf16.gmra.mxu3 %vm611_vm2, %v2107_v17  ;;  %v2077_v23 = vld [vmem:[%s2178_s21 + $0xe8] sm:$0xff] }
  0xca   : > { %v1402_v30 = vpack.c.bf16 %v1274_v26, %v1274_v26  ;;  %v1434_v31 = vpack.c.bf16 %v1306_v27, %v1306_v27  ;;  %v2093_v24 = vld [vmem:[%s2178_s21 + $0x168] sm:$0xff] }
  0xcb   : > { %1594 = vst.msk [vmem:[%s2255_s24 + $0x114] sm:$0xf] %vm1524_vm3, %v1465_v28  ;;  %v2109_v25 = vld [vmem:[%s2178_s21 + $0x1e8] sm:$0xff] }
  0xcc   : > { %1626 = vst.msk [vmem:[%s2255_s24 + $0x194] sm:$0xf] %vm1524_vm3, %v1497_v29  ;;  %v995_v32 = vpop.f32.mrf.mxu2  ;;  %v1075_v33 = vpop.f32.mrf.mxu3 }
  0xcd   : > { %1531 = vst.msk [vmem:[%s2255_s24 + $0x18] sm:$0xf] %vm1524_vm3, %v1402_v30  ;;  %v1210_v34 = vmul.f32 0.01, %v995_v32  ;;  %v1242_v35 = vmul.f32 0.01, %v1075_v33  ;;  %v837_v36 = vpop.f32.mrf.mxu0  ;;  %v917_v37 = vpop.f32.mrf.mxu1 }
  0xce   : > { %1563 = vst.msk [vmem:[%s2255_s24 + $0x98] sm:$0xf] %vm1524_vm3, %v1434_v31  ;;  %v1147_v38 = vmul.f32 0.01, %v837_v36  ;;  %v1179_v39 = vmul.f32 0.01, %v917_v37 }
  0xcf   : > { %v1338_v40 = vmax.f32 %v995_v32, %v1210_v34  ;;  %v1370_v41 = vmax.f32 %v1075_v33, %v1242_v35 }
  0xd0   : > { %v1275_v42 = vmax.f32 %v837_v36, %v1147_v38  ;;  %v1307_v43 = vmax.f32 %v917_v37, %v1179_v39 }
  0xd1   : > { %v1466_v44 = vpack.c.bf16 %v1338_v40, %v1338_v40  ;;  %v1498_v45 = vpack.c.bf16 %v1370_v41, %v1370_v41 }
  0xd2   : > { %v1403_v46 = vpack.c.bf16 %v1275_v42, %v1275_v42  ;;  %v1435_v47 = vpack.c.bf16 %v1307_v43, %v1307_v43 }
  0xd3   : > { %1595 = vst.msk [vmem:[%s2255_s24 + $0x118] sm:$0xf] %vm1524_vm3, %v1466_v44 }
  0xd4   : > { %1627 = vst.msk [vmem:[%s2255_s24 + $0x198] sm:$0xf] %vm1524_vm3, %v1498_v45  ;;  %v997_v49 = vpop.f32.mrf.mxu2  ;;  %v1077_v50 = vpop.f32.mrf.mxu3 }
  0xd5   : > { %1532 = vst.msk [vmem:[%s2255_s24 + $0x1c] sm:$0xf] %vm1524_vm3, %v1403_v46  ;;  %v1211_v54 = vmul.f32 0.01, %v997_v49  ;;  %v1243_v55 = vmul.f32 0.01, %v1077_v50  ;;  %v840_v56 = vpop.f32.mrf.mxu0  ;;  %v920_v57 = vpop.f32.mrf.mxu1 }
  0xd6   : > { %1564 = vst.msk [vmem:[%s2255_s24 + $0x9c] sm:$0xf] %vm1524_vm3, %v1435_v47  ;;  %v1148_v58 = vmul.f32 0.01, %v840_v56  ;;  %v1180_v59 = vmul.f32 0.01, %v920_v57 }
  0xd7   : > { %v1339_v60 = vmax.f32 %v997_v49, %v1211_v54  ;;  %v1371_v61 = vmax.f32 %v1077_v50, %v1243_v55 }
  0xd8   : > { %v1276_v62 = vmax.f32 %v840_v56, %v1148_v58  ;;  %v1308_v63 = vmax.f32 %v920_v57, %v1180_v59  ;;  %1994 = vmatmul.msk.bf16.gmra.mxu0 %vm611_vm2, %v2060_v48  ;;  %2010 = vmatmul.msk.bf16.gmra.mxu1 %vm611_vm2, %v2076_v51  ;;  %v2062_v56 = vld [vmem:[%s2178_s21 + $0x70] sm:$0xff] }
  0xd9   : > { %v1467_v0 = vpack.c.bf16 %v1339_v60, %v1339_v60  ;;  %v1499_v1 = vpack.c.bf16 %v1371_v61, %v1371_v61  ;;  %2026 = vmatmul.msk.bf16.gmra.mxu2 %vm611_vm2, %v2092_v52  ;;  %2042 = vmatmul.msk.bf16.gmra.mxu3 %vm611_vm2, %v2108_v53  ;;  %v2078_v59 = vld [vmem:[%s2178_s21 + $0xf0] sm:$0xff] }
  0xda   : > { %v1404_v2 = vpack.c.bf16 %v1276_v62, %v1276_v62  ;;  %v1436_v3 = vpack.c.bf16 %v1308_v63, %v1308_v63  ;;  %v2094_v60 = vld [vmem:[%s2178_s21 + $0x170] sm:$0xff] }
  0xdb   : > { %1596 = vst.msk [vmem:[%s2255_s24 + $0x11c] sm:$0xf] %vm1524_vm3, %v1467_v0  ;;  %v2110_v61 = vld [vmem:[%s2178_s21 + $0x1f0] sm:$0xff] }
  0xdc   : > { %1628 = vst.msk [vmem:[%s2255_s24 + $0x19c] sm:$0xf] %vm1524_vm3, %v1499_v1  ;;  %v1000_v4 = vpop.f32.mrf.mxu2  ;;  %v1080_v5 = vpop.f32.mrf.mxu3 }
  0xdd   : > { %1533 = vst.msk [vmem:[%s2255_s24 + $0x20] sm:$0xf] %vm1524_vm3, %v1404_v2  ;;  %v1212_v6 = vmul.f32 0.01, %v1000_v4  ;;  %v1244_v7 = vmul.f32 0.01, %v1080_v5  ;;  %v842_v8 = vpop.f32.mrf.mxu0  ;;  %v922_v9 = vpop.f32.mrf.mxu1 }
  0xde   : > { %1565 = vst.msk [vmem:[%s2255_s24 + $0xa0] sm:$0xf] %vm1524_vm3, %v1436_v3  ;;  %v1149_v10 = vmul.f32 0.01, %v842_v8  ;;  %v1181_v11 = vmul.f32 0.01, %v922_v9 }
  0xdf   : > { %v1340_v12 = vmax.f32 %v1000_v4, %v1212_v6  ;;  %v1372_v13 = vmax.f32 %v1080_v5, %v1244_v7 }
  0xe0   : > { %v1277_v14 = vmax.f32 %v842_v8, %v1149_v10  ;;  %v1309_v15 = vmax.f32 %v922_v9, %v1181_v11 }
  0xe1   : > { %v1468_v16 = vpack.c.bf16 %v1340_v12, %v1340_v12  ;;  %v1500_v17 = vpack.c.bf16 %v1372_v13, %v1372_v13 }
  0xe2   : > { %v1405_v18 = vpack.c.bf16 %v1277_v14, %v1277_v14  ;;  %v1437_v19 = vpack.c.bf16 %v1309_v15, %v1309_v15 }
  0xe3   : > { %1597 = vst.msk [vmem:[%s2255_s24 + $0x120] sm:$0xf] %vm1524_vm3, %v1468_v16 }
  0xe4   : > { %1629 = vst.msk [vmem:[%s2255_s24 + $0x1a0] sm:$0xf] %vm1524_vm3, %v1500_v17  ;;  %v1002_v21 = vpop.f32.mrf.mxu2  ;;  %v1082_v22 = vpop.f32.mrf.mxu3 }
  0xe5   : > { %1534 = vst.msk [vmem:[%s2255_s24 + $0x24] sm:$0xf] %vm1524_vm3, %v1405_v18  ;;  %v1213_v26 = vmul.f32 0.01, %v1002_v21  ;;  %v1245_v27 = vmul.f32 0.01, %v1082_v22  ;;  %v845_v28 = vpop.f32.mrf.mxu0  ;;  %v925_v29 = vpop.f32.mrf.mxu1 }
  0xe6   : > { %1566 = vst.msk [vmem:[%s2255_s24 + $0xa4] sm:$0xf] %vm1524_vm3, %v1437_v19  ;;  %v1150_v30 = vmul.f32 0.01, %v845_v28  ;;  %v1182_v31 = vmul.f32 0.01, %v925_v29 }
  0xe7   : > { %v1341_v32 = vmax.f32 %v1002_v21, %v1213_v26  ;;  %v1373_v33 = vmax.f32 %v1082_v22, %v1245_v27 }
  0xe8   : > { %v1278_v34 = vmax.f32 %v845_v28, %v1150_v30  ;;  %v1310_v35 = vmax.f32 %v925_v29, %v1182_v31  ;;  %1995 = vmatmul.msk.bf16.gmra.mxu0 %vm611_vm2, %v2061_v20  ;;  %2011 = vmatmul.msk.bf16.gmra.mxu1 %vm611_vm2, %v2077_v23  ;;  %v2063_v28 = vld [vmem:[%s2178_s21 + $0x78] sm:$0xff] }
  0xe9   : > { %v1469_v36 = vpack.c.bf16 %v1341_v32, %v1341_v32  ;;  %v1501_v37 = vpack.c.bf16 %v1373_v33, %v1373_v33  ;;  %2027 = vmatmul.msk.bf16.gmra.mxu2 %vm611_vm2, %v2093_v24  ;;  %2043 = vmatmul.msk.bf16.gmra.mxu3 %vm611_vm2, %v2109_v25  ;;  %v2079_v31 = vld [vmem:[%s2178_s21 + $0xf8] sm:$0xff] }
  0xea   : > { %v1406_v38 = vpack.c.bf16 %v1278_v34, %v1278_v34  ;;  %v1438_v39 = vpack.c.bf16 %v1310_v35, %v1310_v35  ;;  %v2095_v32 = vld [vmem:[%s2178_s21 + $0x178] sm:$0xff] }
  0xeb   : > { %1598 = vst.msk [vmem:[%s2255_s24 + $0x124] sm:$0xf] %vm1524_vm3, %v1469_v36  ;;  %v2111_v33 = vld [vmem:[%s2178_s21 + $0x1f8] sm:$0xff] }
  0xec   : > { %1630 = vst.msk [vmem:[%s2255_s24 + $0x1a4] sm:$0xf] %vm1524_vm3, %v1501_v37  ;;  %v1005_v40 = vpop.f32.mrf.mxu2  ;;  %v1085_v41 = vpop.f32.mrf.mxu3 }
  0xed   : > { %1535 = vst.msk [vmem:[%s2255_s24 + $0x28] sm:$0xf] %vm1524_vm3, %v1406_v38  ;;  %v1214_v42 = vmul.f32 0.01, %v1005_v40  ;;  %v1246_v43 = vmul.f32 0.01, %v1085_v41  ;;  %v847_v44 = vpop.f32.mrf.mxu0  ;;  %v927_v45 = vpop.f32.mrf.mxu1 }
  0xee   : > { %1567 = vst.msk [vmem:[%s2255_s24 + $0xa8] sm:$0xf] %vm1524_vm3, %v1438_v39  ;;  %v1151_v46 = vmul.f32 0.01, %v847_v44  ;;  %v1183_v47 = vmul.f32 0.01, %v927_v45 }
  0xef   : > { %v1342_v48 = vmax.f32 %v1005_v40, %v1214_v42  ;;  %v1374_v49 = vmax.f32 %v1085_v41, %v1246_v43 }
  0xf0   : > { %v1279_v50 = vmax.f32 %v847_v44, %v1151_v46  ;;  %v1311_v51 = vmax.f32 %v927_v45, %v1183_v47 }
  0xf1   : > { %v1470_v52 = vpack.c.bf16 %v1342_v48, %v1342_v48  ;;  %v1502_v53 = vpack.c.bf16 %v1374_v49, %v1374_v49 }
  0xf2   : > { %v1407_v54 = vpack.c.bf16 %v1279_v50, %v1279_v50  ;;  %v1439_v55 = vpack.c.bf16 %v1311_v51, %v1311_v51 }
  0xf3   : > { %1599 = vst.msk [vmem:[%s2255_s24 + $0x128] sm:$0xf] %vm1524_vm3, %v1470_v52 }
  0xf4   : > { %1631 = vst.msk [vmem:[%s2255_s24 + $0x1a8] sm:$0xf] %vm1524_vm3, %v1502_v53  ;;  %v1007_v57 = vpop.f32.mrf.mxu2  ;;  %v1087_v58 = vpop.f32.mrf.mxu3 }
  0xf5   : > { %1536 = vst.msk [vmem:[%s2255_s24 + $0x2c] sm:$0xf] %vm1524_vm3, %v1407_v54  ;;  %v1215_v62 = vmul.f32 0.01, %v1007_v57  ;;  %v1247_v63 = vmul.f32 0.01, %v1087_v58  ;;  %v850_v0 = vpop.f32.mrf.mxu0  ;;  %v930_v1 = vpop.f32.mrf.mxu1 }
  0xf6   : > { %1568 = vst.msk [vmem:[%s2255_s24 + $0xac] sm:$0xf] %vm1524_vm3, %v1439_v55  ;;  %v1152_v2 = vmul.f32 0.01, %v850_v0  ;;  %v1184_v3 = vmul.f32 0.01, %v930_v1 }
  0xf7   : > { %v1343_v4 = vmax.f32 %v1007_v57, %v1215_v62  ;;  %v1375_v5 = vmax.f32 %v1087_v58, %v1247_v63 }
  0xf8   : > { %v1280_v6 = vmax.f32 %v850_v0, %v1152_v2  ;;  %v1312_v7 = vmax.f32 %v930_v1, %v1184_v3  ;;  %1996 = vmatmul.msk.bf16.gmra.mxu0 %vm611_vm2, %v2062_v56  ;;  %2012 = vmatmul.msk.bf16.gmra.mxu1 %vm611_vm2, %v2078_v59 }
  0xf9   : > { %v1471_v8 = vpack.c.bf16 %v1343_v4, %v1343_v4  ;;  %v1503_v9 = vpack.c.bf16 %v1375_v5, %v1375_v5  ;;  %2028 = vmatmul.msk.bf16.gmra.mxu2 %vm611_vm2, %v2094_v60  ;;  %2044 = vmatmul.msk.bf16.gmra.mxu3 %vm611_vm2, %v2110_v61 }
  0xfa   : > { %v1408_v10 = vpack.c.bf16 %v1280_v6, %v1280_v6  ;;  %v1440_v11 = vpack.c.bf16 %v1312_v7, %v1312_v7 }
  0xfb   : > { %1600 = vst.msk [vmem:[%s2255_s24 + $0x12c] sm:$0xf] %vm1524_vm3, %v1471_v8 }
  0xfc   : > { %1632 = vst.msk [vmem:[%s2255_s24 + $0x1ac] sm:$0xf] %vm1524_vm3, %v1503_v9  ;;  %v1010_v12 = vpop.f32.mrf.mxu2  ;;  %v1090_v13 = vpop.f32.mrf.mxu3 }
  0xfd   : > { %1537 = vst.msk [vmem:[%s2255_s24 + $0x30] sm:$0xf] %vm1524_vm3, %v1408_v10  ;;  %v1216_v14 = vmul.f32 0.01, %v1010_v12  ;;  %v1248_v15 = vmul.f32 0.01, %v1090_v13  ;;  %v852_v16 = vpop.f32.mrf.mxu0  ;;  %v932_v17 = vpop.f32.mrf.mxu1 }
  0xfe   : > { %1569 = vst.msk [vmem:[%s2255_s24 + $0xb0] sm:$0xf] %vm1524_vm3, %v1440_v11  ;;  %v1153_v18 = vmul.f32 0.01, %v852_v16  ;;  %v1185_v19 = vmul.f32 0.01, %v932_v17 }
  0xff   : > { %v1344_v20 = vmax.f32 %v1010_v12, %v1216_v14  ;;  %v1376_v21 = vmax.f32 %v1090_v13, %v1248_v15 }
 0x100   : > { %v1281_v22 = vmax.f32 %v852_v16, %v1153_v18  ;;  %v1313_v23 = vmax.f32 %v932_v17, %v1185_v19 }
 0x101   : > { %v1472_v24 = vpack.c.bf16 %v1344_v20, %v1344_v20  ;;  %v1504_v25 = vpack.c.bf16 %v1376_v21, %v1376_v21 }
 0x102   : > { %v1409_v26 = vpack.c.bf16 %v1281_v22, %v1281_v22  ;;  %v1441_v27 = vpack.c.bf16 %v1313_v23, %v1313_v23 }
 0x103   : > { %1601 = vst.msk [vmem:[%s2255_s24 + $0x130] sm:$0xf] %vm1524_vm3, %v1472_v24 }
 0x104   : > { %1633 = vst.msk [vmem:[%s2255_s24 + $0x1b0] sm:$0xf] %vm1524_vm3, %v1504_v25  ;;  %v1012_v29 = vpop.f32.mrf.mxu2  ;;  %v1092_v30 = vpop.f32.mrf.mxu3 }
 0x105   : > { %1538 = vst.msk [vmem:[%s2255_s24 + $0x34] sm:$0xf] %vm1524_vm3, %v1409_v26  ;;  %v1217_v34 = vmul.f32 0.01, %v1012_v29  ;;  %v1249_v35 = vmul.f32 0.01, %v1092_v30  ;;  %v855_v36 = vpop.f32.mrf.mxu0  ;;  %v935_v37 = vpop.f32.mrf.mxu1 }
 0x106   : > { %1570 = vst.msk [vmem:[%s2255_s24 + $0xb4] sm:$0xf] %vm1524_vm3, %v1441_v27  ;;  %v1154_v38 = vmul.f32 0.01, %v855_v36  ;;  %v1186_v39 = vmul.f32 0.01, %v935_v37 }
 0x107   : > { %v1345_v40 = vmax.f32 %v1012_v29, %v1217_v34  ;;  %v1377_v41 = vmax.f32 %v1092_v30, %v1249_v35 }
 0x108   : > { %v1282_v42 = vmax.f32 %v855_v36, %v1154_v38  ;;  %v1314_v43 = vmax.f32 %v935_v37, %v1186_v39  ;;  %1997 = vmatmul.msk.bf16.gmra.mxu0 %vm611_vm2, %v2063_v28  ;;  %2013 = vmatmul.msk.bf16.gmra.mxu1 %vm611_vm2, %v2079_v31 }
 0x109   : > { %v1473_v44 = vpack.c.bf16 %v1345_v40, %v1345_v40  ;;  %v1505_v45 = vpack.c.bf16 %v1377_v41, %v1377_v41  ;;  %2029 = vmatmul.msk.bf16.gmra.mxu2 %vm611_vm2, %v2095_v32  ;;  %2045 = vmatmul.msk.bf16.gmra.mxu3 %vm611_vm2, %v2111_v33 }
 0x10a   : > { %v1410_v46 = vpack.c.bf16 %v1282_v42, %v1282_v42  ;;  %v1442_v47 = vpack.c.bf16 %v1314_v43, %v1314_v43 }
 0x10b   : > { %1602 = vst.msk [vmem:[%s2255_s24 + $0x134] sm:$0xf] %vm1524_vm3, %v1473_v44 }
 0x10c   : > { %1634 = vst.msk [vmem:[%s2255_s24 + $0x1b4] sm:$0xf] %vm1524_vm3, %v1505_v45  ;;  %v1015_v48 = vpop.f32.mrf.mxu2  ;;  %v1095_v49 = vpop.f32.mrf.mxu3 }
 0x10d   : > { %1539 = vst.msk [vmem:[%s2255_s24 + $0x38] sm:$0xf] %vm1524_vm3, %v1410_v46  ;;  %v1218_v50 = vmul.f32 0.01, %v1015_v48  ;;  %v1250_v51 = vmul.f32 0.01, %v1095_v49  ;;  %v857_v52 = vpop.f32.mrf.mxu0  ;;  %v937_v53 = vpop.f32.mrf.mxu1 }
 0x10e   : > { %1571 = vst.msk [vmem:[%s2255_s24 + $0xb8] sm:$0xf] %vm1524_vm3, %v1442_v47  ;;  %v1155_v54 = vmul.f32 0.01, %v857_v52  ;;  %v1187_v55 = vmul.f32 0.01, %v937_v53 }
 0x10f   : > { %v1346_v56 = vmax.f32 %v1015_v48, %v1218_v50  ;;  %v1378_v57 = vmax.f32 %v1095_v49, %v1250_v51 }
 0x110   : > { %v1283_v58 = vmax.f32 %v857_v52, %v1155_v54  ;;  %v1315_v59 = vmax.f32 %v937_v53, %v1187_v55 }
 0x111   : > { %v1474_v60 = vpack.c.bf16 %v1346_v56, %v1346_v56  ;;  %v1506_v61 = vpack.c.bf16 %v1378_v57, %v1378_v57 }
 0x112   : > { %v1411_v62 = vpack.c.bf16 %v1283_v58, %v1283_v58  ;;  %v1443_v63 = vpack.c.bf16 %v1315_v59, %v1315_v59 }
 0x113   : > { %1603 = vst.msk [vmem:[%s2255_s24 + $0x138] sm:$0xf] %vm1524_vm3, %v1474_v60 }
 0x114   : > { %1635 = vst.msk [vmem:[%s2255_s24 + $0x1b8] sm:$0xf] %vm1524_vm3, %v1506_v61  ;;  %v1017_v0 = vpop.f32.mrf.mxu2  ;;  %v1097_v1 = vpop.f32.mrf.mxu3 }
 0x115   : > { %1540 = vst.msk [vmem:[%s2255_s24 + $0x3c] sm:$0xf] %vm1524_vm3, %v1411_v62  ;;  %v1219_v2 = vmul.f32 0.01, %v1017_v0  ;;  %v1251_v3 = vmul.f32 0.01, %v1097_v1  ;;  %v860_v4 = vpop.f32.mrf.mxu0  ;;  %v940_v5 = vpop.f32.mrf.mxu1 }
 0x116   : > { %1572 = vst.msk [vmem:[%s2255_s24 + $0xbc] sm:$0xf] %vm1524_vm3, %v1443_v63  ;;  %v1156_v6 = vmul.f32 0.01, %v860_v4  ;;  %v1188_v7 = vmul.f32 0.01, %v940_v5 }
 0x117   : > { %v1347_v8 = vmax.f32 %v1017_v0, %v1219_v2  ;;  %v1379_v9 = vmax.f32 %v1097_v1, %v1251_v3 }
 0x118   : > { %v1284_v10 = vmax.f32 %v860_v4, %v1156_v6  ;;  %v1316_v11 = vmax.f32 %v940_v5, %v1188_v7 }
 0x119   : > { %v1475_v12 = vpack.c.bf16 %v1347_v8, %v1347_v8  ;;  %v1507_v13 = vpack.c.bf16 %v1379_v9, %v1379_v9 }
 0x11a   : > { %v1412_v14 = vpack.c.bf16 %v1284_v10, %v1284_v10  ;;  %v1444_v15 = vpack.c.bf16 %v1316_v11, %v1316_v11 }
 0x11b   : > { %1604 = vst.msk [vmem:[%s2255_s24 + $0x13c] sm:$0xf] %vm1524_vm3, %v1475_v12 }
 0x11c   : > { %1636 = vst.msk [vmem:[%s2255_s24 + $0x1bc] sm:$0xf] %vm1524_vm3, %v1507_v13  ;;  %v1020_v16 = vpop.f32.mrf.mxu2  ;;  %v1100_v17 = vpop.f32.mrf.mxu3 }
 0x11d   : > { %1541 = vst.msk [vmem:[%s2255_s24 + $0x40] sm:$0xf] %vm1524_vm3, %v1412_v14  ;;  %v1220_v18 = vmul.f32 0.01, %v1020_v16  ;;  %v1252_v19 = vmul.f32 0.01, %v1100_v17  ;;  %v862_v20 = vpop.f32.mrf.mxu0  ;;  %v942_v21 = vpop.f32.mrf.mxu1 }
 0x11e   : > { %1573 = vst.msk [vmem:[%s2255_s24 + $0xc0] sm:$0xf] %vm1524_vm3, %v1444_v15  ;;  %v1157_v22 = vmul.f32 0.01, %v862_v20  ;;  %v1189_v23 = vmul.f32 0.01, %v942_v21 }
 0x11f   : > { %v1348_v24 = vmax.f32 %v1020_v16, %v1220_v18  ;;  %v1380_v25 = vmax.f32 %v1100_v17, %v1252_v19 }
 0x120   : > { %v1285_v26 = vmax.f32 %v862_v20, %v1157_v22  ;;  %v1317_v27 = vmax.f32 %v942_v21, %v1189_v23 }
 0x121   : > { %v1476_v28 = vpack.c.bf16 %v1348_v24, %v1348_v24  ;;  %v1508_v29 = vpack.c.bf16 %v1380_v25, %v1380_v25 }
 0x122   : > { %v1413_v30 = vpack.c.bf16 %v1285_v26, %v1285_v26  ;;  %v1445_v31 = vpack.c.bf16 %v1317_v27, %v1317_v27 }
 0x123   : > { %1605 = vst.msk [vmem:[%s2255_s24 + $0x140] sm:$0xf] %vm1524_vm3, %v1476_v28 }
 0x124   : > { %1637 = vst.msk [vmem:[%s2255_s24 + $0x1c0] sm:$0xf] %vm1524_vm3, %v1508_v29  ;;  %v1022_v32 = vpop.f32.mrf.mxu2  ;;  %v1102_v33 = vpop.f32.mrf.mxu3 }
 0x125   : > { %1542 = vst.msk [vmem:[%s2255_s24 + $0x44] sm:$0xf] %vm1524_vm3, %v1413_v30  ;;  %v1221_v34 = vmul.f32 0.01, %v1022_v32  ;;  %v1253_v35 = vmul.f32 0.01, %v1102_v33  ;;  %v865_v36 = vpop.f32.mrf.mxu0  ;;  %v945_v37 = vpop.f32.mrf.mxu1 }
 0x126   : > { %1574 = vst.msk [vmem:[%s2255_s24 + $0xc4] sm:$0xf] %vm1524_vm3, %v1445_v31  ;;  %v1158_v38 = vmul.f32 0.01, %v865_v36  ;;  %v1190_v39 = vmul.f32 0.01, %v945_v37 }
 0x127   : > { %v1349_v40 = vmax.f32 %v1022_v32, %v1221_v34  ;;  %v1381_v41 = vmax.f32 %v1102_v33, %v1253_v35 }
 0x128   : > { %v1286_v42 = vmax.f32 %v865_v36, %v1158_v38  ;;  %v1318_v43 = vmax.f32 %v945_v37, %v1190_v39 }
 0x129   : > { %v1477_v44 = vpack.c.bf16 %v1349_v40, %v1349_v40  ;;  %v1509_v45 = vpack.c.bf16 %v1381_v41, %v1381_v41 }
 0x12a   : > { %v1414_v46 = vpack.c.bf16 %v1286_v42, %v1286_v42  ;;  %v1446_v47 = vpack.c.bf16 %v1318_v43, %v1318_v43 }
 0x12b   : > { %1606 = vst.msk [vmem:[%s2255_s24 + $0x144] sm:$0xf] %vm1524_vm3, %v1477_v44 }
 0x12c   : > { %1638 = vst.msk [vmem:[%s2255_s24 + $0x1c4] sm:$0xf] %vm1524_vm3, %v1509_v45  ;;  %v1025_v48 = vpop.f32.mrf.mxu2  ;;  %v1105_v49 = vpop.f32.mrf.mxu3 }
 0x12d   : > { %1543 = vst.msk [vmem:[%s2255_s24 + $0x48] sm:$0xf] %vm1524_vm3, %v1414_v46  ;;  %v1222_v50 = vmul.f32 0.01, %v1025_v48  ;;  %v1254_v51 = vmul.f32 0.01, %v1105_v49  ;;  %v867_v52 = vpop.f32.mrf.mxu0  ;;  %v947_v53 = vpop.f32.mrf.mxu1 }
 0x12e   : > { %1575 = vst.msk [vmem:[%s2255_s24 + $0xc8] sm:$0xf] %vm1524_vm3, %v1446_v47  ;;  %v1159_v54 = vmul.f32 0.01, %v867_v52  ;;  %v1191_v55 = vmul.f32 0.01, %v947_v53 }
 0x12f   : > { %v1350_v56 = vmax.f32 %v1025_v48, %v1222_v50  ;;  %v1382_v57 = vmax.f32 %v1105_v49, %v1254_v51 }
 0x130   : > { %v1287_v58 = vmax.f32 %v867_v52, %v1159_v54  ;;  %v1319_v59 = vmax.f32 %v947_v53, %v1191_v55 }
 0x131   : > { %v1478_v60 = vpack.c.bf16 %v1350_v56, %v1350_v56  ;;  %v1510_v61 = vpack.c.bf16 %v1382_v57, %v1382_v57 }
 0x132   : > { %v1415_v62 = vpack.c.bf16 %v1287_v58, %v1287_v58  ;;  %v1447_v63 = vpack.c.bf16 %v1319_v59, %v1319_v59 }
 0x133   : > { %1607 = vst.msk [vmem:[%s2255_s24 + $0x148] sm:$0xf] %vm1524_vm3, %v1478_v60 }
 0x134   : > { %1639 = vst.msk [vmem:[%s2255_s24 + $0x1c8] sm:$0xf] %vm1524_vm3, %v1510_v61  ;;  %v1027_v0 = vpop.f32.mrf.mxu2  ;;  %v1107_v1 = vpop.f32.mrf.mxu3 }
 0x135   : > { %1544 = vst.msk [vmem:[%s2255_s24 + $0x4c] sm:$0xf] %vm1524_vm3, %v1415_v62  ;;  %v1223_v2 = vmul.f32 0.01, %v1027_v0  ;;  %v1255_v3 = vmul.f32 0.01, %v1107_v1  ;;  %v870_v4 = vpop.f32.mrf.mxu0  ;;  %v950_v5 = vpop.f32.mrf.mxu1 }
 0x136   : > { %1576 = vst.msk [vmem:[%s2255_s24 + $0xcc] sm:$0xf] %vm1524_vm3, %v1447_v63  ;;  %v1160_v6 = vmul.f32 0.01, %v870_v4  ;;  %v1192_v7 = vmul.f32 0.01, %v950_v5 }
 0x137   : > { %v1351_v8 = vmax.f32 %v1027_v0, %v1223_v2  ;;  %v1383_v9 = vmax.f32 %v1107_v1, %v1255_v3 }
 0x138   : > { %v1288_v10 = vmax.f32 %v870_v4, %v1160_v6  ;;  %v1320_v11 = vmax.f32 %v950_v5, %v1192_v7 }
 0x139   : > { %v1479_v12 = vpack.c.bf16 %v1351_v8, %v1351_v8  ;;  %v1511_v13 = vpack.c.bf16 %v1383_v9, %v1383_v9 }
 0x13a   : > { %v1416_v14 = vpack.c.bf16 %v1288_v10, %v1288_v10  ;;  %v1448_v15 = vpack.c.bf16 %v1320_v11, %v1320_v11 }
 0x13b   : > { %1608 = vst.msk [vmem:[%s2255_s24 + $0x14c] sm:$0xf] %vm1524_vm3, %v1479_v12 }
 0x13c   : > { %1640 = vst.msk [vmem:[%s2255_s24 + $0x1cc] sm:$0xf] %vm1524_vm3, %v1511_v13  ;;  %v1030_v16 = vpop.f32.mrf.mxu2  ;;  %v1110_v17 = vpop.f32.mrf.mxu3 }
 0x13d   : > { %1545 = vst.msk [vmem:[%s2255_s24 + $0x50] sm:$0xf] %vm1524_vm3, %v1416_v14  ;;  %v1224_v18 = vmul.f32 0.01, %v1030_v16  ;;  %v1256_v19 = vmul.f32 0.01, %v1110_v17  ;;  %v872_v20 = vpop.f32.mrf.mxu0  ;;  %v952_v21 = vpop.f32.mrf.mxu1 }
 0x13e   : > { %1577 = vst.msk [vmem:[%s2255_s24 + $0xd0] sm:$0xf] %vm1524_vm3, %v1448_v15  ;;  %v1161_v22 = vmul.f32 0.01, %v872_v20  ;;  %v1193_v23 = vmul.f32 0.01, %v952_v21 }
 0x13f   : > { %v1352_v24 = vmax.f32 %v1030_v16, %v1224_v18  ;;  %v1384_v25 = vmax.f32 %v1110_v17, %v1256_v19 }
 0x140   : > { %v1289_v26 = vmax.f32 %v872_v20, %v1161_v22  ;;  %v1321_v27 = vmax.f32 %v952_v21, %v1193_v23 }
 0x141   : > { %v1480_v28 = vpack.c.bf16 %v1352_v24, %v1352_v24  ;;  %v1512_v29 = vpack.c.bf16 %v1384_v25, %v1384_v25 }
 0x142   : > { %v1417_v30 = vpack.c.bf16 %v1289_v26, %v1289_v26  ;;  %v1449_v31 = vpack.c.bf16 %v1321_v27, %v1321_v27 }
 0x143   : > { %1609 = vst.msk [vmem:[%s2255_s24 + $0x150] sm:$0xf] %vm1524_vm3, %v1480_v28 }
 0x144   : > { %1641 = vst.msk [vmem:[%s2255_s24 + $0x1d0] sm:$0xf] %vm1524_vm3, %v1512_v29  ;;  %v1032_v32 = vpop.f32.mrf.mxu2  ;;  %v1112_v33 = vpop.f32.mrf.mxu3 }
 0x145   : > { %1546 = vst.msk [vmem:[%s2255_s24 + $0x54] sm:$0xf] %vm1524_vm3, %v1417_v30  ;;  %v1225_v34 = vmul.f32 0.01, %v1032_v32  ;;  %v1257_v35 = vmul.f32 0.01, %v1112_v33  ;;  %v875_v36 = vpop.f32.mrf.mxu0  ;;  %v955_v37 = vpop.f32.mrf.mxu1 }
 0x146   : > { %1578 = vst.msk [vmem:[%s2255_s24 + $0xd4] sm:$0xf] %vm1524_vm3, %v1449_v31  ;;  %v1162_v38 = vmul.f32 0.01, %v875_v36  ;;  %v1194_v39 = vmul.f32 0.01, %v955_v37 }
 0x147   : > { %v1353_v40 = vmax.f32 %v1032_v32, %v1225_v34  ;;  %v1385_v41 = vmax.f32 %v1112_v33, %v1257_v35 }
 0x148   : > { %v1290_v42 = vmax.f32 %v875_v36, %v1162_v38  ;;  %v1322_v43 = vmax.f32 %v955_v37, %v1194_v39 }
 0x149   : > { %v1481_v44 = vpack.c.bf16 %v1353_v40, %v1353_v40  ;;  %v1513_v45 = vpack.c.bf16 %v1385_v41, %v1385_v41 }
 0x14a   : > { %v1418_v46 = vpack.c.bf16 %v1290_v42, %v1290_v42  ;;  %v1450_v47 = vpack.c.bf16 %v1322_v43, %v1322_v43 }
 0x14b   : > { %1610 = vst.msk [vmem:[%s2255_s24 + $0x154] sm:$0xf] %vm1524_vm3, %v1481_v44 }
 0x14c   : > { %1642 = vst.msk [vmem:[%s2255_s24 + $0x1d4] sm:$0xf] %vm1524_vm3, %v1513_v45  ;;  %v1035_v48 = vpop.f32.mrf.mxu2  ;;  %v1115_v49 = vpop.f32.mrf.mxu3 }
 0x14d   : > { %1547 = vst.msk [vmem:[%s2255_s24 + $0x58] sm:$0xf] %vm1524_vm3, %v1418_v46  ;;  %v1226_v50 = vmul.f32 0.01, %v1035_v48  ;;  %v1258_v51 = vmul.f32 0.01, %v1115_v49  ;;  %v877_v52 = vpop.f32.mrf.mxu0  ;;  %v957_v53 = vpop.f32.mrf.mxu1 }
 0x14e   : > { %1579 = vst.msk [vmem:[%s2255_s24 + $0xd8] sm:$0xf] %vm1524_vm3, %v1450_v47  ;;  %v1163_v54 = vmul.f32 0.01, %v877_v52  ;;  %v1195_v55 = vmul.f32 0.01, %v957_v53 }
 0x14f   : > { %v1354_v56 = vmax.f32 %v1035_v48, %v1226_v50  ;;  %v1386_v57 = vmax.f32 %v1115_v49, %v1258_v51 }
 0x150   : > { %v1291_v58 = vmax.f32 %v877_v52, %v1163_v54  ;;  %v1323_v59 = vmax.f32 %v957_v53, %v1195_v55 }
 0x151   : > { %v1482_v60 = vpack.c.bf16 %v1354_v56, %v1354_v56  ;;  %v1514_v61 = vpack.c.bf16 %v1386_v57, %v1386_v57 }
 0x152   : > { %v1419_v62 = vpack.c.bf16 %v1291_v58, %v1291_v58  ;;  %v1451_v63 = vpack.c.bf16 %v1323_v59, %v1323_v59 }
 0x153   : > { %1611 = vst.msk [vmem:[%s2255_s24 + $0x158] sm:$0xf] %vm1524_vm3, %v1482_v60 }
 0x154   : > { %1643 = vst.msk [vmem:[%s2255_s24 + $0x1d8] sm:$0xf] %vm1524_vm3, %v1514_v61  ;;  %v1037_v0 = vpop.f32.mrf.mxu2  ;;  %v1117_v1 = vpop.f32.mrf.mxu3 }
 0x155   : > { %1548 = vst.msk [vmem:[%s2255_s24 + $0x5c] sm:$0xf] %vm1524_vm3, %v1419_v62  ;;  %v1227_v2 = vmul.f32 0.01, %v1037_v0  ;;  %v1259_v3 = vmul.f32 0.01, %v1117_v1  ;;  %v880_v4 = vpop.f32.mrf.mxu0  ;;  %v960_v5 = vpop.f32.mrf.mxu1 }
 0x156   : > { %1580 = vst.msk [vmem:[%s2255_s24 + $0xdc] sm:$0xf] %vm1524_vm3, %v1451_v63  ;;  %v1164_v6 = vmul.f32 0.01, %v880_v4  ;;  %v1196_v7 = vmul.f32 0.01, %v960_v5 }
 0x157   : > { %v1355_v8 = vmax.f32 %v1037_v0, %v1227_v2  ;;  %v1387_v9 = vmax.f32 %v1117_v1, %v1259_v3 }
 0x158   : > { %v1292_v10 = vmax.f32 %v880_v4, %v1164_v6  ;;  %v1324_v11 = vmax.f32 %v960_v5, %v1196_v7 }
 0x159   : > { %v1483_v12 = vpack.c.bf16 %v1355_v8, %v1355_v8  ;;  %v1515_v13 = vpack.c.bf16 %v1387_v9, %v1387_v9 }
 0x15a   : > { %v1420_v14 = vpack.c.bf16 %v1292_v10, %v1292_v10  ;;  %v1452_v15 = vpack.c.bf16 %v1324_v11, %v1324_v11 }
 0x15b   : > { %1612 = vst.msk [vmem:[%s2255_s24 + $0x15c] sm:$0xf] %vm1524_vm3, %v1483_v12 }
 0x15c   : > { %1644 = vst.msk [vmem:[%s2255_s24 + $0x1dc] sm:$0xf] %vm1524_vm3, %v1515_v13  ;;  %v1040_v16 = vpop.f32.mrf.mxu2  ;;  %v1120_v17 = vpop.f32.mrf.mxu3 }
 0x15d   : > { %1549 = vst.msk [vmem:[%s2255_s24 + $0x60] sm:$0xf] %vm1524_vm3, %v1420_v14  ;;  %v1228_v18 = vmul.f32 0.01, %v1040_v16  ;;  %v1260_v19 = vmul.f32 0.01, %v1120_v17  ;;  %v882_v20 = vpop.f32.mrf.mxu0  ;;  %v962_v21 = vpop.f32.mrf.mxu1 }
 0x15e   : > { %1581 = vst.msk [vmem:[%s2255_s24 + $0xe0] sm:$0xf] %vm1524_vm3, %v1452_v15  ;;  %v1165_v22 = vmul.f32 0.01, %v882_v20  ;;  %v1197_v23 = vmul.f32 0.01, %v962_v21 }
 0x15f   : > { %v1356_v24 = vmax.f32 %v1040_v16, %v1228_v18  ;;  %v1388_v25 = vmax.f32 %v1120_v17, %v1260_v19 }
 0x160   : > { %v1293_v26 = vmax.f32 %v882_v20, %v1165_v22  ;;  %v1325_v27 = vmax.f32 %v962_v21, %v1197_v23 }
 0x161   : > { %v1484_v28 = vpack.c.bf16 %v1356_v24, %v1356_v24  ;;  %v1516_v29 = vpack.c.bf16 %v1388_v25, %v1388_v25 }
 0x162   : > { %v1421_v30 = vpack.c.bf16 %v1293_v26, %v1293_v26  ;;  %v1453_v31 = vpack.c.bf16 %v1325_v27, %v1325_v27 }
 0x163   : > { %1613 = vst.msk [vmem:[%s2255_s24 + $0x160] sm:$0xf] %vm1524_vm3, %v1484_v28 }
 0x164   : > { %1645 = vst.msk [vmem:[%s2255_s24 + $0x1e0] sm:$0xf] %vm1524_vm3, %v1516_v29  ;;  %v1042_v32 = vpop.f32.mrf.mxu2  ;;  %v1122_v33 = vpop.f32.mrf.mxu3 }
 0x165   : > { %1550 = vst.msk [vmem:[%s2255_s24 + $0x64] sm:$0xf] %vm1524_vm3, %v1421_v30  ;;  %v1229_v34 = vmul.f32 0.01, %v1042_v32  ;;  %v1261_v35 = vmul.f32 0.01, %v1122_v33  ;;  %v885_v36 = vpop.f32.mrf.mxu0  ;;  %v965_v37 = vpop.f32.mrf.mxu1 }
 0x166   : > { %1582 = vst.msk [vmem:[%s2255_s24 + $0xe4] sm:$0xf] %vm1524_vm3, %v1453_v31  ;;  %v1166_v38 = vmul.f32 0.01, %v885_v36  ;;  %v1198_v39 = vmul.f32 0.01, %v965_v37 }
 0x167   : > { %v1357_v40 = vmax.f32 %v1042_v32, %v1229_v34  ;;  %v1389_v41 = vmax.f32 %v1122_v33, %v1261_v35 }
 0x168   : > { %v1294_v42 = vmax.f32 %v885_v36, %v1166_v38  ;;  %v1326_v43 = vmax.f32 %v965_v37, %v1198_v39 }
 0x169   : > { %v1485_v44 = vpack.c.bf16 %v1357_v40, %v1357_v40  ;;  %v1517_v45 = vpack.c.bf16 %v1389_v41, %v1389_v41 }
 0x16a   : > { %v1422_v46 = vpack.c.bf16 %v1294_v42, %v1294_v42  ;;  %v1454_v47 = vpack.c.bf16 %v1326_v43, %v1326_v43 }
 0x16b   : > { %1614 = vst.msk [vmem:[%s2255_s24 + $0x164] sm:$0xf] %vm1524_vm3, %v1485_v44 }
 0x16c   : > { %1646 = vst.msk [vmem:[%s2255_s24 + $0x1e4] sm:$0xf] %vm1524_vm3, %v1517_v45  ;;  %v1045_v48 = vpop.f32.mrf.mxu2  ;;  %v1125_v49 = vpop.f32.mrf.mxu3 }
 0x16d   : > { %1551 = vst.msk [vmem:[%s2255_s24 + $0x68] sm:$0xf] %vm1524_vm3, %v1422_v46  ;;  %v1230_v50 = vmul.f32 0.01, %v1045_v48  ;;  %v1262_v51 = vmul.f32 0.01, %v1125_v49  ;;  %v887_v52 = vpop.f32.mrf.mxu0  ;;  %v967_v53 = vpop.f32.mrf.mxu1 }
 0x16e   : > { %1583 = vst.msk [vmem:[%s2255_s24 + $0xe8] sm:$0xf] %vm1524_vm3, %v1454_v47  ;;  %v1167_v54 = vmul.f32 0.01, %v887_v52  ;;  %v1199_v55 = vmul.f32 0.01, %v967_v53 }
 0x16f   : > { %v1358_v56 = vmax.f32 %v1045_v48, %v1230_v50  ;;  %v1390_v57 = vmax.f32 %v1125_v49, %v1262_v51 }
 0x170   : > { %v1295_v58 = vmax.f32 %v887_v52, %v1167_v54  ;;  %v1327_v59 = vmax.f32 %v967_v53, %v1199_v55 }
 0x171   : > { %v1486_v60 = vpack.c.bf16 %v1358_v56, %v1358_v56  ;;  %v1518_v61 = vpack.c.bf16 %v1390_v57, %v1390_v57 }
 0x172   : > { %v1423_v62 = vpack.c.bf16 %v1295_v58, %v1295_v58  ;;  %v1455_v63 = vpack.c.bf16 %v1327_v59, %v1327_v59 }
 0x173   : > { %1615 = vst.msk [vmem:[%s2255_s24 + $0x168] sm:$0xf] %vm1524_vm3, %v1486_v60 }
 0x174   : > { %1647 = vst.msk [vmem:[%s2255_s24 + $0x1e8] sm:$0xf] %vm1524_vm3, %v1518_v61  ;;  %v1047_v0 = vpop.f32.mrf.mxu2  ;;  %v1127_v1 = vpop.f32.mrf.mxu3 }
 0x175   : > { %1552 = vst.msk [vmem:[%s2255_s24 + $0x6c] sm:$0xf] %vm1524_vm3, %v1423_v62  ;;  %v1231_v2 = vmul.f32 0.01, %v1047_v0  ;;  %v1263_v3 = vmul.f32 0.01, %v1127_v1  ;;  %v890_v4 = vpop.f32.mrf.mxu0  ;;  %v970_v5 = vpop.f32.mrf.mxu1 }
 0x176   : > { %1584 = vst.msk [vmem:[%s2255_s24 + $0xec] sm:$0xf] %vm1524_vm3, %v1455_v63  ;;  %v1168_v6 = vmul.f32 0.01, %v890_v4  ;;  %v1200_v7 = vmul.f32 0.01, %v970_v5 }
 0x177   : > { %v1359_v8 = vmax.f32 %v1047_v0, %v1231_v2  ;;  %v1391_v9 = vmax.f32 %v1127_v1, %v1263_v3 }
 0x178   : > { %v1296_v10 = vmax.f32 %v890_v4, %v1168_v6  ;;  %v1328_v11 = vmax.f32 %v970_v5, %v1200_v7 }
 0x179   : > { %v1487_v12 = vpack.c.bf16 %v1359_v8, %v1359_v8  ;;  %v1519_v13 = vpack.c.bf16 %v1391_v9, %v1391_v9 }
 0x17a   : > { %v1424_v14 = vpack.c.bf16 %v1296_v10, %v1296_v10  ;;  %v1456_v15 = vpack.c.bf16 %v1328_v11, %v1328_v11 }
 0x17b   : > { %1616 = vst.msk [vmem:[%s2255_s24 + $0x16c] sm:$0xf] %vm1524_vm3, %v1487_v12 }
 0x17c   : > { %1648 = vst.msk [vmem:[%s2255_s24 + $0x1ec] sm:$0xf] %vm1524_vm3, %v1519_v13  ;;  %v1050_v16 = vpop.f32.mrf.mxu2  ;;  %v1130_v17 = vpop.f32.mrf.mxu3 }
 0x17d   : > { %1553 = vst.msk [vmem:[%s2255_s24 + $0x70] sm:$0xf] %vm1524_vm3, %v1424_v14  ;;  %v1232_v18 = vmul.f32 0.01, %v1050_v16  ;;  %v1264_v19 = vmul.f32 0.01, %v1130_v17  ;;  %v892_v20 = vpop.f32.mrf.mxu0  ;;  %v972_v21 = vpop.f32.mrf.mxu1 }
 0x17e   : > { %1585 = vst.msk [vmem:[%s2255_s24 + $0xf0] sm:$0xf] %vm1524_vm3, %v1456_v15  ;;  %v1169_v22 = vmul.f32 0.01, %v892_v20  ;;  %v1201_v23 = vmul.f32 0.01, %v972_v21 }
 0x17f   : > { %v1360_v24 = vmax.f32 %v1050_v16, %v1232_v18  ;;  %v1392_v25 = vmax.f32 %v1130_v17, %v1264_v19 }
 0x180   : > { %v1297_v26 = vmax.f32 %v892_v20, %v1169_v22  ;;  %v1329_v27 = vmax.f32 %v972_v21, %v1201_v23 }
 0x181   : > { %v1488_v28 = vpack.c.bf16 %v1360_v24, %v1360_v24  ;;  %v1520_v29 = vpack.c.bf16 %v1392_v25, %v1392_v25 }
 0x182   : > { %v1425_v30 = vpack.c.bf16 %v1297_v26, %v1297_v26  ;;  %v1457_v31 = vpack.c.bf16 %v1329_v27, %v1329_v27 }
 0x183   : > { %1617 = vst.msk [vmem:[%s2255_s24 + $0x170] sm:$0xf] %vm1524_vm3, %v1488_v28 }
 0x184   : > { %1649 = vst.msk [vmem:[%s2255_s24 + $0x1f0] sm:$0xf] %vm1524_vm3, %v1520_v29  ;;  %v1052_v32 = vpop.f32.mrf.mxu2  ;;  %v1132_v33 = vpop.f32.mrf.mxu3 }
 0x185   : > { %1554 = vst.msk [vmem:[%s2255_s24 + $0x74] sm:$0xf] %vm1524_vm3, %v1425_v30  ;;  %v1233_v34 = vmul.f32 0.01, %v1052_v32  ;;  %v1265_v35 = vmul.f32 0.01, %v1132_v33  ;;  %v895_v36 = vpop.f32.mrf.mxu0  ;;  %v975_v37 = vpop.f32.mrf.mxu1 }
 0x186   : > { %1586 = vst.msk [vmem:[%s2255_s24 + $0xf4] sm:$0xf] %vm1524_vm3, %v1457_v31  ;;  %v1170_v38 = vmul.f32 0.01, %v895_v36  ;;  %v1202_v39 = vmul.f32 0.01, %v975_v37 }
 0x187   : > { %v1361_v40 = vmax.f32 %v1052_v32, %v1233_v34  ;;  %v1393_v41 = vmax.f32 %v1132_v33, %v1265_v35 }
 0x188   : > { %v1298_v42 = vmax.f32 %v895_v36, %v1170_v38  ;;  %v1330_v43 = vmax.f32 %v975_v37, %v1202_v39 }
 0x189   : > { %v1489_v44 = vpack.c.bf16 %v1361_v40, %v1361_v40  ;;  %v1521_v45 = vpack.c.bf16 %v1393_v41, %v1393_v41 }
 0x18a   : > { %v1426_v46 = vpack.c.bf16 %v1298_v42, %v1298_v42  ;;  %v1458_v47 = vpack.c.bf16 %v1330_v43, %v1330_v43 }
 0x18b   : > { %1618 = vst.msk [vmem:[%s2255_s24 + $0x174] sm:$0xf] %vm1524_vm3, %v1489_v44 }
 0x18c   : > { %1650 = vst.msk [vmem:[%s2255_s24 + $0x1f4] sm:$0xf] %vm1524_vm3, %v1521_v45  ;;  %v1055_v48 = vpop.f32.mrf.mxu2  ;;  %v1135_v49 = vpop.f32.mrf.mxu3 }
 0x18d   : > { %1555 = vst.msk [vmem:[%s2255_s24 + $0x78] sm:$0xf] %vm1524_vm3, %v1426_v46  ;;  %v1234_v50 = vmul.f32 0.01, %v1055_v48  ;;  %v1266_v51 = vmul.f32 0.01, %v1135_v49  ;;  %v897_v52 = vpop.f32.mrf.mxu0  ;;  %v977_v53 = vpop.f32.mrf.mxu1 }
 0x18e   : > { %1587 = vst.msk [vmem:[%s2255_s24 + $0xf8] sm:$0xf] %vm1524_vm3, %v1458_v47  ;;  %v1171_v54 = vmul.f32 0.01, %v897_v52  ;;  %v1203_v55 = vmul.f32 0.01, %v977_v53 }
 0x18f   : > { %v1362_v56 = vmax.f32 %v1055_v48, %v1234_v50  ;;  %v1394_v57 = vmax.f32 %v1135_v49, %v1266_v51 }
 0x190   : > { %v1299_v58 = vmax.f32 %v897_v52, %v1171_v54  ;;  %v1331_v59 = vmax.f32 %v977_v53, %v1203_v55 }
 0x191   : > { %v1490_v60 = vpack.c.bf16 %v1362_v56, %v1362_v56  ;;  %v1522_v61 = vpack.c.bf16 %v1394_v57, %v1394_v57 }
 0x192   : > { %v1427_v62 = vpack.c.bf16 %v1299_v58, %v1299_v58  ;;  %v1459_v63 = vpack.c.bf16 %v1331_v59, %v1331_v59 }
 0x193   : > { %1619 = vst.msk [vmem:[%s2255_s24 + $0x178] sm:$0xf] %vm1524_vm3, %v1490_v60 }
 0x194   : > { %1651 = vst.msk [vmem:[%s2255_s24 + $0x1f8] sm:$0xf] %vm1524_vm3, %v1522_v61  ;;  %v1057_v0 = vpop.f32.mrf.mxu2  ;;  %v1137_v1 = vpop.f32.mrf.mxu3 }
 0x195   : > { %1556 = vst.msk [vmem:[%s2255_s24 + $0x7c] sm:$0xf] %vm1524_vm3, %v1427_v62  ;;  %v1235_v2 = vmul.f32 0.01, %v1057_v0  ;;  %v1267_v3 = vmul.f32 0.01, %v1137_v1 }
 0x196   : > { %1588 = vst.msk [vmem:[%s2255_s24 + $0xfc] sm:$0xf] %vm1524_vm3, %v1459_v63 }
 0x197   : > { %v1363_v4 = vmax.f32 %v1057_v0, %v1235_v2  ;;  %v1395_v5 = vmax.f32 %v1137_v1, %v1267_v3 }
 0x199   : > { %v1491_v6 = vpack.c.bf16 %v1363_v4, %v1363_v4  ;;  %v1523_v7 = vpack.c.bf16 %v1395_v5, %v1395_v5 }
 0x19b   : > { %1620 = vst.msk [vmem:[%s2255_s24 + $0x17c] sm:$0xf] %vm1524_vm3, %v1491_v6 }
 0x19c   : > { %1652 = vst.msk [vmem:[%s2255_s24 + $0x1fc] sm:$0xf] %vm1524_vm3, %v1523_v7 }
 0x19d PF: > { %s12_s9 = sadd.s32 1, %s2135_s9  }
 0x19e   : > { %p9_p4 = scmp.ge.s32.totalorder %s12_s9, 4  }
 0x1a0   :  { %11 = sbr.rel (!%p9_p4) target bundleno = 1 (0x1), region = 58 }

// kernel: discriminator_forward.5
= control target key start
LH: loop header
LB: loop body
LE: loop exit
PB: predicated region body
PF: predicated region fallthrough
CT: control target
= control target key end

     0   :  { %vm997_vm0 = vcmask 261120   ;;  %vm1604_vm4 = vcmask 257024   ;;  %s3785_s1 = inlined_call_operand.vmem [shape: bf16[256,32], index: 1, kind: input, shape index: {}]   ;;  %s3786_s0 = inlined_call_operand.vmem [shape: bf16[512,256], index: 0, kind: input, shape index: {}]   ;;  %s3787_s3 = inlined_call_operand.vmem [shape: f32[1,32], index: 3, kind: input, shape index: {}]   ;;  %s3788_s2 = inlined_call_operand.vmem [shape: f32[1,32], index: 2, kind: input, shape index: {}]   ;;  %s3789_s4 = inlined_call_operand.vmem [shape: bf16[512,32], index: 4, kind: output, shape index: {}]  }
   0x1   :  { %v2064_v0 = vld [vmem:[%s3785_s1 + $0x38] sm:$0xff]  ;;  %v2063_v2 = vld [vmem:[%s3785_s1 + $0x30] sm:$0xff]  ;;  %v2062_v4 = vld [vmem:[%s3785_s1 + $0x28] sm:$0xff] }
   0x2   :  { %v2072_v1 = vld [vmem:[%s3785_s1 + $0x78] sm:$0xff]  ;;  %529 = vmatpush.bf16.msra.mxu0 %v2064_v0  ;;  %v2071_v3 = vld [vmem:[%s3785_s1 + $0x70] sm:$0xff]  ;;  %2073 = vmatpush.bf16.msra.mxu2 %v2064_v0  ;;  %v2070_v5 = vld [vmem:[%s3785_s1 + $0x68] sm:$0xff] }
   0x3   :  { %698 = vmatpush.bf16.msra.mxu1 %v2072_v1  ;;  %2081 = vmatpush.bf16.msra.mxu3 %v2072_v1  ;;  %v2061_v6 = vld [vmem:[%s3785_s1 + $0x20] sm:$0xff]  ;;  %v2060_v8 = vld [vmem:[%s3785_s1 + $0x18] sm:$0xff]  ;;  %v2059_v10 = vld [vmem:[%s3785_s1 + $0x10] sm:$0xff] }
   0x4   :  { %v2069_v7 = vld [vmem:[%s3785_s1 + $0x60] sm:$0xff]  ;;  %v2068_v9 = vld [vmem:[%s3785_s1 + $0x58] sm:$0xff]  ;;  %v2067_v11 = vld [vmem:[%s3785_s1 + $0x50] sm:$0xff] }
   0x5   :  { %v2058_v12 = vld [vmem:[%s3785_s1 + $0x8] sm:$0xff]  ;;  %v2057_v14 = vld [vmem:[%s3785_s1] sm:$0xff]  ;;  %v1683_v22 = vld [vmem:[%s3786_s0 + $0x10] sm:$0xf] }
   0x6   :  { %530 = vmatpush.bf16.msra.mxu0 %v2063_v2  ;;  %2074 = vmatpush.bf16.msra.mxu2 %v2063_v2  ;;  %v2066_v13 = vld [vmem:[%s3785_s1 + $0x48] sm:$0xff]  ;;  %v2065_v15 = vld [vmem:[%s3785_s1 + $0x40] sm:$0xff]  ;;  %v1996_v23 = vld [vmem:[%s3786_s0 + $0x14] sm:$0xf0] }
   0x7   :  { %699 = vmatpush.bf16.msra.mxu1 %v2071_v3  ;;  %2082 = vmatpush.bf16.msra.mxu3 %v2071_v3  ;;  %v1675_v16 = vld [vmem:[%s3786_s0] sm:$0xf]  ;;  %v1994_v17 = vld [vmem:[%s3786_s0 + $0x4] sm:$0xf0]  ;;  %v1993_v18 = vld [vmem:[%s3786_s0 + $0x4] sm:$0xf]  ;;  %v1684_v26 = vor.u32 %v1996_v23, %v1683_v22 }
   0x8   :  { %v1677_v19 = vld [vmem:[%s3786_s0 + $0x8] sm:$0xf0]  ;;  %v1676_v20 = vor.u32 %v1994_v17, %v1675_v16  ;;  %v1995_v24 = vld [vmem:[%s3786_s0 + $0x14] sm:$0xf]  ;;  %v1685_v25 = vld [vmem:[%s3786_s0 + $0x18] sm:$0xf0] }
   0x9   :  { %v1680_v21 = vor.u32 %v1993_v18, %v1677_v19  ;;  %v1688_v27 = vor.u32 %v1995_v24, %v1685_v25  ;;  %v1803_v28 = vld [vmem:[%s3786_s0 + $0x100] sm:$0xf]  ;;  %v2026_v29 = vld [vmem:[%s3786_s0 + $0x104] sm:$0xf0]  ;;  %v2025_v31 = vld [vmem:[%s3786_s0 + $0x104] sm:$0xf] }
   0xa   :  { %531 = vmatpush.bf16.msra.mxu0 %v2062_v4  ;;  %2075 = vmatpush.bf16.msra.mxu2 %v2062_v4  ;;  %v1804_v30 = vor.u32 %v2026_v29, %v1803_v28  ;;  %v1805_v32 = vld [vmem:[%s3786_s0 + $0x108] sm:$0xf0]  ;;  %v1691_v34 = vld [vmem:[%s3786_s0 + $0x20] sm:$0xf]  ;;  %v1998_v35 = vld [vmem:[%s3786_s0 + $0x24] sm:$0xf0] }
   0xb   :  { %700 = vmatpush.bf16.msra.mxu1 %v2070_v5  ;;  %2083 = vmatpush.bf16.msra.mxu3 %v2070_v5  ;;  %v1808_v33 = vor.u32 %v2025_v31, %v1805_v32  ;;  %v1997_v36 = vld [vmem:[%s3786_s0 + $0x24] sm:$0xf]  ;;  %v1693_v37 = vld [vmem:[%s3786_s0 + $0x28] sm:$0xf0]  ;;  %v1692_v38 = vor.u32 %v1998_v35, %v1691_v34  ;;  %v1811_v40 = vld [vmem:[%s3786_s0 + $0x110] sm:$0xf] }
   0xc   :  { %v1696_v39 = vor.u32 %v1997_v36, %v1693_v37  ;;  %v2028_v41 = vld [vmem:[%s3786_s0 + $0x114] sm:$0xf0]  ;;  %v2027_v43 = vld [vmem:[%s3786_s0 + $0x114] sm:$0xf]  ;;  %v1813_v44 = vld [vmem:[%s3786_s0 + $0x118] sm:$0xf0] }
   0xd   :  { %v1812_v42 = vor.u32 %v2028_v41, %v1811_v40  ;;  %v1816_v45 = vor.u32 %v2027_v43, %v1813_v44  ;;  %v1699_v46 = vld [vmem:[%s3786_s0 + $0x30] sm:$0xf]  ;;  %v2000_v47 = vld [vmem:[%s3786_s0 + $0x34] sm:$0xf0]  ;;  %v1999_v48 = vld [vmem:[%s3786_s0 + $0x34] sm:$0xf] }
   0xe   :  { %532 = vmatpush.bf16.msra.mxu0 %v2061_v6  ;;  %2076 = vmatpush.bf16.msra.mxu2 %v2061_v6  ;;  %v1701_v49 = vld [vmem:[%s3786_s0 + $0x38] sm:$0xf0]  ;;  %v1700_v50 = vor.u32 %v2000_v47, %v1699_v46  ;;  %v1819_v52 = vld [vmem:[%s3786_s0 + $0x120] sm:$0xf]  ;;  %v2030_v53 = vld [vmem:[%s3786_s0 + $0x124] sm:$0xf0] }
   0xf   :  { %701 = vmatpush.bf16.msra.mxu1 %v2069_v7  ;;  %2084 = vmatpush.bf16.msra.mxu3 %v2069_v7  ;;  %v1704_v51 = vor.u32 %v1999_v48, %v1701_v49  ;;  %v1820_v54 = vor.u32 %v2030_v53, %v1819_v52  ;;  %v2029_v55 = vld [vmem:[%s3786_s0 + $0x124] sm:$0xf]  ;;  %v1821_v56 = vld [vmem:[%s3786_s0 + $0x128] sm:$0xf0]  ;;  %v1707_v58 = vld [vmem:[%s3786_s0 + $0x40] sm:$0xf] }
  0x10   :  { %v1824_v57 = vor.u32 %v2029_v55, %v1821_v56  ;;  %v2002_v59 = vld [vmem:[%s3786_s0 + $0x44] sm:$0xf0]  ;;  %v2001_v60 = vld [vmem:[%s3786_s0 + $0x44] sm:$0xf]  ;;  %v1709_v61 = vld [vmem:[%s3786_s0 + $0x48] sm:$0xf0] }
  0x11   :  { %v1708_v62 = vor.u32 %v2002_v59, %v1707_v58  ;;  %v1712_v63 = vor.u32 %v2001_v60, %v1709_v61  ;;  %v1827_v0 = vld [vmem:[%s3786_s0 + $0x130] sm:$0xf]  ;;  %v2032_v1 = vld [vmem:[%s3786_s0 + $0x134] sm:$0xf0]  ;;  %v2031_v3 = vld [vmem:[%s3786_s0 + $0x134] sm:$0xf] }
  0x12   :  { %533 = vmatpush.bf16.msra.mxu0 %v2060_v8  ;;  %2077 = vmatpush.bf16.msra.mxu2 %v2060_v8  ;;  %v1828_v2 = vor.u32 %v2032_v1, %v1827_v0  ;;  %v1829_v4 = vld [vmem:[%s3786_s0 + $0x138] sm:$0xf0]  ;;  %v1715_v6 = vld [vmem:[%s3786_s0 + $0x50] sm:$0xf]  ;;  %v2004_v7 = vld [vmem:[%s3786_s0 + $0x54] sm:$0xf0] }
  0x13   :  { %702 = vmatpush.bf16.msra.mxu1 %v2068_v9  ;;  %2085 = vmatpush.bf16.msra.mxu3 %v2068_v9  ;;  %v1832_v5 = vor.u32 %v2031_v3, %v1829_v4  ;;  %v2003_v8 = vld [vmem:[%s3786_s0 + $0x54] sm:$0xf]  ;;  %v1717_v9 = vld [vmem:[%s3786_s0 + $0x58] sm:$0xf0]  ;;  %v1837_v16 = vld [vmem:[%s3786_s0 + $0x148] sm:$0xf0] }
  0x14   :  { %v1723_v18 = vld [vmem:[%s3786_s0 + $0x60] sm:$0xf]  ;;  %v2006_v19 = vld [vmem:[%s3786_s0 + $0x64] sm:$0xf0]  ;;  %v1843_v24 = vld [vmem:[%s3786_s0 + $0x150] sm:$0xf] }
  0x15   :  { %v1724_v22 = vor.u32 %v2006_v19, %v1723_v18  ;;  %v2036_v25 = vld [vmem:[%s3786_s0 + $0x154] sm:$0xf0]  ;;  %v1845_v28 = vld [vmem:[%s3786_s0 + $0x158] sm:$0xf0]  ;;  %v2007_v32 = vld [vmem:[%s3786_s0 + $0x74] sm:$0xf] }
  0x16   :  { %534 = vmatpush.bf16.msra.mxu0 %v2059_v10  ;;  %2078 = vmatpush.bf16.msra.mxu2 %v2059_v10  ;;  %v1716_v10 = vor.u32 %v2004_v7, %v1715_v6  ;;  %v2008_v31 = vld [vmem:[%s3786_s0 + $0x74] sm:$0xf0]  ;;  %v1851_v36 = vld [vmem:[%s3786_s0 + $0x160] sm:$0xf]  ;;  %v2038_v37 = vld [vmem:[%s3786_s0 + $0x164] sm:$0xf0] }
  0x17   :  { %703 = vmatpush.bf16.msra.mxu1 %v2067_v11  ;;  %2086 = vmatpush.bf16.msra.mxu3 %v2067_v11  ;;  %v1720_v11 = vor.u32 %v2003_v8, %v1717_v9  ;;  %v1853_v40 = vld [vmem:[%s3786_s0 + $0x168] sm:$0xf0]  ;;  %v2010_v43 = vld [vmem:[%s3786_s0 + $0x84] sm:$0xf0]  ;;  %v2009_v44 = vld [vmem:[%s3786_s0 + $0x84] sm:$0xf] }
  0x18   :  { %v2040_v52 = vld [vmem:[%s3786_s0 + $0x174] sm:$0xf0]  ;;  %v1861_v55 = vld [vmem:[%s3786_s0 + $0x178] sm:$0xf0]  ;;  %v1747_v60 = vld [vmem:[%s3786_s0 + $0x90] sm:$0xf] }
  0x19   :  { %v2012_v61 = vld [vmem:[%s3786_s0 + $0x94] sm:$0xf0]  ;;  %v1867_v4 = vld [vmem:[%s3786_s0 + $0x180] sm:$0xf]  ;;  %v2042_v6 = vld [vmem:[%s3786_s0 + $0x184] sm:$0xf0] }
  0x1a   :  { %535 = vmatpush.bf16.msra.mxu0 %v2058_v12  ;;  %2079 = vmatpush.bf16.msra.mxu2 %v2058_v12  ;;  %v1835_v12 = vld [vmem:[%s3786_s0 + $0x140] sm:$0xf]  ;;  %v1748_v0 = vor.u32 %v2012_v61, %v1747_v60  ;;  %v1868_v7 = vor.u32 %v2042_v6, %v1867_v4  ;;  %v2041_v8 = vld [vmem:[%s3786_s0 + $0x184] sm:$0xf]  ;;  %v1869_v9 = vld [vmem:[%s3786_s0 + $0x188] sm:$0xf0] }
  0x1b   :  { %704 = vmatpush.bf16.msra.mxu1 %v2066_v13  ;;  %2087 = vmatpush.bf16.msra.mxu3 %v2066_v13  ;;  %v2034_v13 = vld [vmem:[%s3786_s0 + $0x144] sm:$0xf0]  ;;  %v2013_v19 = vld [vmem:[%s3786_s0 + $0xa4] sm:$0xf] }
  0x1c   :  { %v2014_v18 = vld [vmem:[%s3786_s0 + $0xa4] sm:$0xf0]  ;;  %v2017_v6 = vld [vmem:[%s3786_s0 + $0xc4] sm:$0xf] }
  0x1d   :  { %v2018_v4 = vld [vmem:[%s3786_s0 + $0xc4] sm:$0xf0] }
  0x1e   :  { %536 = vmatpush.bf16.msra.mxu0 %v2057_v14  ;;  %2080 = vmatpush.bf16.msra.mxu2 %v2057_v14  ;;  %v1836_v14 = vor.u32 %v2034_v13, %v1835_v12 }
  0x1f   :  { %705 = vmatpush.bf16.msra.mxu1 %v2065_v15  ;;  %2088 = vmatpush.bf16.msra.mxu3 %v2065_v15  ;;  %v2033_v15 = vld [vmem:[%s3786_s0 + $0x144] sm:$0xf] }
  0x20   :  { %v1840_v17 = vor.u32 %v2033_v15, %v1837_v16 }
  0x21   :  { %537 = vmatmul.bf16.vlgmr.msra.gmra.mxu0 %v1676_v20  ;;  %617 = vmatmul.bf16.vlgmr.msra.gmra.mxu2 %v1804_v30  ;;  %v2005_v20 = vld [vmem:[%s3786_s0 + $0x64] sm:$0xf]  ;;  %v1731_v30 = vld [vmem:[%s3786_s0 + $0x70] sm:$0xf] }
  0x22   :  { %706 = vmatmul.bf16.vlgmr.msra.gmra.mxu1 %v1680_v21  ;;  %786 = vmatmul.bf16.vlgmr.msra.gmra.mxu3 %v1808_v33  ;;  %v1725_v21 = vld [vmem:[%s3786_s0 + $0x68] sm:$0xf0]  ;;  %v1733_v33 = vld [vmem:[%s3786_s0 + $0x78] sm:$0xf0]  ;;  %v1732_v34 = vor.u32 %v2008_v31, %v1731_v30  ;;  %v2044_v30 = vld [vmem:[%s3786_s0 + $0x194] sm:$0xf0] }
  0x23   :  { %v1728_v23 = vor.u32 %v2005_v20, %v1725_v21  ;;  %v1736_v35 = vor.u32 %v2007_v32, %v1733_v33  ;;  %v1757_v20 = vld [vmem:[%s3786_s0 + $0xa8] sm:$0xf0]  ;;  %v2043_v32 = vld [vmem:[%s3786_s0 + $0x194] sm:$0xf]  ;;  %v1877_v33 = vld [vmem:[%s3786_s0 + $0x198] sm:$0xf0] }
  0x31   :  { %542 = vmatmul.bf16.gmra.mxu0 %v1684_v26  ;;  %622 = vmatmul.bf16.gmra.mxu2 %v1812_v42  ;;  %v1844_v26 = vor.u32 %v2036_v25, %v1843_v24  ;;  %v1739_v42 = vld [vmem:[%s3786_s0 + $0x80] sm:$0xf] }
  0x32   :  { %711 = vmatmul.bf16.gmra.mxu1 %v1688_v27  ;;  %791 = vmatmul.bf16.gmra.mxu3 %v1816_v45  ;;  %v2035_v27 = vld [vmem:[%s3786_s0 + $0x154] sm:$0xf]  ;;  %v1741_v45 = vld [vmem:[%s3786_s0 + $0x88] sm:$0xf0]  ;;  %v1740_v46 = vor.u32 %v2010_v43, %v1739_v42  ;;  %v2016_v42 = vld [vmem:[%s3786_s0 + $0xb4] sm:$0xf0] }
  0x33   :  { %v1848_v29 = vor.u32 %v2035_v27, %v1845_v28  ;;  %v1744_v47 = vor.u32 %v2009_v44, %v1741_v45  ;;  %v2015_v43 = vld [vmem:[%s3786_s0 + $0xb4] sm:$0xf]  ;;  %v1765_v44 = vld [vmem:[%s3786_s0 + $0xb8] sm:$0xf0] }
  0x41   :  { %547 = vmatmul.bf16.gmra.mxu0 %v1692_v38  ;;  %627 = vmatmul.bf16.gmra.mxu2 %v1820_v54  ;;  %v1852_v38 = vor.u32 %v2038_v37, %v1851_v36  ;;  %v2039_v54 = vld [vmem:[%s3786_s0 + $0x174] sm:$0xf] }
  0x42   :  { %716 = vmatmul.bf16.gmra.mxu1 %v1696_v39  ;;  %796 = vmatmul.bf16.gmra.mxu3 %v1824_v57  ;;  %v2037_v39 = vld [vmem:[%s3786_s0 + $0x164] sm:$0xf]  ;;  %v1864_v56 = vor.u32 %v2039_v54, %v1861_v55  ;;  %v1883_v54 = vld [vmem:[%s3786_s0 + $0x1a0] sm:$0xf]  ;;  %v2046_v55 = vld [vmem:[%s3786_s0 + $0x1a4] sm:$0xf0] }
  0x43   :  { %v1856_v41 = vor.u32 %v2037_v39, %v1853_v40 }
  0x51   :  { %552 = vmatmul.bf16.gmra.mxu0 %v1700_v50  ;;  %632 = vmatmul.bf16.gmra.mxu2 %v1828_v2  ;;  %v1859_v50 = vld [vmem:[%s3786_s0 + $0x170] sm:$0xf] }
  0x52   :  { %721 = vmatmul.bf16.gmra.mxu1 %v1704_v51  ;;  %801 = vmatmul.bf16.gmra.mxu3 %v1832_v5  ;;  %v1860_v53 = vor.u32 %v2040_v52, %v1859_v50 }
  0x61   :  { %557 = vmatmul.bf16.gmra.mxu0 %v1708_v62  ;;  %637 = vmatmul.bf16.gmra.mxu2 %v1836_v14  ;;  %v2011_v62 = vld [vmem:[%s3786_s0 + $0x94] sm:$0xf] }
  0x62   :  { %726 = vmatmul.bf16.gmra.mxu1 %v1712_v63  ;;  %806 = vmatmul.bf16.gmra.mxu3 %v1840_v17  ;;  %v1749_v63 = vld [vmem:[%s3786_s0 + $0x98] sm:$0xf0]  ;;  %v1755_v17 = vld [vmem:[%s3786_s0 + $0xa0] sm:$0xf] }
  0x63   :  { %v1752_v1 = vor.u32 %v2011_v62, %v1749_v63  ;;  %v1756_v21 = vor.u32 %v2014_v18, %v1755_v17  ;;  %v1891_v18 = vld [vmem:[%s3786_s0 + $0x1b0] sm:$0xf] }
  0x71   :  { %562 = vmatmul.bf16.gmra.mxu0 %v1716_v10  ;;  %642 = vmatmul.bf16.gmra.mxu2 %v1844_v26  ;;  %v1872_v10 = vor.u32 %v2041_v8, %v1869_v9 }
  0x72   :  { %731 = vmatmul.bf16.gmra.mxu1 %v1720_v11  ;;  %811 = vmatmul.bf16.gmra.mxu3 %v1848_v29  ;;  %v1875_v29 = vld [vmem:[%s3786_s0 + $0x190] sm:$0xf] }
  0x73   :  { %v1876_v31 = vor.u32 %v2044_v30, %v1875_v29 }
  0x81   :  { %567 = vmatmul.bf16.gmra.mxu0 %v1724_v22  ;;  %647 = vmatmul.bf16.gmra.mxu2 %v1852_v38  ;;  %v1760_v22 = vor.u32 %v2013_v19, %v1757_v20  ;;  %v2048_v19 = vld [vmem:[%s3786_s0 + $0x1b4] sm:$0xf0] }
  0x82   :  { %736 = vmatmul.bf16.gmra.mxu1 %v1728_v23  ;;  %816 = vmatmul.bf16.gmra.mxu3 %v1856_v41  ;;  %v1763_v41 = vld [vmem:[%s3786_s0 + $0xb0] sm:$0xf]  ;;  %v1892_v20 = vor.u32 %v2048_v19, %v1891_v18 }
  0x83   :  { %v1764_v45 = vor.u32 %v2016_v42, %v1763_v41 }
  0x91   :  { %572 = vmatmul.bf16.gmra.mxu0 %v1732_v34  ;;  %652 = vmatmul.bf16.gmra.mxu2 %v1860_v53  ;;  %v1880_v34 = vor.u32 %v2043_v32, %v1877_v33  ;;  %v1779_v32 = vld [vmem:[%s3786_s0 + $0xd0] sm:$0xf]  ;;  %v2020_v33 = vld [vmem:[%s3786_s0 + $0xd4] sm:$0xf0] }
  0x92   :  { %741 = vmatmul.bf16.gmra.mxu1 %v1736_v35  ;;  %821 = vmatmul.bf16.gmra.mxu3 %v1864_v56  ;;  %v1884_v56 = vor.u32 %v2046_v55, %v1883_v54 }
  0x9e   :  { %v538_v48 = vpop.f32.mrf.mxu0 }
  0x9f   :  { %v707_v49 = vpop.f32.mrf.mxu1 }
  0xa0   :  { %v2360_v51 = vadd.f32 %v707_v49, %v538_v48 }
  0xa1   :  { %577 = vmatmul.bf16.gmra.mxu0 %v1740_v46  ;;  %657 = vmatmul.bf16.gmra.mxu2 %v1868_v7  ;;  %v1768_v46 = vor.u32 %v2015_v43, %v1765_v44  ;;  %v1773_v7 = vld [vmem:[%s3786_s0 + $0xc8] sm:$0xf0] }
  0xa2   :  { %746 = vmatmul.bf16.gmra.mxu1 %v1744_v47  ;;  %826 = vmatmul.bf16.gmra.mxu3 %v1872_v10  ;;  %v1776_v9 = vor.u32 %v2017_v6, %v1773_v7 }
  0xa4   :  { %v618_v11 = vpop.f32.mrf.mxu2 }
  0xa5   :  { %v787_v12 = vpop.f32.mrf.mxu3 }
  0xa6   :  { %v540_v57 = vpop.f32.mrf.mxu0  ;;  %v2401_v16 = vadd.f32 %v787_v12, %v618_v11 }
  0xa7   :  { %v709_v58 = vpop.f32.mrf.mxu1 }
  0xa8   :  { %v2371_v59 = vadd.f32 %v709_v58, %v540_v57  ;;  %v2045_v57 = vld [vmem:[%s3786_s0 + $0x1a4] sm:$0xf]  ;;  %v1885_v58 = vld [vmem:[%s3786_s0 + $0x1a8] sm:$0xf0] }
  0xa9   :  { %v1888_v60 = vor.u32 %v2045_v57, %v1885_v58 }
  0xac   :  { %v620_v23 = vpop.f32.mrf.mxu2 }
  0xad   :  { %v789_v24 = vpop.f32.mrf.mxu3 }
  0xae   :  { %v543_v2 = vpop.f32.mrf.mxu0  ;;  %v2415_v27 = vadd.f32 %v789_v24, %v620_v23 }
  0xaf   :  { %v712_v3 = vpop.f32.mrf.mxu1 }
  0xb0   :  { %v2388_v5 = vadd.f32 %v712_v3, %v543_v2  ;;  %v1771_v3 = vld [vmem:[%s3786_s0 + $0xc0] sm:$0xf] }
  0xb1   :  { %582 = vmatmul.bf16.gmra.mxu0 %v1748_v0  ;;  %662 = vmatmul.bf16.gmra.mxu2 %v1876_v31  ;;  %v1772_v8 = vor.u32 %v2018_v4, %v1771_v3  ;;  %v1789_v3 = vld [vmem:[%s3786_s0 + $0xe8] sm:$0xf0] }
  0xb2   :  { %751 = vmatmul.bf16.gmra.mxu1 %v1752_v1  ;;  %831 = vmatmul.bf16.gmra.mxu3 %v1880_v34  ;;  %v2019_v34 = vld [vmem:[%s3786_s0 + $0xd4] sm:$0xf] }
  0xb4   :  { %v623_v35 = vpop.f32.mrf.mxu2 }
  0xb5   :  { %v792_v36 = vpop.f32.mrf.mxu3 }
  0xb6   :  { %v545_v13 = vpop.f32.mrf.mxu0  ;;  %v2433_v40 = vadd.f32 %v792_v36, %v623_v35  ;;  %v1781_v35 = vld [vmem:[%s3786_s0 + $0xd8] sm:$0xf0]  ;;  %v1780_v36 = vor.u32 %v2020_v33, %v1779_v32  ;;  %v1795_v33 = vld [vmem:[%s3786_s0 + $0xf0] sm:$0xf] }
  0xb7   :  { %v714_v14 = vpop.f32.mrf.mxu1 }
  0xb8   :  { %v2399_v15 = vadd.f32 %v714_v14, %v545_v13 }
  0xbc   :  { %v625_v47 = vpop.f32.mrf.mxu2 }
  0xbd   :  { %v794_v48 = vpop.f32.mrf.mxu3 }
  0xbe   :  { %v548_v25 = vpop.f32.mrf.mxu0  ;;  %v2447_v52 = vadd.f32 %v794_v48, %v625_v47  ;;  %v2050_v47 = vld [vmem:[%s3786_s0 + $0x1c4] sm:$0xf0] }
  0xbf   :  { %v717_v26 = vpop.f32.mrf.mxu1 }
  0xc0   :  { %v2417_v28 = vadd.f32 %v717_v26, %v548_v25 }
  0xc1   :  { %587 = vmatmul.bf16.gmra.mxu0 %v1756_v21  ;;  %667 = vmatmul.bf16.gmra.mxu2 %v1884_v56  ;;  %v2047_v21 = vld [vmem:[%s3786_s0 + $0x1b4] sm:$0xf] }
  0xc2   :  { %756 = vmatmul.bf16.gmra.mxu1 %v1760_v22  ;;  %836 = vmatmul.bf16.gmra.mxu3 %v1888_v60  ;;  %v1893_v22 = vld [vmem:[%s3786_s0 + $0x1b8] sm:$0xf0] }
  0xc3   :  { %v1896_v23 = vor.u32 %v2047_v21, %v1893_v22  ;;  %v1909_v21 = vld [vmem:[%s3786_s0 + $0x1d8] sm:$0xf0] }
  0xc4   :  { %v628_v61 = vpop.f32.mrf.mxu2 }
  0xc5   :  { %v797_v62 = vpop.f32.mrf.mxu3 }
  0xc6   :  { %v550_v37 = vpop.f32.mrf.mxu0  ;;  %v2465_v2 = vadd.f32 %v797_v62, %v628_v61  ;;  %v1787_v62 = vld [vmem:[%s3786_s0 + $0xe0] sm:$0xf] }
  0xc7   :  { %v719_v38 = vpop.f32.mrf.mxu1 }
  0xc8   :  { %v2431_v39 = vadd.f32 %v719_v38, %v550_v37  ;;  %v1784_v37 = vor.u32 %v2019_v34, %v1781_v35  ;;  %v2024_v34 = vld [vmem:[%s3786_s0 + $0xf4] sm:$0xf0]  ;;  %v2023_v35 = vld [vmem:[%s3786_s0 + $0xf4] sm:$0xf] }
  0xcc   :  { %v630_v10 = vpop.f32.mrf.mxu2 }
  0xcd   :  { %v799_v11 = vpop.f32.mrf.mxu3 }
  0xce   :  { %v553_v49 = vpop.f32.mrf.mxu0  ;;  %v2479_v14 = vadd.f32 %v799_v11, %v630_v10 }
  0xcf   :  { %v722_v50 = vpop.f32.mrf.mxu1 }
  0xd0   :  { %v2449_v53 = vadd.f32 %v722_v50, %v553_v49  ;;  %v2049_v49 = vld [vmem:[%s3786_s0 + $0x1c4] sm:$0xf]  ;;  %v1901_v50 = vld [vmem:[%s3786_s0 + $0x1c8] sm:$0xf0] }
  0xd1   :  { %592 = vmatmul.bf16.gmra.mxu0 %v1764_v45  ;;  %672 = vmatmul.bf16.gmra.mxu2 %v1892_v20  ;;  %v1904_v54 = vor.u32 %v2049_v49, %v1901_v50  ;;  %v2051_v20 = vld [vmem:[%s3786_s0 + $0x1d4] sm:$0xf] }
  0xd2   :  { %761 = vmatmul.bf16.gmra.mxu1 %v1768_v46  ;;  %841 = vmatmul.bf16.gmra.mxu3 %v1896_v23  ;;  %v1899_v46 = vld [vmem:[%s3786_s0 + $0x1c0] sm:$0xf]  ;;  %v1912_v22 = vor.u32 %v2051_v20, %v1909_v21  ;;  %v2055_v20 = vld [vmem:[%s3786_s0 + $0x1f4] sm:$0xf]  ;;  %v1925_v21 = vld [vmem:[%s3786_s0 + $0x1f8] sm:$0xf0] }
  0xd3   :  { %v1900_v48 = vor.u32 %v2050_v47, %v1899_v46  ;;  %v1915_v46 = vld [vmem:[%s3786_s0 + $0x1e0] sm:$0xf]  ;;  %v2054_v47 = vld [vmem:[%s3786_s0 + $0x1e4] sm:$0xf0] }
  0xd4   :  { %v633_v24 = vpop.f32.mrf.mxu2  ;;  %v1916_v50 = vor.u32 %v2054_v47, %v1915_v46 }
  0xd5   :  { %v802_v25 = vpop.f32.mrf.mxu3 }
  0xd6   :  { %v555_v63 = vpop.f32.mrf.mxu0  ;;  %v2497_v31 = vadd.f32 %v802_v25, %v633_v24 }
  0xd7   :  { %v724_v0 = vpop.f32.mrf.mxu1 }
  0xd8   :  { %v2463_v1 = vadd.f32 %v724_v0, %v555_v63  ;;  %v2022_v63 = vld [vmem:[%s3786_s0 + $0xe4] sm:$0xf0]  ;;  %v2021_v0 = vld [vmem:[%s3786_s0 + $0xe4] sm:$0xf] }
  0xd9   :  { %v1788_v4 = vor.u32 %v2022_v63, %v1787_v62  ;;  %v1792_v6 = vor.u32 %v2021_v0, %v1789_v3 }
  0xdc   :  { %v635_v38 = vpop.f32.mrf.mxu2 }
  0xdd   :  { %v804_v41 = vpop.f32.mrf.mxu3 }
  0xde   :  { %v558_v12 = vpop.f32.mrf.mxu0  ;;  %v2511_v44 = vadd.f32 %v804_v41, %v635_v38 }
  0xdf   :  { %v727_v13 = vpop.f32.mrf.mxu1 }
  0xe0   :  { %v2481_v17 = vadd.f32 %v727_v13, %v558_v12  ;;  %v1907_v12 = vld [vmem:[%s3786_s0 + $0x1d0] sm:$0xf]  ;;  %v2052_v13 = vld [vmem:[%s3786_s0 + $0x1d4] sm:$0xf0] }
  0xe1   :  { %597 = vmatmul.bf16.gmra.mxu0 %v1772_v8  ;;  %677 = vmatmul.bf16.gmra.mxu2 %v1900_v48  ;;  %v1908_v19 = vor.u32 %v2052_v13, %v1907_v12 }
  0xe2   :  { %766 = vmatmul.bf16.gmra.mxu1 %v1776_v9  ;;  %846 = vmatmul.bf16.gmra.mxu3 %v1904_v54  ;;  %v2053_v54 = vld [vmem:[%s3786_s0 + $0x1e4] sm:$0xf] }
  0xe4   :  { %v638_v55 = vpop.f32.mrf.mxu2 }
  0xe5   :  { %v807_v56 = vpop.f32.mrf.mxu3 }
  0xe6   :  { %v560_v26 = vpop.f32.mrf.mxu0  ;;  %v2529_v61 = vadd.f32 %v807_v56, %v638_v55  ;;  %v1917_v55 = vld [vmem:[%s3786_s0 + $0x1e8] sm:$0xf0] }
  0xe7   :  { %v729_v29 = vpop.f32.mrf.mxu1 }
  0xe8   :  { %v2495_v30 = vadd.f32 %v729_v29, %v560_v26 }
  0xec   :  { %v640_v7 = vpop.f32.mrf.mxu2 }
  0xed   :  { %v809_v8 = vpop.f32.mrf.mxu3 }
  0xee   :  { %v563_v42 = vpop.f32.mrf.mxu0  ;;  %v2543_v11 = vadd.f32 %v809_v8, %v640_v7 }
  0xef   :  { %v732_v43 = vpop.f32.mrf.mxu1 }
  0xf0   :  { %v2513_v45 = vadd.f32 %v732_v43, %v563_v42 }
  0xf1   :  { %602 = vmatmul.bf16.gmra.mxu0 %v1780_v36  ;;  %682 = vmatmul.bf16.gmra.mxu2 %v1908_v19  ;;  %v1797_v36 = vld [vmem:[%s3786_s0 + $0xf8] sm:$0xf0] }
  0xf2   :  { %771 = vmatmul.bf16.gmra.mxu1 %v1784_v37  ;;  %851 = vmatmul.bf16.gmra.mxu3 %v1912_v22  ;;  %v1796_v37 = vor.u32 %v2024_v34, %v1795_v33  ;;  %v1800_v38 = vor.u32 %v2023_v35, %v1797_v36 }
  0xf4   :  { %v643_v23 = vpop.f32.mrf.mxu2 }
  0xf5   :  { %v812_v29 = vpop.f32.mrf.mxu3 }
  0xf6   :  { %v565_v57 = vpop.f32.mrf.mxu0  ;;  %v2561_v32 = vadd.f32 %v812_v29, %v643_v23  ;;  %v1928_v23 = vor.u32 %v2055_v20, %v1925_v21 }
  0xf7   :  { %v734_v58 = vpop.f32.mrf.mxu1 }
  0xf8   :  { %v2527_v60 = vadd.f32 %v734_v58, %v565_v57  ;;  %v1920_v57 = vor.u32 %v2053_v54, %v1917_v55 }
  0xfc   :  { %v645_v41 = vpop.f32.mrf.mxu2 }
  0xfd   :  { %v814_v49 = vpop.f32.mrf.mxu3 }
  0xfe   :  { %v568_v9 = vpop.f32.mrf.mxu0  ;;  %v2589_v56 = vadd.f32 %v814_v49, %v645_v41 }
  0xff   :  { %v737_v10 = vpop.f32.mrf.mxu1 }
 0x100   :  { %v2551_v18 = vadd.f32 %v737_v10, %v568_v9  ;;  %v1923_v9 = vld [vmem:[%s3786_s0 + $0x1f0] sm:$0xf]  ;;  %v2056_v10 = vld [vmem:[%s3786_s0 + $0x1f4] sm:$0xf0] }
 0x101   :  { %607 = vmatmul.bf16.gmra.mxu0 %v1788_v4  ;;  %687 = vmatmul.bf16.gmra.mxu2 %v1916_v50  ;;  %v1924_v19 = vor.u32 %v2056_v10, %v1923_v9 }
 0x102   :  { %776 = vmatmul.bf16.gmra.mxu1 %v1792_v6  ;;  %856 = vmatmul.bf16.gmra.mxu3 %v1920_v57 }
 0x104   :  { %v648_v58 = vpop.f32.mrf.mxu2 }
 0x105   :  { %v817_v3 = vpop.f32.mrf.mxu3 }
 0x106   :  { %v570_v24 = vpop.f32.mrf.mxu0  ;;  %v2593_v4 = vadd.f32 %v817_v3, %v648_v58 }
 0x107   :  { %v739_v25 = vpop.f32.mrf.mxu1 }
 0x108   :  { %v2559_v26 = vadd.f32 %v739_v25, %v570_v24 }
 0x10c   :  { %v650_v6 = vpop.f32.mrf.mxu2 }
 0x10d   :  { %v819_v13 = vpop.f32.mrf.mxu3 }
 0x10e   :  { %v573_v42 = vpop.f32.mrf.mxu0  ;;  %v2609_v22 = vadd.f32 %v819_v13, %v650_v6 }
 0x10f   :  { %v742_v43 = vpop.f32.mrf.mxu1 }
 0x110   :  { %v2581_v48 = vadd.f32 %v742_v43, %v573_v42 }
 0x111   :  { %612 = vmatmul.bf16.gmra.mxu0 %v1796_v37  ;;  %692 = vmatmul.bf16.gmra.mxu2 %v1924_v19 }
 0x112   :  { %781 = vmatmul.bf16.gmra.mxu1 %v1800_v38  ;;  %861 = vmatmul.bf16.gmra.mxu3 %v1928_v23 }
 0x114   :  { %v653_v24 = vpop.f32.mrf.mxu2 }
 0x115   :  { %v822_v34 = vpop.f32.mrf.mxu3 }
 0x116   :  { %v575_v62 = vpop.f32.mrf.mxu0  ;;  %v2613_v35 = vadd.f32 %v822_v34, %v653_v24 }
 0x117   :  { %v744_v63 = vpop.f32.mrf.mxu1 }
 0x118   :  { %v2591_v0 = vadd.f32 %v744_v63, %v575_v62 }
 0x11c   :  { %v655_v36 = vpop.f32.mrf.mxu2 }
 0x11d   :  { %v824_v42 = vpop.f32.mrf.mxu3 }
 0x11e   :  { %v578_v7 = vpop.f32.mrf.mxu0  ;;  %v2617_v43 = vadd.f32 %v824_v42, %v655_v36 }
 0x11f   :  { %v747_v8 = vpop.f32.mrf.mxu1 }
 0x120   :  { %v2601_v12 = vadd.f32 %v747_v8, %v578_v7 }
 0x124   :  { %v658_v46 = vpop.f32.mrf.mxu2 }
 0x125   :  { %v827_v54 = vpop.f32.mrf.mxu3 }
 0x126   :  { %v580_v25 = vpop.f32.mrf.mxu0  ;;  %v2621_v55 = vadd.f32 %v827_v54, %v658_v46 }
 0x127   :  { %v749_v29 = vpop.f32.mrf.mxu1 }
 0x128   :  { %v2611_v33 = vadd.f32 %v749_v29, %v580_v25  ;;  %v868_v25 = vmul.f32 0.01, %v2371_v59  ;;  %v867_v29 = vmul.f32 0.01, %v2360_v51 }
 0x12a   :  { %v2647_v46 = vmax.f32 %v2371_v59, %v868_v25  ;;  %v2653_v54 = vmax.f32 %v2360_v51, %v867_v29  ;;  %v872_v59 = vmul.f32 0.01, %v2431_v39  ;;  %v873_v51 = vmul.f32 0.01, %v2449_v53 }
 0x12b   :  { %v874_v29 = vmul.f32 0.01, %v2463_v1 }
 0x12c   :  { %v660_v57 = vpop.f32.mrf.mxu2  ;;  %3820 = vst [vmem:[#allocation4_spill] sm:$0xff] %v2647_v46  ;;  %v998_v25 = vsel %vm997_vm0, %v2653_v54, 0.0 }
 0x12d   :  { %v829_v3 = vpop.f32.mrf.mxu3  ;;  %3822 = vst [vmem:[#allocation6_spill] sm:$0xff] %v2653_v54 }
 0x12e   :  { %v583_v37 = vpop.f32.mrf.mxu0  ;;  %v2625_v6 = vadd.f32 %v829_v3, %v660_v57 }
 0x12f   :  { %v752_v38 = vpop.f32.mrf.mxu1 }
 0x130   :  { %v2615_v41 = vadd.f32 %v752_v38, %v583_v37  ;;  %v869_v37 = vmul.f32 0.01, %v2388_v5 }
 0x132   :  { %v2656_v57 = vmax.f32 %v2388_v5, %v869_v37 }
 0x134   :  { %v663_v7 = vpop.f32.mrf.mxu2  ;;  %3823 = vst [vmem:[#allocation7_spill] sm:$0xff] %v2656_v57 }
 0x135   :  { %v832_v10 = vpop.f32.mrf.mxu3 }
 0x136   :  { %v585_v47 = vpop.f32.mrf.mxu0  ;;  %v2631_v13 = vadd.f32 %v832_v10, %v663_v7  ;;  %v1132_v7 = vmul.f32 %v2653_v54, %v2653_v54 }
 0x137   :  { %v754_v49 = vpop.f32.mrf.mxu1 }
 0x138   :  { %v2619_v50 = vadd.f32 %v754_v49, %v585_v47  ;;  %3818 = vst [vmem:[#allocation2_spill] sm:$0xff] %v2631_v13  ;;  %v870_v47 = vmul.f32 0.01, %v2399_v15 }
 0x13a   :  { %v2662_v3 = vmax.f32 %v2399_v15, %v870_v47  ;;  %v2688_v47 = vmax.f32 %v2431_v39, %v872_v59  ;;  %v2701_v39 = vmax.f32 %v2463_v1, %v874_v29 }
 0x13c   :  { %v665_v19 = vpop.f32.mrf.mxu2  ;;  %3824 = vst [vmem:[#allocation8_spill] sm:$0xff] %v2662_v3  ;;  %v1007_v29 = vsel %vm997_vm0, %v2688_v47, 0.0 }
 0x13d   :  { %v834_v23 = vpop.f32.mrf.mxu3  ;;  %3826 = vst [vmem:[#allocation10_spill] sm:$0xff] %v2688_v47 }
 0x13e   :  { %v588_v58 = vpop.f32.mrf.mxu0  ;;  %v2637_v24 = vadd.f32 %v834_v23, %v665_v19  ;;  %v999_v19 = vsel %vm997_vm0, %v2647_v46, 0.0  ;;  %v1134_v23 = vmul.f32 %v2656_v57, %v2656_v57  ;;  %3827 = vst [vmem:[#allocation11_spill] sm:$0xff] %v2701_v39 }
 0x13f   :  { %v757_v62 = vpop.f32.mrf.mxu1 }
 0x140   :  { %v2623_v63 = vadd.f32 %v757_v62, %v588_v58  ;;  %3819 = vst [vmem:[#allocation3_spill] sm:$0xff] %v2637_v24  ;;  %v871_v58 = vmul.f32 0.01, %v2417_v28  ;;  %v1133_v62 = vmul.f32 %v2647_v46, %v2647_v46  ;;  %v1196_v46 = vsel %vm997_vm0, %v1132_v7, 0.0 }
 0x141   :  { %v1199_v54 = vsel %vm997_vm0, %v1134_v23, 0.0  ;;  %v1137_v7 = vmul.f32 %v2688_v47, %v2688_v47 }
 0x142   :  { %v2677_v15 = vmax.f32 %v2417_v28, %v871_v58  ;;  %v1197_v37 = vsel %vm997_vm0, %v1133_v62, 0.0  ;;  %v1000_v28 = vadd.f32 %v999_v19, %v998_v25  ;;  %v2692_v58 = vmax.f32 %v2449_v53, %v873_v51 }
 0x143   :  { %v1003_v62 = vsel %vm997_vm0, %v2662_v3, 0.0  ;;  %v1198_v24 = vadd.f32 %v1197_v37, %v1196_v46  ;;  %v876_v51 = vmul.f32 0.01, %v2495_v30 }
 0x144   :  { %v668_v38 = vpop.f32.mrf.mxu2  ;;  %3825 = vst [vmem:[#allocation9_spill] sm:$0xff] %v2677_v15  ;;  %v1005_v53 = vsel %vm997_vm0, %v2677_v15, 0.0  ;;  %v1138_v25 = vmul.f32 %v2692_v58, %v2692_v58 }
 0x145   :  { %v837_v42 = vpop.f32.mrf.mxu3  ;;  %v1200_v19 = vadd.f32 %v1199_v54, %v1198_v24  ;;  %v2732_v47 = vmax.f32 %v2495_v30, %v876_v51 }
 0x146   :  { %v2627_v8 = vpop.f32.mrf.mxu0  ;;  %v2650_v49 = vadd.f32 %v837_v42, %v668_v38  ;;  %v1001_v38 = vsel %vm997_vm0, %v2656_v57, 0.0  ;;  %v1135_v42 = vmul.f32 %v2662_v3, %v2662_v3  ;;  %v1136_v57 = vmul.f32 %v2677_v15, %v2677_v15 }
 0x147   :  { %v2629_v9 = vpop.f32.mrf.mxu1  ;;  %v1002_v13 = vadd.f32 %v1001_v38, %v1000_v28  ;;  %v1205_v15 = vsel %vm997_vm0, %v1137_v7, 0.0  ;;  %3830 = vst [vmem:[#allocation14_spill] sm:$0xff] %v2732_v47 }
 0x148   :  { %3821 = vst [vmem:[#allocation5_spill] sm:$0xff] %v2650_v49  ;;  %v875_v49 = vmul.f32 0.01, %v2481_v17  ;;  %v1201_v59 = vsel %vm997_vm0, %v1135_v42, 0.0  ;;  %v1203_v1 = vsel %vm997_vm0, %v1136_v57, 0.0  ;;  %v1009_v57 = vsel %vm997_vm0, %v2692_v58, 0.0 }
 0x149   :  { %v1004_v23 = vadd.f32 %v1003_v62, %v1002_v13  ;;  %v877_v42 = vmul.f32 0.01, %v2513_v45  ;;  %v1202_v24 = vadd.f32 %v1201_v59, %v1200_v19  ;;  %v1139_v62 = vmul.f32 %v2701_v39, %v2701_v39 }
 0x14a   :  { %v2719_v38 = vmax.f32 %v2481_v17, %v875_v49  ;;  %v878_v17 = vmul.f32 0.01, %v2527_v60  ;;  %v1011_v59 = vsel %vm997_vm0, %v2701_v39, 0.0  ;;  %v879_v19 = vmul.f32 0.01, %v2551_v18 }
 0x14b   :  { %v1006_v54 = vadd.f32 %v1005_v53, %v1004_v23  ;;  %v1204_v49 = vadd.f32 %v1203_v1, %v1202_v24  ;;  %v2741_v7 = vmax.f32 %v2513_v45, %v877_v42  ;;  %v1209_v51 = vsel %vm997_vm0, %v1139_v62, 0.0 }
 0x14c   :  { %3828 = vst [vmem:[#allocation12_spill] sm:$0xff] %v2719_v38  ;;  %v2722_v28 = vpop.f32.mrf.mxu2  ;;  %v1140_v53 = vmul.f32 %v2719_v38, %v2719_v38  ;;  %v1013_v1 = vsel %vm997_vm0, %v2719_v38, 0.0  ;;  %v880_v24 = vmul.f32 0.01, %v2559_v26  ;;  %v881_v42 = vmul.f32 0.01, %v2581_v48 }
 0x14d   :  { %3829 = vst [vmem:[#allocation13_spill] sm:$0xff] %v2722_v28  ;;  %v2724_v13 = vpop.f32.mrf.mxu3  ;;  %v1008_v3 = vadd.f32 %v1007_v29, %v1006_v54  ;;  %v1207_v28 = vsel %vm997_vm0, %v1138_v25, 0.0  ;;  %v1206_v23 = vadd.f32 %v1205_v15, %v1204_v49  ;;  %v1141_v25 = vmul.f32 %v2732_v47, %v2732_v47 }
 0x14e   :  { %v2633_v20 = vpop.f32.mrf.mxu0  ;;  %3831 = vst [vmem:[#allocation15_spill] sm:$0xff] %v2741_v7  ;;  %v2750_v29 = vmax.f32 %v2527_v60, %v878_v17  ;;  %v1211_v15 = vsel %vm997_vm0, %v1140_v53, 0.0  ;;  %v1015_v62 = vsel %vm997_vm0, %v2732_v47, 0.0  ;;  %v2764_v60 = vmax.f32 %v2551_v18, %v879_v19 }
 0x14f   :  { %v2635_v21 = vpop.f32.mrf.mxu1  ;;  %v1010_v30 = vadd.f32 %v1009_v57, %v1008_v3  ;;  %v1208_v54 = vadd.f32 %v1207_v28, %v1206_v23  ;;  %v1142_v57 = vmul.f32 %v2741_v7, %v2741_v7  ;;  %v882_v49 = vmul.f32 0.01, %v2591_v0 }
 0x150   :  { %3832 = vst [vmem:[#allocation16_spill] sm:$0xff] %v2764_v60  ;;  %v1017_v23 = vsel %vm997_vm0, %v2741_v7, 0.0  ;;  %v1143_v53 = vmul.f32 %v2750_v29, %v2750_v29 }
 0x151   :  { %v1012_v45 = vadd.f32 %v1011_v59, %v1010_v30  ;;  %v1210_v17 = vadd.f32 %v1209_v51, %v1208_v54  ;;  %v1213_v59 = vsel %vm997_vm0, %v1141_v25, 0.0  ;;  %v2773_v30 = vmax.f32 %v2559_v26, %v880_v24 }
 0x152   :  { %v2780_v51 = vmax.f32 %v2581_v48, %v881_v42  ;;  %v1019_v25 = vsel %vm997_vm0, %v2750_v29, 0.0  ;;  %v1144_v54 = vmul.f32 %v2764_v60, %v2764_v60  ;;  %v883_v26 = vmul.f32 0.01, %v2601_v12 }
 0x153   :  { %v1014_v28 = vadd.f32 %v1013_v1, %v1012_v45  ;;  %3833 = vst [vmem:[#allocation17_spill] sm:$0xff] %v2773_v30  ;;  %v1212_v18 = vadd.f32 %v1211_v15, %v1210_v17  ;;  %v1215_v1 = vsel %vm997_vm0, %v1142_v57, 0.0  ;;  %v2789_v7 = vmax.f32 %v2591_v0, %v882_v49 }
 0x154   :  { %v2775_v47 = vpop.f32.mrf.mxu2  ;;  %v1217_v15 = vsel %vm997_vm0, %v1143_v53, 0.0  ;;  %v1021_v48 = vsel %vm997_vm0, %v2764_v60, 0.0  ;;  %v1145_v42 = vmul.f32 %v2773_v30, %v2773_v30  ;;  %v1219_v0 = vsel %vm997_vm0, %v1144_v54, 0.0 }
 0x155   :  { %v2777_v38 = vpop.f32.mrf.mxu3  ;;  %v1016_v19 = vadd.f32 %v1015_v62, %v1014_v28  ;;  %v1214_v24 = vadd.f32 %v1213_v59, %v1212_v18  ;;  %v884_v62 = vmul.f32 0.01, %v2611_v33  ;;  %v1146_v28 = vmul.f32 %v2780_v51, %v2780_v51 }
 0x156   :  { %v2641_v34 = vpop.f32.mrf.mxu0  ;;  %v1023_v49 = vsel %vm997_vm0, %v2773_v30, 0.0  ;;  %v2807_v53 = vmax.f32 %v2601_v12, %v883_v26  ;;  %v885_v18 = vmul.f32 0.01, %v2615_v41  ;;  %v1025_v54 = vsel %vm997_vm0, %v2780_v51, 0.0 }
 0x157   :  { %v2643_v36 = vpop.f32.mrf.mxu1  ;;  %v1018_v45 = vadd.f32 %v1017_v23, %v1016_v19  ;;  %v1216_v57 = vadd.f32 %v1215_v1, %v1214_v24  ;;  %v760_v24 = vadd.f32 %v2629_v9, %v2627_v8  ;;  %v2818_v30 = vmax.f32 %v2611_v33, %v884_v62 }
 0x158   :  { %3834 = vst [vmem:[#allocation18_spill] sm:$0xff] %v2807_v53  ;;  %v886_v12 = vmul.f32 0.01, %v2619_v50  ;;  %v1148_v8 = vmul.f32 %v2807_v53, %v2807_v53  ;;  %v2828_v9 = vmax.f32 %v2615_v41, %v885_v18  ;;  %v763_v33 = vadd.f32 %v2635_v21, %v2633_v20 }
 0x159   :  { %v1020_v17 = vadd.f32 %v1019_v25, %v1018_v45  ;;  %v1218_v19 = vadd.f32 %v1217_v15, %v1216_v57  ;;  %v1147_v25 = vmul.f32 %v2789_v7, %v2789_v7  ;;  %v1221_v45 = vsel %vm997_vm0, %v1145_v42, 0.0 }
 0x15a   :  { %v1223_v15 = vsel %vm997_vm0, %v1146_v28, 0.0  ;;  %v1027_v57 = vsel %vm997_vm0, %v2789_v7, 0.0  ;;  %v2842_v41 = vmax.f32 %v2619_v50, %v886_v12  ;;  %v765_v20 = vadd.f32 %v2643_v36, %v2641_v34 }
 0x15b   :  { %v1022_v1 = vadd.f32 %v1021_v48, %v1020_v17  ;;  %v1220_v26 = vadd.f32 %v1219_v0, %v1218_v19  ;;  %v887_v48 = vmul.f32 0.01, %v2623_v63  ;;  %v1225_v0 = vsel %vm997_vm0, %v1147_v25, 0.0 }
 0x15c   :  { %v2832_v42 = vpop.f32.mrf.mxu2  ;;  %v1029_v19 = vsel %vm997_vm0, %v2807_v53, 0.0  ;;  %v1031_v53 = vsel %vm997_vm0, %v2818_v30, 0.0  ;;  %v1150_v50 = vmul.f32 %v2828_v9, %v2828_v9  ;;  %v889_v12 = vmul.f32 0.01, %v763_v33 }
 0x15d   :  { %v1024_v60 = vadd.f32 %v1023_v49, %v1022_v1  ;;  %v2834_v62 = vpop.f32.mrf.mxu3  ;;  %v1222_v17 = vadd.f32 %v1221_v45, %v1220_v26  ;;  %v888_v49 = vmul.f32 0.01, %v760_v24  ;;  %v1149_v1 = vmul.f32 %v2818_v30, %v2818_v30 }
 0x15e   :  { %v2668_v10 = vpop.f32.mrf.mxu0  ;;  %v2847_v45 = vmax.f32 %v2623_v63, %v887_v48  ;;  %v1227_v26 = vsel %vm997_vm0, %v1148_v8, 0.0  ;;  %v1151_v48 = vmul.f32 %v2842_v41, %v2842_v41 }
 0x15f   :  { %v2670_v5 = vpop.f32.mrf.mxu1  ;;  %v1026_v28 = vadd.f32 %v1025_v54, %v1024_v60  ;;  %v1224_v21 = vadd.f32 %v1223_v15, %v1222_v17  ;;  %v2856_v15 = vmax.f32 %v760_v24, %v888_v49  ;;  %v1231_v24 = vsel %vm997_vm0, %v1150_v50, 0.0 }
 0x160   :  { %3835 = vst [vmem:[#allocation19_spill] sm:$0xff] %v2847_v45  ;;  %v768_v60 = vadd.f32 %v2670_v5, %v2668_v10  ;;  %v1229_v10 = vsel %vm997_vm0, %v1149_v1, 0.0  ;;  %v1033_v5 = vsel %vm997_vm0, %v2828_v9, 0.0 }
 0x161   :  { %v1028_v18 = vadd.f32 %v1027_v57, %v1026_v28  ;;  %v1226_v34 = vadd.f32 %v1225_v0, %v1224_v21  ;;  %3836 = vst [vmem:[#allocation20_spill] sm:$0xff] %v2856_v15  ;;  %v890_v57 = vmul.f32 0.01, %v765_v20  ;;  %v1152_v28 = vmul.f32 %v2847_v45, %v2847_v45 }
 0x162   :  { %v891_v0 = vmul.f32 0.01, %v768_v60  ;;  %v1153_v21 = vmul.f32 %v2856_v15, %v2856_v15 }
 0x163   :  { %v1030_v36 = vadd.f32 %v1029_v19, %v1028_v18  ;;  %v1228_v8 = vadd.f32 %v1227_v26, %v1226_v34  ;;  %v1233_v18 = vsel %vm997_vm0, %v1151_v48, 0.0  ;;  %v1037_v26 = vsel %vm997_vm0, %v2847_v45, 0.0 }
 0x164   :  { %v2879_v50 = vmax.f32 %v765_v20, %v890_v57  ;;  %v1237_v45 = vsel %vm997_vm0, %v1153_v21, 0.0 }
 0x165   :  { %v1032_v17 = vadd.f32 %v1031_v53, %v1030_v36  ;;  %v1230_v19 = vadd.f32 %v1229_v10, %v1228_v8  ;;  %v2885_v34 = vpop.f32.mrf.mxu3  ;;  %v1235_v36 = vsel %vm997_vm0, %v1152_v28, 0.0  ;;  %v2888_v10 = vmax.f32 %v768_v60, %v891_v0 }
 0x166   :  { %v2711_v46 = vpop.f32.mrf.mxu0  ;;  %v1039_v8 = vsel %vm997_vm0, %v2856_v15, 0.0  ;;  %v1155_v28 = vmul.f32 %v2879_v50, %v2879_v50 }
 0x167   :  { %v2713_v37 = vpop.f32.mrf.mxu1  ;;  %v1034_v1 = vadd.f32 %v1033_v5, %v1032_v17  ;;  %v1156_v15 = vmul.f32 %v2888_v10, %v2888_v10 }
 0x168   :  { %v770_v63 = vadd.f32 %v2713_v37, %v2711_v46  ;;  %v1035_v46 = vsel %vm997_vm0, %v2842_v41, 0.0  ;;  %v2870_v37 = vmax.f32 %v763_v33, %v889_v12  ;;  %v2883_v12 = vpop.f32.mrf.mxu2 }
 0x16a   :  { %v892_v53 = vmul.f32 0.01, %v770_v63  ;;  %v1154_v20 = vmul.f32 %v2870_v37, %v2870_v37  ;;  %v1041_v60 = vsel %vm997_vm0, %v2870_v37, 0.0 }
 0x16e   :  { %v2754_v39 = vpop.f32.mrf.mxu0 }
 0x16f   :  { %v2756_v3 = vpop.f32.mrf.mxu1 }
 0x170   :  { %v773_v49 = vadd.f32 %v2756_v3, %v2754_v39  ;;  %v1232_v39 = vadd.f32 %v1231_v24, %v1230_v19  ;;  %v1036_v3 = vadd.f32 %v1035_v46, %v1034_v1  ;;  %v2895_v24 = vmax.f32 %v770_v63, %v892_v53 }
 0x172   :  { %v893_v57 = vmul.f32 0.01, %v773_v49  ;;  %v1038_v17 = vadd.f32 %v1037_v26, %v1036_v3  ;;  %v1157_v26 = vmul.f32 %v2895_v24, %v2895_v24  ;;  %v1045_v3 = vsel %vm997_vm0, %v2888_v10, 0.0 }
 0x174   :  { %v1040_v1 = vadd.f32 %v1039_v8, %v1038_v17  ;;  %v2906_v63 = vmax.f32 %v773_v49, %v893_v57 }
 0x176   :  { %v2799_v59 = vpop.f32.mrf.mxu0 }
 0x177   :  { %v2801_v23 = vpop.f32.mrf.mxu1 }
 0x178   :  { %v775_v33 = vadd.f32 %v2801_v23, %v2799_v59  ;;  %v1234_v23 = vadd.f32 %v1233_v18, %v1232_v39  ;;  %v1042_v18 = vadd.f32 %v1041_v60, %v1040_v1  ;;  %v1241_v39 = vsel %vm997_vm0, %v1155_v28, 0.0  ;;  %v2925_v1 = vpop.f32.mrf.mxu3 }
 0x17a   :  { %v894_v0 = vmul.f32 0.01, %v775_v33  ;;  %v1236_v19 = vadd.f32 %v1235_v36, %v1234_v23  ;;  %v1158_v23 = vmul.f32 %v2906_v63, %v2906_v63 }
 0x17c   :  { %v1238_v53 = vadd.f32 %v1237_v45, %v1236_v19  ;;  %v2913_v36 = vmax.f32 %v775_v33, %v894_v0  ;;  %v1047_v45 = vsel %vm997_vm0, %v2895_v24, 0.0  ;;  %v1245_v33 = vsel %vm997_vm0, %v1157_v26, 0.0  ;;  %v2923_v0 = vpop.f32.mrf.mxu2 }
 0x17e   :  { %v608_v25 = vpop.f32.mrf.mxu0  ;;  %3837 = vst [vmem:[#allocation21_spill] sm:$0xff] %v2913_v36  ;;  %v1051_v26 = vsel %vm997_vm0, %v2913_v36, 0.0 }
 0x17f   :  { %v777_v54 = vpop.f32.mrf.mxu1 }
 0x180   :  { %v778_v59 = vadd.f32 %v777_v54, %v608_v25  ;;  %v1239_v25 = vsel %vm997_vm0, %v1154_v20, 0.0  ;;  %v1043_v54 = vsel %vm997_vm0, %v2879_v50, 0.0  ;;  %v1243_v20 = vsel %vm997_vm0, %v1156_v15, 0.0 }
 0x181   :  { %v1044_v8 = vadd.f32 %v1043_v54, %v1042_v18  ;;  %v1049_v15 = vsel %vm997_vm0, %v2906_v63, 0.0  ;;  %v1247_v18 = vsel %vm997_vm0, %v1158_v23, 0.0 }
 0x182   :  { %v895_v21 = vmul.f32 0.01, %v778_v59 }
 0x183   :  { %v1046_v19 = vadd.f32 %v1045_v3, %v1044_v8 }
 0x184   :  { %v2920_v17 = vmax.f32 %v778_v59, %v895_v21 }
 0x185   :  { %v1048_v21 = vadd.f32 %v1047_v45, %v1046_v19 }
 0x186   :  { %v610_v5 = vpop.f32.mrf.mxu0  ;;  %3838 = vst [vmem:[#allocation22_spill] sm:$0xff] %v2920_v17 }
 0x187   :  { %v779_v48 = vpop.f32.mrf.mxu1 }
 0x188   :  { %v780_v46 = vadd.f32 %v779_v48, %v610_v5  ;;  %v1240_v48 = vadd.f32 %v1239_v25, %v1238_v53  ;;  %v1159_v25 = vmul.f32 %v2913_v36, %v2913_v36  ;;  %v2961_v36 = vpop.f32.mrf.mxu3 }
 0x18a   :  { %v896_v5 = vmul.f32 0.01, %v780_v46  ;;  %v1242_v28 = vadd.f32 %v1241_v39, %v1240_v48  ;;  %v1160_v39 = vmul.f32 %v2920_v17, %v2920_v17  ;;  %v899_v48 = vmul.f32 0.01, %v2401_v16 }
 0x18c   :  { %v2931_v54 = vmax.f32 %v780_v46, %v896_v5  ;;  %v1244_v59 = vadd.f32 %v1243_v20, %v1242_v28  ;;  %v1249_v46 = vsel %vm997_vm0, %v1159_v25, 0.0  ;;  %v1053_v5 = vsel %vm997_vm0, %v2920_v17, 0.0 }
 0x18d   :  { %v901_v17 = vmul.f32 0.01, %v2433_v40 }
 0x18e   :  { %v613_v49 = vpop.f32.mrf.mxu0  ;;  %3839 = vst [vmem:[#allocation23_spill] sm:$0xff] %v2931_v54  ;;  %v1246_v8 = vadd.f32 %v1245_v33, %v1244_v59  ;;  %v1161_v20 = vmul.f32 %v2931_v54, %v2931_v54  ;;  %v1055_v33 = vsel %vm997_vm0, %v2931_v54, 0.0  ;;  %v2959_v54 = vpop.f32.mrf.mxu2 }
 0x18f   :  { %v782_v57 = vpop.f32.mrf.mxu1 }
 0x190   :  { %v783_v60 = vadd.f32 %v782_v57, %v613_v49  ;;  %v1050_v49 = vadd.f32 %v1049_v15, %v1048_v21  ;;  %v900_v57 = vmul.f32 0.01, %v2415_v27  ;;  %v1248_v45 = vadd.f32 %v1247_v18, %v1246_v8 }
 0x191   :  { %v1253_v18 = vsel %vm997_vm0, %v1161_v20, 0.0 }
 0x192   :  { %v897_v53 = vmul.f32 0.01, %v783_v60  ;;  %v1052_v23 = vadd.f32 %v1051_v26, %v1050_v49  ;;  %v1250_v59 = vadd.f32 %v1249_v46, %v1248_v45 }
 0x194   :  { %v2938_v3 = vmax.f32 %v783_v60, %v897_v53  ;;  %v1251_v60 = vsel %vm997_vm0, %v1160_v39, 0.0  ;;  %v2953_v53 = vmax.f32 %v2401_v16, %v899_v48  ;;  %v1054_v21 = vadd.f32 %v1053_v5, %v1052_v23 }
 0x195   :  { %v1252_v8 = vadd.f32 %v1251_v60, %v1250_v59  ;;  %v902_v16 = vmul.f32 0.01, %v2447_v52  ;;  %v2973_v23 = vmax.f32 %v2433_v40, %v901_v17  ;;  %v904_v60 = vmul.f32 0.01, %v2479_v14 }
 0x196   :  { %v615_v28 = vpop.f32.mrf.mxu0  ;;  %v1162_v15 = vmul.f32 %v2938_v3, %v2938_v3  ;;  %v1057_v26 = vsel %vm997_vm0, %v2938_v3, 0.0  ;;  %v1056_v49 = vadd.f32 %v1055_v33, %v1054_v21  ;;  %v1164_v5 = vmul.f32 %v2953_v53, %v2953_v53 }
 0x197   :  { %v784_v19 = vpop.f32.mrf.mxu1  ;;  %v1254_v20 = vadd.f32 %v1253_v18, %v1252_v8  ;;  %v2986_v40 = vmax.f32 %v2447_v52, %v902_v16  ;;  %v905_v21 = vmul.f32 0.01, %v2497_v31  ;;  %v2999_v52 = vmax.f32 %v2479_v14, %v904_v60  ;;  %v3012_v14 = vpop.f32.mrf.mxu3 }
 0x198   :  { %v785_v25 = vadd.f32 %v784_v19, %v615_v28  ;;  %v2964_v28 = vmax.f32 %v2415_v27, %v900_v57  ;;  %v1255_v48 = vsel %vm997_vm0, %v1162_v15, 0.0  ;;  %v1058_v45 = vadd.f32 %v1057_v26, %v1056_v49 }
 0x199   :  { %v903_v19 = vmul.f32 0.01, %v2465_v2  ;;  %v1256_v33 = vadd.f32 %v1255_v48, %v1254_v20  ;;  %v1166_v49 = vmul.f32 %v2973_v23, %v2973_v23 }
 0x19a   :  { %v898_v39 = vmul.f32 0.01, %v785_v25  ;;  %v1165_v59 = vmul.f32 %v2964_v28, %v2964_v28  ;;  %v1063_v8 = vsel %vm997_vm0, %v2964_v28, 0.0 }
 0x19b   :  { %v2996_v48 = vmax.f32 %v2465_v2, %v903_v19  ;;  %v1263_v60 = vsel %vm997_vm0, %v1166_v49, 0.0  ;;  %v908_v49 = vmul.f32 0.01, %v2543_v11 }
 0x19c   :  { %v2968_v46 = vmax.f32 %v785_v25, %v898_v39  ;;  %v1061_v25 = vsel %vm997_vm0, %v2953_v53, 0.0  ;;  %v1259_v39 = vsel %vm997_vm0, %v1164_v5, 0.0  ;;  %v1167_v5 = vmul.f32 %v2986_v40, %v2986_v40 }
 0x19e   :  { %v1059_v27 = vsel %vm997_vm0, %v2968_v46, 0.0  ;;  %v1163_v57 = vmul.f32 %v2968_v46, %v2968_v46 }
 0x19f   :  { %v1060_v15 = vadd.f32 %v1059_v27, %v1058_v45  ;;  %v1261_v45 = vsel %vm997_vm0, %v1165_v59, 0.0  ;;  %v1065_v27 = vsel %vm997_vm0, %v2973_v23, 0.0  ;;  %v1168_v59 = vmul.f32 %v2996_v48, %v2996_v48 }
 0x1a0   :  { %v1257_v17 = vsel %vm997_vm0, %v1163_v57, 0.0  ;;  %v906_v57 = vmul.f32 0.01, %v2511_v44 }
 0x1a1   :  { %v1062_v18 = vadd.f32 %v1061_v25, %v1060_v15  ;;  %v1258_v26 = vadd.f32 %v1257_v17, %v1256_v33  ;;  %v3008_v33 = vmax.f32 %v2497_v31, %v905_v21  ;;  %v3010_v15 = vpop.f32.mrf.mxu2  ;;  %v1067_v25 = vsel %vm997_vm0, %v2986_v40, 0.0 }
 0x1a2   :  { %v907_v17 = vmul.f32 0.01, %v2529_v61  ;;  %v1169_v31 = vmul.f32 %v2999_v52, %v2999_v52 }
 0x1a3   :  { %v1064_v16 = vadd.f32 %v1063_v8, %v1062_v18  ;;  %v1260_v20 = vadd.f32 %v1259_v39, %v1258_v26  ;;  %v1265_v26 = vsel %vm997_vm0, %v1167_v5, 0.0  ;;  %v1069_v39 = vsel %vm997_vm0, %v2996_v48, 0.0 }
 0x1a4   :  { %v3026_v8 = vmax.f32 %v2511_v44, %v906_v57  ;;  %v3035_v5 = vmax.f32 %v2529_v61, %v907_v17  ;;  %v1269_v44 = vsel %vm997_vm0, %v1169_v31, 0.0 }
 0x1a5   :  { %v1066_v2 = vadd.f32 %v1065_v27, %v1064_v16  ;;  %v1262_v19 = vadd.f32 %v1261_v45, %v1260_v20  ;;  %v1170_v16 = vmul.f32 %v3008_v33, %v3008_v33  ;;  %v1267_v27 = vsel %vm997_vm0, %v1168_v59, 0.0 }
 0x1a6   :  { %3840 = vst [vmem:[#allocation24_spill] sm:$0xff] %v3026_v8  ;;  %v3044_v59 = vmax.f32 %v2543_v11, %v908_v49  ;;  %v1075_v31 = vsel %vm997_vm0, %v3026_v8, 0.0  ;;  %v912_v11 = vmul.f32 0.01, %v2609_v22 }
 0x1a7   :  { %v1068_v21 = vadd.f32 %v1067_v25, %v1066_v2  ;;  %v1264_v18 = vadd.f32 %v1263_v60, %v1262_v19  ;;  %v1071_v2 = vsel %vm997_vm0, %v2999_v52, 0.0  ;;  %3841 = vst [vmem:[#allocation25_spill] sm:$0xff] %v3035_v5  ;;  %v909_v19 = vmul.f32 0.01, %v2561_v32 }
 0x1a8   :  { %v1073_v25 = vsel %vm997_vm0, %v3008_v33, 0.0  ;;  %3842 = vst [vmem:[#allocation26_spill] sm:$0xff] %v3044_v59  ;;  %v1271_v61 = vsel %vm997_vm0, %v1170_v16, 0.0  ;;  %v3059_v16 = vpop.f32.mrf.mxu3 }
 0x1a9   :  { %v1070_v20 = vadd.f32 %v1069_v39, %v1068_v21  ;;  %v1266_v45 = vadd.f32 %v1265_v26, %v1264_v18  ;;  %v1171_v21 = vmul.f32 %v3026_v8, %v3026_v8  ;;  %v910_v18 = vmul.f32 0.01, %v2589_v56 }
 0x1aa   :  { %v1172_v39 = vmul.f32 %v3035_v5, %v3035_v5 }
 0x1ab   :  { %v1072_v57 = vadd.f32 %v1071_v2, %v1070_v20  ;;  %v1268_v60 = vadd.f32 %v1267_v27, %v1266_v45  ;;  %v3053_v20 = vmax.f32 %v2561_v32, %v909_v19  ;;  %v911_v45 = vmul.f32 0.01, %v2593_v4  ;;  %v3057_v2 = vpop.f32.mrf.mxu2 }
 0x1ac   :  { %v3067_v32 = vmax.f32 %v2589_v56, %v910_v18  ;;  %v913_v19 = vmul.f32 0.01, %v2613_v35  ;;  %v914_v56 = vmul.f32 0.01, %v2617_v43 }
 0x1ad   :  { %v1074_v17 = vadd.f32 %v1073_v25, %v1072_v57  ;;  %v1270_v26 = vadd.f32 %v1269_v44, %v1268_v60  ;;  %3843 = vst [vmem:[#allocation27_spill] sm:$0xff] %v3053_v20  ;;  %v1273_v44 = vsel %vm997_vm0, %v1171_v21, 0.0  ;;  %v1077_v57 = vsel %vm997_vm0, %v3035_v5, 0.0 }
 0x1ae   :  { %v1173_v60 = vmul.f32 %v3044_v59, %v3044_v59  ;;  %3844 = vst [vmem:[#allocation28_spill] sm:$0xff] %v3067_v32  ;;  %v1174_v21 = vmul.f32 %v3053_v20, %v3053_v20  ;;  %v3079_v5 = vmax.f32 %v2609_v22, %v912_v11  ;;  %v1083_v11 = vsel %vm997_vm0, %v3067_v32, 0.0 }
 0x1af   :  { %v1076_v49 = vadd.f32 %v1075_v31, %v1074_v17  ;;  %v1272_v27 = vadd.f32 %v1271_v61, %v1270_v26  ;;  %v1275_v61 = vsel %vm997_vm0, %v1172_v39, 0.0  ;;  %v1079_v26 = vsel %vm997_vm0, %v3044_v59, 0.0 }
 0x1b0   :  { %v3076_v31 = vmax.f32 %v2593_v4, %v911_v45  ;;  %3846 = vst [vmem:[#allocation30_spill] sm:$0xff] %v3079_v5  ;;  %v1081_v39 = vsel %vm997_vm0, %v3053_v20, 0.0  ;;  %v1279_v22 = vsel %vm997_vm0, %v1174_v21, 0.0 }
 0x1b1   :  { %v1078_v25 = vadd.f32 %v1077_v57, %v1076_v49  ;;  %v1274_v17 = vadd.f32 %v1273_v44, %v1272_v27  ;;  %v1277_v49 = vsel %vm997_vm0, %v1173_v60, 0.0  ;;  %v1175_v27 = vmul.f32 %v3067_v32, %v3067_v32  ;;  %v3109_v32 = vpop.f32.mrf.mxu3 }
 0x1b2   :  { %3845 = vst [vmem:[#allocation29_spill] sm:$0xff] %v3076_v31  ;;  %v3088_v44 = vmax.f32 %v2613_v35, %v913_v19  ;;  %v1176_v57 = vmul.f32 %v3076_v31, %v3076_v31  ;;  %v915_v60 = vmul.f32 0.01, %v2621_v55 }
 0x1b3   :  { %v1080_v18 = vadd.f32 %v1079_v26, %v1078_v25  ;;  %v1276_v8 = vadd.f32 %v1275_v61, %v1274_v17  ;;  %v1177_v25 = vmul.f32 %v3079_v5, %v3079_v5  ;;  %v3099_v17 = vmax.f32 %v2617_v43, %v914_v56 }
 0x1b4   :  { %v1085_v61 = vsel %vm997_vm0, %v3076_v31, 0.0  ;;  %v916_v26 = vmul.f32 0.01, %v2625_v6  ;;  %v1178_v21 = vmul.f32 %v3088_v44, %v3088_v44  ;;  %v1283_v43 = vsel %vm997_vm0, %v1176_v57, 0.0  ;;  %v3849_v31 = vld [vmem:[#allocation13_spill] sm:$0xff] }
 0x1b5   :  { %v1082_v4 = vadd.f32 %v1081_v39, %v1080_v18  ;;  %v1278_v45 = vadd.f32 %v1277_v49, %v1276_v8  ;;  %v1281_v8 = vsel %vm997_vm0, %v1175_v27, 0.0  ;;  %v3107_v39 = vpop.f32.mrf.mxu2  ;;  %v1087_v56 = vsel %vm997_vm0, %v3079_v5, 0.0 }
 0x1b6   :  { %v3115_v27 = vmax.f32 %v2621_v55, %v915_v60  ;;  %v3124_v57 = vmax.f32 %v2625_v6, %v916_v26  ;;  %v840_v55 = vadd.f32 %v2724_v13, %v3849_v31  ;;  %v1287_v60 = vsel %vm997_vm0, %v1178_v21, 0.0  ;;  %v3850_v26 = vld [vmem:[#allocation5_spill] sm:$0xff] }
 0x1b7   :  { %v1084_v35 = vadd.f32 %v1083_v11, %v1082_v4  ;;  %v1280_v19 = vadd.f32 %v1279_v22, %v1278_v45  ;;  %v3847_v4 = vld [vmem:[#allocation2_spill] sm:$0xff]  ;;  %v1285_v22 = vsel %vm997_vm0, %v1177_v25, 0.0  ;;  %v1179_v11 = vmul.f32 %v3099_v17, %v3099_v17 }
 0x1b8   :  { %v917_v45 = vmul.f32 0.01, %v3847_v4  ;;  %v843_v25 = vadd.f32 %v2777_v38, %v2775_v47  ;;  %v845_v31 = vadd.f32 %v2834_v62, %v2832_v42  ;;  %v1093_v38 = vsel %vm997_vm0, %v3115_v27, 0.0 }
 0x1b9   :  { %v1282_v18 = vadd.f32 %v1281_v8, %v1280_v19  ;;  %v1086_v49 = vadd.f32 %v1085_v61, %v1084_v35  ;;  %v1089_v8 = vsel %vm997_vm0, %v3088_v44, 0.0  ;;  %v3848_v61 = vld [vmem:[#allocation3_spill] sm:$0xff]  ;;  %v1289_v13 = vsel %vm997_vm0, %v1179_v11, 0.0 }
 0x1ba   :  { %v918_v5 = vmul.f32 0.01, %v3848_v61  ;;  %v3137_v6 = vmax.f32 %v3847_v4, %v917_v45  ;;  %v920_v4 = vmul.f32 0.01, %v840_v55  ;;  %v921_v45 = vmul.f32 0.01, %v843_v25 }
 0x1bb   :  { %v1088_v35 = vadd.f32 %v1087_v56, %v1086_v49  ;;  %v1284_v19 = vadd.f32 %v1283_v43, %v1282_v18  ;;  %v1091_v18 = vsel %vm997_vm0, %v3099_v17, 0.0  ;;  %v1180_v49 = vmul.f32 %v3115_v27, %v3115_v27 }
 0x1bc   :  { %v919_v43 = vmul.f32 0.01, %v3850_v26  ;;  %v1181_v56 = vmul.f32 %v3124_v57, %v3124_v57  ;;  %v1095_v62 = vsel %vm997_vm0, %v3124_v57, 0.0 }
 0x1bd   :  { %v1090_v20 = vadd.f32 %v1089_v8, %v1088_v35  ;;  %v1286_v59 = vadd.f32 %v1285_v22, %v1284_v19  ;;  %v3148_v22 = vmax.f32 %v3848_v61, %v918_v5  ;;  %v848_v35 = vadd.f32 %v2885_v34, %v2883_v12  ;;  %v693_v12 = vpop.f32.mrf.mxu2  ;;  %v862_v34 = vpop.f32.mrf.mxu3 }
 0x1be   :  { %v1291_v42 = vsel %vm997_vm0, %v1180_v49, 0.0  ;;  %v922_v5 = vmul.f32 0.01, %v845_v31  ;;  %v850_v8 = vadd.f32 %v2925_v1, %v2923_v0  ;;  %v1097_v49 = vsel %vm997_vm0, %v3137_v6, 0.0 }
 0x1bf   :  { %v1092_v21 = vadd.f32 %v1091_v18, %v1090_v20  ;;  %v1288_v47 = vadd.f32 %v1287_v60, %v1286_v59  ;;  %v1182_v59 = vmul.f32 %v3137_v6, %v3137_v6  ;;  %v3158_v20 = vmax.f32 %v3850_v26, %v919_v43 }
 0x1c0   :  { %v1293_v18 = vsel %vm997_vm0, %v1181_v56, 0.0  ;;  %v3169_v26 = vmax.f32 %v843_v25, %v921_v45  ;;  %v923_v43 = vmul.f32 0.01, %v848_v35  ;;  %v1099_v1 = vsel %vm997_vm0, %v3148_v22, 0.0 }
 0x1c1   :  { %v1094_v11 = vadd.f32 %v1093_v38, %v1092_v21  ;;  %v1290_v19 = vadd.f32 %v1289_v13, %v1288_v47  ;;  %v1183_v13 = vmul.f32 %v3148_v22, %v3148_v22  ;;  %v3167_v21 = vmax.f32 %v840_v55, %v920_v4 }
 0x1c2   :  { %v1295_v0 = vsel %vm997_vm0, %v1182_v59, 0.0  ;;  %v1184_v56 = vmul.f32 %v3158_v20, %v3158_v20  ;;  %v924_v55 = vmul.f32 0.01, %v850_v8  ;;  %v855_v59 = vadd.f32 %v3012_v14, %v3010_v15 }
 0x1c3   :  { %v1096_v61 = vadd.f32 %v1095_v62, %v1094_v11  ;;  %v1292_v60 = vadd.f32 %v1291_v42, %v1290_v19  ;;  %v853_v11 = vadd.f32 %v2961_v36, %v2959_v54  ;;  %v3178_v19 = vmax.f32 %v845_v31, %v922_v5 }
 0x1c4   :  { %v1297_v45 = vsel %vm997_vm0, %v1183_v13, 0.0  ;;  %v1101_v42 = vsel %vm997_vm0, %v3158_v20, 0.0  ;;  %v1185_v62 = vmul.f32 %v3167_v21, %v3167_v21  ;;  %v3189_v36 = vmax.f32 %v848_v35, %v923_v43 }
 0x1c5   :  { %v1098_v47 = vadd.f32 %v1097_v49, %v1096_v61  ;;  %v1294_v38 = vadd.f32 %v1293_v18, %v1292_v60  ;;  %v1186_v61 = vmul.f32 %v3169_v26, %v3169_v26  ;;  %v1299_v5 = vsel %vm997_vm0, %v1184_v56, 0.0 }
 0x1c6   :  { %v1103_v60 = vsel %vm997_vm0, %v3167_v21, 0.0  ;;  %v925_v18 = vmul.f32 0.01, %v853_v11  ;;  %v858_v49 = vadd.f32 %v3059_v16, %v3057_v2  ;;  %v1187_v13 = vmul.f32 %v3178_v19, %v3178_v19 }
 0x1c7   :  { %v1100_v4 = vadd.f32 %v1099_v1, %v1098_v47  ;;  %v1296_v25 = vadd.f32 %v1295_v0, %v1294_v38  ;;  %v3198_v15 = vmax.f32 %v850_v8, %v924_v55  ;;  %v1301_v35 = vsel %vm997_vm0, %v1185_v62, 0.0  ;;  %v695_v8 = vpop.f32.mrf.mxu2  ;;  %v864_v55 = vpop.f32.mrf.mxu3 }
 0x1c8   :  { %v1105_v43 = vsel %vm997_vm0, %v3169_v26, 0.0  ;;  %v926_v38 = vmul.f32 0.01, %v855_v59  ;;  %v860_v0 = vadd.f32 %v3109_v32, %v3107_v39  ;;  %v1303_v1 = vsel %vm997_vm0, %v1186_v61, 0.0 }
 0x1c9   :  { %v1102_v54 = vadd.f32 %v1101_v42, %v1100_v4  ;;  %v1298_v31 = vadd.f32 %v1297_v45, %v1296_v25  ;;  %v1188_v2 = vmul.f32 %v3189_v36, %v3189_v36  ;;  %v1107_v4 = vsel %vm997_vm0, %v3178_v19, 0.0 }
 0x1ca   :  { %v3210_v25 = vmax.f32 %v853_v11, %v925_v18  ;;  %v927_v45 = vmul.f32 0.01, %v858_v49  ;;  %v863_v42 = vadd.f32 %v862_v34, %v693_v12  ;;  %v1305_v62 = vsel %vm997_vm0, %v1187_v13, 0.0 }
 0x1cb   :  { %v1104_v14 = vadd.f32 %v1103_v60, %v1102_v54  ;;  %v1300_v47 = vadd.f32 %v1299_v5, %v1298_v31  ;;  %v1189_v32 = vmul.f32 %v3198_v15, %v3198_v15  ;;  %v1109_v61 = vsel %vm997_vm0, %v3189_v36, 0.0 }
 0x1cc   :  { %v3217_v31 = vmax.f32 %v855_v59, %v926_v38  ;;  %v928_v5 = vmul.f32 0.01, %v860_v0  ;;  %v865_v60 = vadd.f32 %v864_v55, %v695_v8  ;;  %v1111_v12 = vsel %vm997_vm0, %v3198_v15, 0.0 }
 0x1cd   :  { %v1106_v16 = vadd.f32 %v1105_v43, %v1104_v14  ;;  %v1302_v56 = vadd.f32 %v1301_v35, %v1300_v47  ;;  %v1307_v14 = vsel %vm997_vm0, %v1188_v2, 0.0  ;;  %v1190_v34 = vmul.f32 %v3210_v25, %v3210_v25 }
 0x1ce   :  { %v3224_v13 = vmax.f32 %v858_v49, %v927_v45  ;;  %v929_v47 = vmul.f32 0.01, %v863_v42  ;;  %v1309_v59 = vsel %vm997_vm0, %v1189_v32, 0.0  ;;  %v1113_v38 = vsel %vm997_vm0, %v3210_v25, 0.0 }
 0x1cf   :  { %v1108_v54 = vadd.f32 %v1107_v4, %v1106_v16  ;;  %v1304_v39 = vadd.f32 %v1303_v1, %v1302_v56  ;;  %v1191_v1 = vmul.f32 %v3217_v31, %v3217_v31  ;;  %v3231_v2 = vmax.f32 %v860_v0, %v928_v5 }
 0x1d0   :  { %v930_v16 = vmul.f32 0.01, %v865_v60  ;;  %v1311_v55 = vsel %vm997_vm0, %v1190_v34, 0.0  ;;  %v1115_v49 = vsel %vm997_vm0, %v3217_v31, 0.0  ;;  %v1192_v4 = vmul.f32 %v3224_v13, %v3224_v13 }
 0x1d1   :  { %v1110_v11 = vadd.f32 %v1109_v61, %v1108_v54  ;;  %v1306_v18 = vadd.f32 %v1305_v62, %v1304_v39  ;;  %v3238_v45 = vmax.f32 %v863_v42, %v929_v47  ;;  %v1313_v32 = vsel %vm997_vm0, %v1191_v1, 0.0 }
 0x1d2   :  { %v1117_v0 = vsel %vm997_vm0, %v3224_v13, 0.0  ;;  %v1193_v39 = vmul.f32 %v3231_v2, %v3231_v2  ;;  %v994_v61 = vmax.f32 %v865_v60, %v930_v16 }
 0x1d3   :  { %v1112_v35 = vadd.f32 %v1111_v12, %v1110_v11  ;;  %v1308_v43 = vadd.f32 %v1307_v14, %v1306_v18  ;;  %v1315_v11 = vsel %vm997_vm0, %v1192_v4, 0.0  ;;  %v1119_v18 = vsel %vm997_vm0, %v3231_v2, 0.0 }
 0x1d4   :  { %v1194_v42 = vmul.f32 %v3238_v45, %v3238_v45  ;;  %v1317_v47 = vsel %vm997_vm0, %v1193_v39, 0.0  ;;  %v1123_v1 = vsel %vm997_vm0, %v994_v61, 0.0 }
 0x1d5   :  { %v1310_v56 = vadd.f32 %v1309_v59, %v1308_v43  ;;  %v1114_v8 = vadd.f32 %v1113_v38, %v1112_v35  ;;  %v1121_v35 = vsel %vm997_vm0, %v3238_v45, 0.0  ;;  %v1195_v43 = vmul.f32 %v994_v61, %v994_v61 }
 0x1d6   :  { %v1319_v38 = vsel %vm997_vm0, %v1194_v42, 0.0 }
 0x1d7   :  { %v1312_v62 = vadd.f32 %v1311_v55, %v1310_v56  ;;  %v1116_v54 = vadd.f32 %v1115_v49, %v1114_v8  ;;  %v1321_v8 = vsel %vm997_vm0, %v1195_v43, 0.0 }
 0x1d9   :  { %v1314_v5 = vadd.f32 %v1313_v32, %v1312_v62  ;;  %v1118_v14 = vadd.f32 %v1117_v0, %v1116_v54 }
 0x1db   :  { %v1316_v12 = vadd.f32 %v1315_v11, %v1314_v5  ;;  %v1120_v34 = vadd.f32 %v1119_v18, %v1118_v14 }
 0x1dd   :  { %v1318_v59 = vadd.f32 %v1317_v47, %v1316_v12  ;;  %v1122_v60 = vadd.f32 %v1121_v35, %v1120_v34 }
 0x1df   :  { %v1320_v16 = vadd.f32 %v1319_v38, %v1318_v59  ;;  %v1124_v56 = vadd.f32 %v1123_v1, %v1122_v60 }
 0x1e1   :  { %v1125_v55 = vrot.slane %v1124_v56, 4  ;;  %v1322_v49 = vadd.f32 %v1321_v8, %v1320_v16  ;;  %v995_v8 = vld [vmem:[%s3788_s2] sm:$0x1] }
 0x1e3   :  { %v1126_v4 = vadd.f32 %v1125_v55, %v1124_v56  ;;  %v1323_v62 = vrot.slane %v1322_v49, 4 }
 0x1e5   :  { %v1127_v54 = vrot.slane %v1126_v4, 2  ;;  %v1324_v32 = vadd.f32 %v1323_v62, %v1322_v49 }
 0x1e7   :  { %v1128_v0 = vadd.f32 %v1127_v54, %v1126_v4  ;;  %v1325_v39 = vrot.slane %v1324_v32, 2 }
 0x1e9   :  { %v1129_v5 = vrot.slane %v1128_v0, 1  ;;  %v1326_v14 = vadd.f32 %v1325_v39, %v1324_v32  ;;  %v3270_v32 = vld [vmem:[%s3787_s3] ss:$0 sm:$0xff] }
 0x1ea   :  { %v3852_v39 = vld [vmem:[#allocation6_spill] sm:$0xff] }
 0x1eb   :  { %v1130_v11 = vadd.f32 %v1129_v5, %v1128_v0  ;;  %v1327_v18 = vrot.slane %v1326_v14, 1 }
 0x1ed   :  { %v3256_v12 = vmul.f32 0.001953125, %v1130_v11  ;;  %v1328_v42 = vadd.f32 %v1327_v18, %v1326_v14  ;;  %v3853_v14 = vld [vmem:[#allocation4_spill] sm:$0xff]  ;;  %v3854_v18 = vld [vmem:[#allocation7_spill] sm:$0xff] }
 0x1ef   :  { %v1329_v34 = vmul.f32 0.001953125, %v1328_v42  ;;  %v1330_v47 = vmul.f32 %v3256_v12, %v3256_v12  ;;  %v1406_v62 = vsub.f32 %v994_v61, %v3256_v12  ;;  %v1343_v5 = vsub.f32 %v3852_v39, %v3256_v12 }
 0x1f0   :  { %v1344_v11 = vsub.f32 %v3853_v14, %v3256_v12  ;;  %v1345_v42 = vsub.f32 %v3854_v18, %v3256_v12 }
 0x1f1   :  { %v1331_v35 = vsub.f32 %v1329_v34, %v1330_v47  ;;  %v3855_v34 = vld [vmem:[#allocation8_spill] sm:$0xff] }
 0x1f2   :  { %v1346_v47 = vsub.f32 %v3855_v34, %v3256_v12  ;;  %v3861_v34 = vld [vmem:[#allocation15_spill] sm:$0xff] }
 0x1f3   :  { %v1332_v43 = vadd.f32 1e-05, %v1331_v35 }
 0x1f5   :  { %2090 = vrsqrt.f32 %v1332_v43  ;;  %vm1339_vm2 = vweird.f32 %v1332_v43 }
 0x1fb   :  { %v2091_v59 = vpop.eup %2090 }
 0x1fc   :  { %v1334_v60 = vmul.f32 %v2091_v59, %v1332_v43  ;;  %vm1340_vm1 = vweird.f32 %v2091_v59  ;;  %v3856_v43 = vld [vmem:[#allocation9_spill] sm:$0xff] }
 0x1fd   :  { %vm1341_vm3 = vmor %vm1339_vm2, %vm1340_vm1 }
 0x1fe   :  { %v1335_v38 = vmul.f32 %v2091_v59, %v1334_v60 }
 0x200   :  { %v1336_v1 = vmul.f32 0.5, %v1335_v38  ;;  %v3857_v38 = vld [vmem:[#allocation10_spill] sm:$0xff] }
 0x202   :  { %v1337_v16 = vsub.f32 1.5, %v1336_v1  ;;  %v1348_v1 = vsub.f32 %v3857_v38, %v3256_v12 }
 0x204   :  { %v1338_v56 = vmul.f32 %v2091_v59, %v1337_v16 }
 0x206   :  { %v1342_v55 = vsel %vm1341_vm3, %v2091_v59, %v1338_v56  ;;  %v1347_v59 = vsub.f32 %v3856_v43, %v3256_v12  ;;  %v1349_v56 = vsub.f32 %v2692_v58, %v3256_v12  ;;  %v3860_v58 = vld [vmem:[#allocation14_spill] sm:$0xff] }
 0x207   :  { %v1407_v49 = vmul.f32 %v1342_v55, %v995_v8 }
 0x209   :  { %v3263_v4 = vperm.slane %v1407_v49, 0  ;;  %v3858_v49 = vld [vmem:[#allocation11_spill] sm:$0xff] }
 0x20b   :  { %v1472_v54 = vmul.f32 %v3263_v4, %v1406_v62  ;;  %v1409_v61 = vmul.f32 %v3263_v4, %v1343_v5  ;;  %v1410_v35 = vmul.f32 %v3263_v4, %v1344_v11  ;;  %v1411_v60 = vmul.f32 %v3263_v4, %v1345_v42  ;;  %v3859_v5 = vld [vmem:[#allocation12_spill] sm:$0xff] }
 0x20c   :  { %v1412_v16 = vmul.f32 %v3263_v4, %v1346_v47  ;;  %v1413_v8 = vmul.f32 %v3263_v4, %v1347_v59  ;;  %v1350_v62 = vsub.f32 %v3858_v49, %v3256_v12  ;;  %v1351_v14 = vsub.f32 %v3859_v5, %v3256_v12 }
 0x20d   :  { %v3273_v0 = vadd.f32 %v3270_v32, %v1472_v54  ;;  %v1476_v55 = vadd.f32 %v3270_v32, %v1409_v61  ;;  %v1414_v54 = vmul.f32 %v3263_v4, %v1348_v1  ;;  %v1477_v39 = vadd.f32 %v3270_v32, %v1410_v35 }
 0x20e   :  { %v1415_v11 = vmul.f32 %v3263_v4, %v1349_v56  ;;  %v1478_v18 = vadd.f32 %v3270_v32, %v1411_v60  ;;  %v1352_v42 = vsub.f32 %v3860_v58, %v3256_v12  ;;  %v1353_v61 = vsub.f32 %v3861_v34, %v3256_v12  ;;  %v3862_v60 = vld [vmem:[#allocation16_spill] sm:$0xff] }
 0x20f   :  { %3851 = vst [vmem:[#allocation2_spill] sm:$0xff] %v3273_v0  ;;  %v1416_v47 = vmul.f32 %v3263_v4, %v1350_v62  ;;  %v1479_v43 = vadd.f32 %v3270_v32, %v1412_v16  ;;  %v1354_v35 = vsub.f32 %v2750_v29, %v3256_v12  ;;  %v1417_v59 = vmul.f32 %v3263_v4, %v1351_v14  ;;  %v3863_v62 = vld [vmem:[#allocation17_spill] sm:$0xff] }
 0x210   :  { %v1480_v38 = vadd.f32 %v3270_v32, %v1413_v8  ;;  %v1540_v1 = vpack.c.bf16 %v1476_v55, %v1476_v55  ;;  %v1355_v56 = vsub.f32 %v3862_v60, %v3256_v12  ;;  %v1418_v49 = vmul.f32 %v3263_v4, %v1352_v42 }
 0x211   :  { %v1481_v5 = vadd.f32 %v3270_v32, %v1414_v54  ;;  %v1541_v58 = vpack.c.bf16 %v1477_v39, %v1477_v39  ;;  %v1356_v34 = vsub.f32 %v3863_v62, %v3256_v12  ;;  %v1419_v16 = vmul.f32 %v3263_v4, %v1353_v61 }
 0x212   :  { %v1482_v29 = vadd.f32 %v3270_v32, %v1415_v11  ;;  %v1542_v0 = vpack.c.bf16 %v1478_v18, %v1478_v18  ;;  %v1420_v14 = vmul.f32 %v3263_v4, %v1354_v35  ;;  %v1483_v8 = vadd.f32 %v3270_v32, %v1416_v47  ;;  %1605 = vst.msk [vmem:[%s3789_s4] sm:$0xf] %vm1604_vm4, %v1540_v1 }
 0x213   :  { %v1543_v55 = vpack.c.bf16 %v1479_v43, %v1479_v43  ;;  %v1357_v42 = vsub.f32 %v2780_v51, %v3256_v12  ;;  %v1421_v54 = vmul.f32 %v3263_v4, %v1355_v56  ;;  %v1484_v39 = vadd.f32 %v3270_v32, %v1417_v59  ;;  %1606 = vst.msk [vmem:[%s3789_s4 + $0x4] sm:$0xf] %vm1604_vm4, %v1541_v58  ;;  %v3864_v51 = vld [vmem:[#allocation18_spill] sm:$0xff] }
 0x214   :  { %v1544_v60 = vpack.c.bf16 %v1480_v38, %v1480_v38  ;;  %v1358_v11 = vsub.f32 %v2789_v7, %v3256_v12  ;;  %v1422_v18 = vmul.f32 %v3263_v4, %v1356_v34  ;;  %v1485_v61 = vadd.f32 %v3270_v32, %v1418_v49  ;;  %1607 = vst.msk [vmem:[%s3789_s4 + $0x8] sm:$0xf] %vm1604_vm4, %v1542_v0 }
 0x215   :  { %v1545_v47 = vpack.c.bf16 %v1481_v5, %v1481_v5  ;;  %v1359_v43 = vsub.f32 %v3864_v51, %v3256_v12  ;;  %v1423_v35 = vmul.f32 %v3263_v4, %v1357_v42  ;;  %v1486_v59 = vadd.f32 %v3270_v32, %v1419_v16  ;;  %1608 = vst.msk [vmem:[%s3789_s4 + $0xc] sm:$0xf] %vm1604_vm4, %v1543_v55 }
 0x216   :  { %v1546_v38 = vpack.c.bf16 %v1482_v29, %v1482_v29  ;;  %v1360_v7 = vsub.f32 %v2818_v30, %v3256_v12  ;;  %v1424_v1 = vmul.f32 %v3263_v4, %v1358_v11  ;;  %v1487_v56 = vadd.f32 %v3270_v32, %v1420_v14  ;;  %1609 = vst.msk [vmem:[%s3789_s4 + $0x10] sm:$0xf] %vm1604_vm4, %v1544_v60 }
 0x217   :  { %v1547_v49 = vpack.c.bf16 %v1483_v8, %v1483_v8  ;;  %v1361_v5 = vsub.f32 %v2828_v9, %v3256_v12  ;;  %v1425_v58 = vmul.f32 %v3263_v4, %v1359_v43  ;;  %v1488_v0 = vadd.f32 %v3270_v32, %v1421_v54  ;;  %1610 = vst.msk [vmem:[%s3789_s4 + $0x14] sm:$0xf] %vm1604_vm4, %v1545_v47  ;;  %v3865_v9 = vld [vmem:[#allocation19_spill] sm:$0xff] }
 0x218   :  { %v1548_v62 = vpack.c.bf16 %v1484_v39, %v1484_v39  ;;  %v1362_v30 = vsub.f32 %v2842_v41, %v3256_v12  ;;  %v1426_v34 = vmul.f32 %v3263_v4, %v1360_v7  ;;  %v1489_v16 = vadd.f32 %v3270_v32, %v1422_v18  ;;  %1611 = vst.msk [vmem:[%s3789_s4 + $0x18] sm:$0xf] %vm1604_vm4, %v1546_v38  ;;  %v3866_v41 = vld [vmem:[#allocation20_spill] sm:$0xff] }
 0x219   :  { %v1549_v29 = vpack.c.bf16 %v1485_v61, %v1485_v61  ;;  %v1363_v14 = vsub.f32 %v3865_v9, %v3256_v12  ;;  %v1427_v8 = vmul.f32 %v3263_v4, %v1361_v5  ;;  %v1490_v55 = vadd.f32 %v3270_v32, %v1423_v35  ;;  %1612 = vst.msk [vmem:[%s3789_s4 + $0x1c] sm:$0xf] %vm1604_vm4, %v1547_v49 }
 0x21a   :  { %v1550_v42 = vpack.c.bf16 %v1486_v59, %v1486_v59  ;;  %v1364_v54 = vsub.f32 %v3866_v41, %v3256_v12  ;;  %v1428_v39 = vmul.f32 %v3263_v4, %v1362_v30  ;;  %v1491_v60 = vadd.f32 %v3270_v32, %v1424_v1  ;;  %1613 = vst.msk [vmem:[%s3789_s4 + $0x20] sm:$0xf] %vm1604_vm4, %v1548_v62  ;;  %v3869_v41 = vld [vmem:[#allocation23_spill] sm:$0xff] }
 0x21b   :  { %v1551_v11 = vpack.c.bf16 %v1487_v56, %v1487_v56  ;;  %v1365_v18 = vsub.f32 %v2870_v37, %v3256_v12  ;;  %v1429_v61 = vmul.f32 %v3263_v4, %v1363_v14  ;;  %v1492_v47 = vadd.f32 %v3270_v32, %v1425_v58  ;;  %1614 = vst.msk [vmem:[%s3789_s4 + $0x24] sm:$0xf] %vm1604_vm4, %v1549_v29 }
 0x21c   :  { %v1552_v51 = vpack.c.bf16 %v1488_v0, %v1488_v0  ;;  %v1366_v43 = vsub.f32 %v2879_v50, %v3256_v12  ;;  %v1430_v35 = vmul.f32 %v3263_v4, %v1364_v54  ;;  %v1493_v59 = vadd.f32 %v3270_v32, %v1426_v34  ;;  %1615 = vst.msk [vmem:[%s3789_s4 + $0x28] sm:$0xf] %vm1604_vm4, %v1550_v42 }
 0x21d   :  { %v1553_v38 = vpack.c.bf16 %v1489_v16, %v1489_v16  ;;  %v1367_v37 = vsub.f32 %v2888_v10, %v3256_v12  ;;  %v1431_v7 = vmul.f32 %v3263_v4, %v1365_v18  ;;  %v1494_v1 = vadd.f32 %v3270_v32, %v1427_v8  ;;  %1616 = vst.msk [vmem:[%s3789_s4 + $0x2c] sm:$0xf] %vm1604_vm4, %v1551_v11 }
 0x21e   :  { %v1554_v56 = vpack.c.bf16 %v1490_v55, %v1490_v55  ;;  %v1368_v50 = vsub.f32 %v2895_v24, %v3256_v12  ;;  %v1432_v49 = vmul.f32 %v3263_v4, %v1366_v43  ;;  %v1495_v5 = vadd.f32 %v3270_v32, %v1428_v39  ;;  %1617 = vst.msk [vmem:[%s3789_s4 + $0x30] sm:$0xf] %vm1604_vm4, %v1552_v51  ;;  %v3867_v24 = vld [vmem:[#allocation21_spill] sm:$0xff] }
 0x21f   :  { %v1555_v58 = vpack.c.bf16 %v1491_v60, %v1491_v60  ;;  %v1369_v10 = vsub.f32 %v2906_v63, %v3256_v12  ;;  %v1433_v0 = vmul.f32 %v3263_v4, %v1367_v37  ;;  %v1496_v62 = vadd.f32 %v3270_v32, %v1429_v61  ;;  %1618 = vst.msk [vmem:[%s3789_s4 + $0x34] sm:$0xf] %vm1604_vm4, %v1553_v38  ;;  %v3868_v63 = vld [vmem:[#allocation22_spill] sm:$0xff] }
 0x220   :  { %v1556_v30 = vpack.c.bf16 %v1492_v47, %v1492_v47  ;;  %v1370_v34 = vsub.f32 %v3867_v24, %v3256_v12  ;;  %v1434_v16 = vmul.f32 %v3263_v4, %v1368_v50  ;;  %v1497_v29 = vadd.f32 %v3270_v32, %v1430_v35  ;;  %1619 = vst.msk [vmem:[%s3789_s4 + $0x38] sm:$0xf] %vm1604_vm4, %v1554_v56 }
 0x221   :  { %v1557_v9 = vpack.c.bf16 %v1493_v59, %v1493_v59  ;;  %v1371_v14 = vsub.f32 %v3868_v63, %v3256_v12  ;;  %v1435_v8 = vmul.f32 %v3263_v4, %v1369_v10  ;;  %v1498_v55 = vadd.f32 %v3270_v32, %v1431_v7  ;;  %1620 = vst.msk [vmem:[%s3789_s4 + $0x3c] sm:$0xf] %vm1604_vm4, %v1555_v58 }
 0x222   :  { %v1558_v42 = vpack.c.bf16 %v1494_v1, %v1494_v1  ;;  %v1372_v54 = vsub.f32 %v3869_v41, %v3256_v12  ;;  %v1436_v39 = vmul.f32 %v3263_v4, %v1370_v34  ;;  %v1499_v60 = vadd.f32 %v3270_v32, %v1432_v49  ;;  %1621 = vst.msk [vmem:[%s3789_s4 + $0x40] sm:$0xf] %vm1604_vm4, %v1556_v30 }
 0x223   :  { %v1559_v11 = vpack.c.bf16 %v1495_v5, %v1495_v5  ;;  %v1373_v18 = vsub.f32 %v2938_v3, %v3256_v12  ;;  %v1437_v61 = vmul.f32 %v3263_v4, %v1371_v14  ;;  %v1500_v47 = vadd.f32 %v3270_v32, %v1433_v0  ;;  %1622 = vst.msk [vmem:[%s3789_s4 + $0x44] sm:$0xf] %vm1604_vm4, %v1557_v9 }
 0x224   :  { %v1560_v51 = vpack.c.bf16 %v1496_v62, %v1496_v62  ;;  %v1374_v43 = vsub.f32 %v2968_v46, %v3256_v12  ;;  %v1438_v35 = vmul.f32 %v3263_v4, %v1372_v54  ;;  %v1501_v59 = vadd.f32 %v3270_v32, %v1434_v16  ;;  %1623 = vst.msk [vmem:[%s3789_s4 + $0x48] sm:$0xf] %vm1604_vm4, %v1558_v42 }
 0x225   :  { %v1561_v38 = vpack.c.bf16 %v1497_v29, %v1497_v29  ;;  %v1375_v3 = vsub.f32 %v2953_v53, %v3256_v12  ;;  %v1439_v37 = vmul.f32 %v3263_v4, %v1373_v18  ;;  %v1502_v7 = vadd.f32 %v3270_v32, %v1435_v8  ;;  %1624 = vst.msk [vmem:[%s3789_s4 + $0x4c] sm:$0xf] %vm1604_vm4, %v1559_v11 }
 0x226   :  { %v1562_v1 = vpack.c.bf16 %v1498_v55, %v1498_v55  ;;  %v1376_v46 = vsub.f32 %v2964_v28, %v3256_v12  ;;  %v1440_v56 = vmul.f32 %v3263_v4, %v1374_v43  ;;  %v1503_v50 = vadd.f32 %v3270_v32, %v1436_v39  ;;  %1625 = vst.msk [vmem:[%s3789_s4 + $0x50] sm:$0xf] %vm1604_vm4, %v1560_v51 }
 0x227   :  { %v1563_v49 = vpack.c.bf16 %v1499_v60, %v1499_v60  ;;  %v1377_v53 = vsub.f32 %v2973_v23, %v3256_v12  ;;  %v1441_v5 = vmul.f32 %v3263_v4, %v1375_v3  ;;  %v1504_v58 = vadd.f32 %v3270_v32, %v1437_v61  ;;  %1626 = vst.msk [vmem:[%s3789_s4 + $0x54] sm:$0xf] %vm1604_vm4, %v1561_v38  ;;  %v3873_v38 = vld [vmem:[#allocation27_spill] sm:$0xff] }
 0x228   :  { %v1564_v10 = vpack.c.bf16 %v1500_v47, %v1500_v47  ;;  %v1378_v28 = vsub.f32 %v2986_v40, %v3256_v12  ;;  %v1442_v0 = vmul.f32 %v3263_v4, %v1376_v46  ;;  %v1505_v62 = vadd.f32 %v3270_v32, %v1438_v35  ;;  %1627 = vst.msk [vmem:[%s3789_s4 + $0x58] sm:$0xf] %vm1604_vm4, %v1562_v1  ;;  %v3872_v47 = vld [vmem:[#allocation26_spill] sm:$0xff]  ;;  %v3874_v46 = vld [vmem:[#allocation28_spill] sm:$0xff] }
 0x229   :  { %v1565_v30 = vpack.c.bf16 %v1501_v59, %v1501_v59  ;;  %v1379_v23 = vsub.f32 %v2996_v48, %v3256_v12  ;;  %v1443_v24 = vmul.f32 %v3263_v4, %v1377_v53  ;;  %v1506_v34 = vadd.f32 %v3270_v32, %v1439_v37  ;;  %1628 = vst.msk [vmem:[%s3789_s4 + $0x5c] sm:$0xf] %vm1604_vm4, %v1563_v49 }
 0x22a   :  { %v1566_v16 = vpack.c.bf16 %v1502_v7, %v1502_v7  ;;  %v1380_v40 = vsub.f32 %v2999_v52, %v3256_v12  ;;  %v1444_v29 = vmul.f32 %v3263_v4, %v1378_v28  ;;  %v1507_v9 = vadd.f32 %v3270_v32, %v1440_v56  ;;  %1629 = vst.msk [vmem:[%s3789_s4 + $0x60] sm:$0xf] %vm1604_vm4, %v1564_v10  ;;  %v3870_v52 = vld [vmem:[#allocation24_spill] sm:$0xff] }
 0x22b   :  { %v1567_v63 = vpack.c.bf16 %v1503_v50, %v1503_v50  ;;  %v1381_v48 = vsub.f32 %v3008_v33, %v3256_v12  ;;  %v1445_v14 = vmul.f32 %v3263_v4, %v1379_v23  ;;  %v1508_v8 = vadd.f32 %v3270_v32, %v1441_v5  ;;  %1630 = vst.msk [vmem:[%s3789_s4 + $0x64] sm:$0xf] %vm1604_vm4, %v1565_v30  ;;  %v3871_v33 = vld [vmem:[#allocation25_spill] sm:$0xff] }
 0x22c   :  { %v1568_v55 = vpack.c.bf16 %v1504_v58, %v1504_v58  ;;  %v1382_v42 = vsub.f32 %v3870_v52, %v3256_v12  ;;  %v1446_v41 = vmul.f32 %v3263_v4, %v1380_v40  ;;  %v1509_v54 = vadd.f32 %v3270_v32, %v1442_v0  ;;  %1631 = vst.msk [vmem:[%s3789_s4 + $0x68] sm:$0xf] %vm1604_vm4, %v1566_v16  ;;  %v3875_v5 = vld [vmem:[#allocation29_spill] sm:$0xff] }
 0x22d   :  { %v1569_v39 = vpack.c.bf16 %v1505_v62, %v1505_v62  ;;  %v1383_v60 = vsub.f32 %v3871_v33, %v3256_v12  ;;  %v1447_v11 = vmul.f32 %v3263_v4, %v1381_v48  ;;  %v1510_v18 = vadd.f32 %v3270_v32, %v1443_v24  ;;  %1632 = vst.msk [vmem:[%s3789_s4 + $0x6c] sm:$0xf] %vm1604_vm4, %v1567_v63  ;;  %v3876_v62 = vld [vmem:[#allocation30_spill] sm:$0xff] }
 0x22e   :  { %v1570_v61 = vpack.c.bf16 %v1506_v34, %v1506_v34  ;;  %v1384_v51 = vsub.f32 %v3872_v47, %v3256_v12  ;;  %v1448_v43 = vmul.f32 %v3263_v4, %v1382_v42  ;;  %v1511_v35 = vadd.f32 %v3270_v32, %v1444_v29  ;;  %1633 = vst.msk [vmem:[%s3789_s4 + $0x70] sm:$0xf] %vm1604_vm4, %v1568_v55 }
 0x22f   :  { %v1571_v59 = vpack.c.bf16 %v1507_v9, %v1507_v9  ;;  %v1385_v3 = vsub.f32 %v3873_v38, %v3256_v12  ;;  %v1449_v37 = vmul.f32 %v3263_v4, %v1383_v60  ;;  %v1512_v7 = vadd.f32 %v3270_v32, %v1445_v14  ;;  %1634 = vst.msk [vmem:[%s3789_s4 + $0x74] sm:$0xf] %vm1604_vm4, %v1569_v39 }
 0x230   :  { %v1572_v1 = vpack.c.bf16 %v1508_v8, %v1508_v8  ;;  %v1386_v56 = vsub.f32 %v3874_v46, %v3256_v12  ;;  %v1450_v50 = vmul.f32 %v3263_v4, %v1384_v51  ;;  %v1513_v49 = vadd.f32 %v3270_v32, %v1446_v41  ;;  %1635 = vst.msk [vmem:[%s3789_s4 + $0x78] sm:$0xf] %vm1604_vm4, %v1570_v61 }
 0x231   :  { %v1573_v53 = vpack.c.bf16 %v1509_v54, %v1509_v54  ;;  %v1387_v58 = vsub.f32 %v3875_v5, %v3256_v12  ;;  %v1451_v10 = vmul.f32 %v3263_v4, %v1385_v3  ;;  %v1514_v28 = vadd.f32 %v3270_v32, %v1447_v11  ;;  %1636 = vst.msk [vmem:[%s3789_s4 + $0x7c] sm:$0xf] %vm1604_vm4, %v1571_v59 }
 0x232   :  { %v1574_v0 = vpack.c.bf16 %v1510_v18, %v1510_v18  ;;  %v1388_v30 = vsub.f32 %v3876_v62, %v3256_v12  ;;  %v1452_v23 = vmul.f32 %v3263_v4, %v1386_v56  ;;  %v1515_v24 = vadd.f32 %v3270_v32, %v1448_v43  ;;  %1637 = vst.msk [vmem:[%s3789_s4 + $0x80] sm:$0xf] %vm1604_vm4, %v1572_v1 }
 0x233   :  { %v1575_v34 = vpack.c.bf16 %v1511_v35, %v1511_v35  ;;  %v1389_v16 = vsub.f32 %v3088_v44, %v3256_v12  ;;  %v1453_v40 = vmul.f32 %v3263_v4, %v1387_v58  ;;  %v1516_v29 = vadd.f32 %v3270_v32, %v1449_v37  ;;  %1638 = vst.msk [vmem:[%s3789_s4 + $0x84] sm:$0xf] %vm1604_vm4, %v1573_v53 }
 0x234   :  { %v1576_v9 = vpack.c.bf16 %v1512_v7, %v1512_v7  ;;  %v1390_v63 = vsub.f32 %v3099_v17, %v3256_v12  ;;  %v1454_v48 = vmul.f32 %v3263_v4, %v1388_v30  ;;  %v1517_v14 = vadd.f32 %v3270_v32, %v1450_v50  ;;  %1639 = vst.msk [vmem:[%s3789_s4 + $0x88] sm:$0xf] %vm1604_vm4, %v1574_v0 }
 0x235   :  { %v1577_v8 = vpack.c.bf16 %v1513_v49, %v1513_v49  ;;  %v1391_v44 = vsub.f32 %v3115_v27, %v3256_v12  ;;  %v1455_v55 = vmul.f32 %v3263_v4, %v1389_v16  ;;  %v1518_v52 = vadd.f32 %v3270_v32, %v1451_v10  ;;  %1640 = vst.msk [vmem:[%s3789_s4 + $0x8c] sm:$0xf] %vm1604_vm4, %v1575_v34 }
 0x236   :  { %v1578_v42 = vpack.c.bf16 %v1514_v28, %v1514_v28  ;;  %v1392_v17 = vsub.f32 %v3124_v57, %v3256_v12  ;;  %v1456_v41 = vmul.f32 %v3263_v4, %v1390_v63  ;;  %v1519_v54 = vadd.f32 %v3270_v32, %v1452_v23  ;;  %1641 = vst.msk [vmem:[%s3789_s4 + $0x90] sm:$0xf] %vm1604_vm4, %v1576_v9 }
 0x237   :  { %v1579_v39 = vpack.c.bf16 %v1515_v24, %v1515_v24  ;;  %v1393_v27 = vsub.f32 %v3137_v6, %v3256_v12  ;;  %v1457_v33 = vmul.f32 %v3263_v4, %v1391_v44  ;;  %v1520_v60 = vadd.f32 %v3270_v32, %v1453_v40  ;;  %1642 = vst.msk [vmem:[%s3789_s4 + $0x94] sm:$0xf] %vm1604_vm4, %v1577_v8 }
 0x238   :  { %v1580_v11 = vpack.c.bf16 %v1516_v29, %v1516_v29  ;;  %v1394_v57 = vsub.f32 %v3148_v22, %v3256_v12  ;;  %v1458_v18 = vmul.f32 %v3263_v4, %v1392_v17  ;;  %v1521_v61 = vadd.f32 %v3270_v32, %v1454_v48  ;;  %1643 = vst.msk [vmem:[%s3789_s4 + $0x98] sm:$0xf] %vm1604_vm4, %v1578_v42 }
 0x239   :  { %v1581_v47 = vpack.c.bf16 %v1517_v14, %v1517_v14  ;;  %v1395_v6 = vsub.f32 %v3158_v20, %v3256_v12  ;;  %v1459_v51 = vmul.f32 %v3263_v4, %v1393_v27  ;;  %v1522_v43 = vadd.f32 %v3270_v32, %v1455_v55  ;;  %1644 = vst.msk [vmem:[%s3789_s4 + $0x9c] sm:$0xf] %vm1604_vm4, %v1579_v39 }
 0x23a   :  { %v1582_v35 = vpack.c.bf16 %v1518_v52, %v1518_v52  ;;  %v1396_v22 = vsub.f32 %v3167_v21, %v3256_v12  ;;  %v1460_v59 = vmul.f32 %v3263_v4, %v1394_v57  ;;  %v1523_v38 = vadd.f32 %v3270_v32, %v1456_v41  ;;  %1645 = vst.msk [vmem:[%s3789_s4 + $0xa0] sm:$0xf] %vm1604_vm4, %v1580_v11 }
 0x23b   :  { %v1583_v3 = vpack.c.bf16 %v1519_v54, %v1519_v54  ;;  %v1397_v20 = vsub.f32 %v3169_v26, %v3256_v12  ;;  %v1461_v37 = vmul.f32 %v3263_v4, %v1395_v6  ;;  %v1524_v7 = vadd.f32 %v3270_v32, %v1457_v33  ;;  %1646 = vst.msk [vmem:[%s3789_s4 + $0xa4] sm:$0xf] %vm1604_vm4, %v1581_v47 }
 0x23c   :  { %v1584_v1 = vpack.c.bf16 %v1520_v60, %v1520_v60  ;;  %v1398_v21 = vsub.f32 %v3178_v19, %v3256_v12  ;;  %v1462_v46 = vmul.f32 %v3263_v4, %v1396_v22  ;;  %v1525_v56 = vadd.f32 %v3270_v32, %v1458_v18  ;;  %1647 = vst.msk [vmem:[%s3789_s4 + $0xa8] sm:$0xf] %vm1604_vm4, %v1582_v35 }
 0x23d   :  { %v1585_v50 = vpack.c.bf16 %v1521_v61, %v1521_v61  ;;  %v1399_v26 = vsub.f32 %v3189_v36, %v3256_v12  ;;  %v1463_v49 = vmul.f32 %v3263_v4, %v1397_v20  ;;  %v1526_v53 = vadd.f32 %v3270_v32, %v1459_v51  ;;  %1648 = vst.msk [vmem:[%s3789_s4 + $0xac] sm:$0xf] %vm1604_vm4, %v1583_v3  ;;  %v3877_v61 = vld [vmem:[#allocation2_spill] sm:$0xff] }
 0x23e   :  { %v1586_v5 = vpack.c.bf16 %v1522_v43, %v1522_v43  ;;  %v1400_v19 = vsub.f32 %v3198_v15, %v3256_v12  ;;  %v1464_v58 = vmul.f32 %v3263_v4, %v1398_v21  ;;  %v1527_v10 = vadd.f32 %v3270_v32, %v1460_v59  ;;  %1649 = vst.msk [vmem:[%s3789_s4 + $0xb0] sm:$0xf] %vm1604_vm4, %v1584_v1 }
 0x23f   :  { %v1587_v28 = vpack.c.bf16 %v1523_v38, %v1523_v38  ;;  %v1401_v36 = vsub.f32 %v3210_v25, %v3256_v12  ;;  %v1465_v0 = vmul.f32 %v3263_v4, %v1399_v26  ;;  %v1528_v62 = vadd.f32 %v3270_v32, %v1461_v37  ;;  %1650 = vst.msk [vmem:[%s3789_s4 + $0xb4] sm:$0xf] %vm1604_vm4, %v1585_v50 }
 0x240   :  { %v1588_v30 = vpack.c.bf16 %v1524_v7, %v1524_v7  ;;  %v1402_v15 = vsub.f32 %v3217_v31, %v3256_v12  ;;  %v1466_v23 = vmul.f32 %v3263_v4, %v1400_v19  ;;  %v1529_v24 = vadd.f32 %v3270_v32, %v1462_v46  ;;  %1651 = vst.msk [vmem:[%s3789_s4 + $0xb8] sm:$0xf] %vm1604_vm4, %v1586_v5 }
 0x241   :  { %v1589_v34 = vpack.c.bf16 %v1525_v56, %v1525_v56  ;;  %v1403_v25 = vsub.f32 %v3224_v13, %v3256_v12  ;;  %v1467_v16 = vmul.f32 %v3263_v4, %v1401_v36  ;;  %v1530_v40 = vadd.f32 %v3270_v32, %v1463_v49  ;;  %1652 = vst.msk [vmem:[%s3789_s4 + $0xbc] sm:$0xf] %vm1604_vm4, %v1587_v28 }
 0x242   :  { %v1590_v29 = vpack.c.bf16 %v1526_v53, %v1526_v53  ;;  %v1404_v31 = vsub.f32 %v3231_v2, %v3256_v12  ;;  %v1468_v9 = vmul.f32 %v3263_v4, %v1402_v15  ;;  %v1531_v63 = vadd.f32 %v3270_v32, %v1464_v58  ;;  %1653 = vst.msk [vmem:[%s3789_s4 + $0xc0] sm:$0xf] %vm1604_vm4, %v1588_v30 }
 0x243   :  { %v1591_v48 = vpack.c.bf16 %v1527_v10, %v1527_v10  ;;  %v1405_v13 = vsub.f32 %v3238_v45, %v3256_v12  ;;  %v1469_v14 = vmul.f32 %v3263_v4, %v1403_v25  ;;  %v1532_v8 = vadd.f32 %v3270_v32, %v1465_v0  ;;  %1654 = vst.msk [vmem:[%s3789_s4 + $0xc4] sm:$0xf] %vm1604_vm4, %v1589_v34 }
 0x244   :  { %v1592_v44 = vpack.c.bf16 %v1528_v62, %v1528_v62  ;;  %v1470_v2 = vmul.f32 %v3263_v4, %v1404_v31  ;;  %v1533_v55 = vadd.f32 %v3270_v32, %v1466_v23  ;;  %v1593_v52 = vpack.c.bf16 %v1529_v24, %v1529_v24  ;;  %1655 = vst.msk [vmem:[%s3789_s4 + $0xc8] sm:$0xf] %vm1604_vm4, %v1590_v29 }
 0x245   :  { %v1471_v45 = vmul.f32 %v3263_v4, %v1405_v13  ;;  %v1534_v12 = vadd.f32 %v3270_v32, %v1467_v16  ;;  %v1594_v42 = vpack.c.bf16 %v1530_v40, %v1530_v40  ;;  %v1535_v17 = vadd.f32 %v3270_v32, %v1468_v9  ;;  %1656 = vst.msk [vmem:[%s3789_s4 + $0xcc] sm:$0xf] %vm1604_vm4, %v1591_v48 }
 0x246   :  { %v1595_v41 = vpack.c.bf16 %v1531_v63, %v1531_v63  ;;  %v1536_v54 = vadd.f32 %v3270_v32, %v1469_v14  ;;  %v1596_v39 = vpack.c.bf16 %v1532_v8, %v1532_v8  ;;  %1657 = vst.msk [vmem:[%s3789_s4 + $0xd0] sm:$0xf] %vm1604_vm4, %v1592_v44  ;;  %v1537_v4 = vadd.f32 %v3270_v32, %v1470_v2 }
 0x247   :  { %v1597_v27 = vpack.c.bf16 %v1533_v55, %v1533_v55  ;;  %1658 = vst.msk [vmem:[%s3789_s4 + $0xd4] sm:$0xf] %vm1604_vm4, %v1593_v52  ;;  %v1538_v33 = vadd.f32 %v3270_v32, %v1471_v45  ;;  %v1598_v60 = vpack.c.bf16 %v1534_v12, %v1534_v12  ;;  %v1599_v11 = vpack.c.bf16 %v1535_v17, %v1535_v17 }
 0x248   :  { %1659 = vst.msk [vmem:[%s3789_s4 + $0xd8] sm:$0xf] %vm1604_vm4, %v1594_v42  ;;  %v1600_v57 = vpack.c.bf16 %v1536_v54, %v1536_v54  ;;  %v1601_v18 = vpack.c.bf16 %v1537_v4, %v1537_v4  ;;  %v1603_v47 = vpack.c.bf16 %v3877_v61, %v3877_v61 }
 0x249   :  { %1660 = vst.msk [vmem:[%s3789_s4 + $0xdc] sm:$0xf] %vm1604_vm4, %v1595_v41  ;;  %v1602_v32 = vpack.c.bf16 %v1538_v33, %v1538_v33 }
 0x24a   :  { %1661 = vst.msk [vmem:[%s3789_s4 + $0xe0] sm:$0xf] %vm1604_vm4, %v1596_v39 }
 0x24b   :  { %1662 = vst.msk [vmem:[%s3789_s4 + $0xe4] sm:$0xf] %vm1604_vm4, %v1597_v27 }
 0x24c   :  { %1663 = vst.msk [vmem:[%s3789_s4 + $0xe8] sm:$0xf] %vm1604_vm4, %v1598_v60 }
 0x24d   :  { %1664 = vst.msk [vmem:[%s3789_s4 + $0xec] sm:$0xf] %vm1604_vm4, %v1599_v11 }
 0x24e   :  { %1665 = vst.msk [vmem:[%s3789_s4 + $0xf0] sm:$0xf] %vm1604_vm4, %v1600_v57 }
 0x24f   :  { %1666 = vst.msk [vmem:[%s3789_s4 + $0xf4] sm:$0xf] %vm1604_vm4, %v1601_v18 }
 0x250   :  { %1667 = vst.msk [vmem:[%s3789_s4 + $0xf8] sm:$0xf] %vm1604_vm4, %v1602_v32 }
 0x251   :  { %1668 = vst.msk [vmem:[%s3789_s4 + $0xfc] sm:$0xf] %vm1604_vm4, %v1603_v47 }

// kernel: discriminator_forward.6
= control target key start
LH: loop header
LB: loop body
LE: loop exit
PB: predicated region body
PF: predicated region fallthrough
CT: control target
= control target key end

     0   :  { %vm695_vm0 = vcmask 523264   ;;  %vm870_vm4 = vcmask 519168   ;;  %s1756_s1 = inlined_call_operand.vmem [shape: bf16[512,64], index: 1, kind: input, shape index: {}]   ;;  %s1757_s0 = inlined_call_operand.vmem [shape: bf16[128,512], index: 0, kind: input, shape index: {}]   ;;  %s1758_s3 = inlined_call_operand.vmem [shape: f32[1,64], index: 3, kind: input, shape index: {}]   ;;  %s1759_s2 = inlined_call_operand.vmem [shape: f32[1,64], index: 2, kind: input, shape index: {}]   ;;  %s1760_s4 = inlined_call_operand.vmem [shape: bf16[128,64], index: 4, kind: output, shape index: {}]  }
   0x1   :  { %v1186_v0 = vld [vmem:[%s1756_s1 + $0x38] sm:$0xff]  ;;  %v1185_v4 = vld [vmem:[%s1756_s1 + $0x30] sm:$0xff]  ;;  %v1184_v8 = vld [vmem:[%s1756_s1 + $0x28] sm:$0xff] }
   0x2   :  { %v1194_v1 = vld [vmem:[%s1756_s1 + $0x78] sm:$0xff]  ;;  %465 = vmatpush.bf16.msra.mxu0 %v1186_v0  ;;  %v1193_v5 = vld [vmem:[%s1756_s1 + $0x70] sm:$0xff]  ;;  %v1192_v9 = vld [vmem:[%s1756_s1 + $0x68] sm:$0xff] }
   0x3   :  { %v1202_v2 = vld [vmem:[%s1756_s1 + $0xb8] sm:$0xff]  ;;  %514 = vmatpush.bf16.msra.mxu1 %v1194_v1  ;;  %v1201_v6 = vld [vmem:[%s1756_s1 + $0xb0] sm:$0xff]  ;;  %v1200_v10 = vld [vmem:[%s1756_s1 + $0xa8] sm:$0xff] }
   0x4   :  { %v1210_v3 = vld [vmem:[%s1756_s1 + $0xf8] sm:$0xff]  ;;  %563 = vmatpush.bf16.msra.mxu2 %v1202_v2  ;;  %v1209_v7 = vld [vmem:[%s1756_s1 + $0xf0] sm:$0xff]  ;;  %v1208_v11 = vld [vmem:[%s1756_s1 + $0xe8] sm:$0xff] }
   0x5   :  { %612 = vmatpush.bf16.msra.mxu3 %v1210_v3  ;;  %v1183_v12 = vld [vmem:[%s1756_s1 + $0x20] sm:$0xff]  ;;  %v1182_v16 = vld [vmem:[%s1756_s1 + $0x18] sm:$0xff]  ;;  %v1181_v20 = vld [vmem:[%s1756_s1 + $0x10] sm:$0xff] }
   0x6   :  { %466 = vmatpush.bf16.msra.mxu0 %v1185_v4  ;;  %v1191_v13 = vld [vmem:[%s1756_s1 + $0x60] sm:$0xff]  ;;  %v1190_v17 = vld [vmem:[%s1756_s1 + $0x58] sm:$0xff]  ;;  %v1189_v21 = vld [vmem:[%s1756_s1 + $0x50] sm:$0xff] }
   0x7   :  { %515 = vmatpush.bf16.msra.mxu1 %v1193_v5  ;;  %v1199_v14 = vld [vmem:[%s1756_s1 + $0xa0] sm:$0xff]  ;;  %v1198_v18 = vld [vmem:[%s1756_s1 + $0x98] sm:$0xff]  ;;  %v1197_v22 = vld [vmem:[%s1756_s1 + $0x90] sm:$0xff] }
   0x8   :  { %564 = vmatpush.bf16.msra.mxu2 %v1201_v6  ;;  %v1207_v15 = vld [vmem:[%s1756_s1 + $0xe0] sm:$0xff]  ;;  %v1206_v19 = vld [vmem:[%s1756_s1 + $0xd8] sm:$0xff]  ;;  %v1205_v23 = vld [vmem:[%s1756_s1 + $0xd0] sm:$0xff] }
   0x9   :  { %613 = vmatpush.bf16.msra.mxu3 %v1209_v7  ;;  %v1180_v24 = vld [vmem:[%s1756_s1 + $0x8] sm:$0xff]  ;;  %v1179_v28 = vld [vmem:[%s1756_s1] sm:$0xff]  ;;  %v1149_v33 = vld [vmem:[%s1757_s0 + $0xc] sm:$0xf0] }
   0xa   :  { %467 = vmatpush.bf16.msra.mxu0 %v1184_v8  ;;  %v1188_v25 = vld [vmem:[%s1756_s1 + $0x48] sm:$0xff]  ;;  %v1187_v29 = vld [vmem:[%s1756_s1 + $0x40] sm:$0xff]  ;;  %v895_v35 = vld [vmem:[%s1757_s0 + $0x10] sm:$0xf0] }
   0xb   :  { %516 = vmatpush.bf16.msra.mxu1 %v1192_v9  ;;  %v1196_v26 = vld [vmem:[%s1756_s1 + $0x88] sm:$0xff]  ;;  %v1195_v30 = vld [vmem:[%s1756_s1 + $0x80] sm:$0xff]  ;;  %v1150_v37 = vld [vmem:[%s1757_s0 + $0x14] sm:$0xf0] }
   0xc   :  { %565 = vmatpush.bf16.msra.mxu2 %v1200_v10  ;;  %v1204_v27 = vld [vmem:[%s1756_s1 + $0xc8] sm:$0xff]  ;;  %v1203_v31 = vld [vmem:[%s1756_s1 + $0xc0] sm:$0xff]  ;;  %v903_v39 = vld [vmem:[%s1757_s0 + $0x18] sm:$0xf0] }
   0xd   :  { %614 = vmatpush.bf16.msra.mxu3 %v1208_v11  ;;  %v893_v32 = vld [vmem:[%s1757_s0] sm:$0xf]  ;;  %v1147_v34 = vld [vmem:[%s1757_s0 + $0x4] sm:$0xf]  ;;  %v901_v36 = vld [vmem:[%s1757_s0 + $0x8] sm:$0xf] }
   0xe   :  { %468 = vmatpush.bf16.msra.mxu0 %v1183_v12  ;;  %v1148_v38 = vld [vmem:[%s1757_s0 + $0xc] sm:$0xf]  ;;  %v894_v40 = vor.u32 %v1149_v33, %v893_v32  ;;  %v898_v41 = vor.u32 %v1147_v34, %v895_v35  ;;  %v902_v42 = vor.u32 %v1150_v37, %v901_v36  ;;  %v909_v44 = vld [vmem:[%s1757_s0 + $0x20] sm:$0xf]  ;;  %v1153_v45 = vld [vmem:[%s1757_s0 + $0x2c] sm:$0xf0] }
   0xf   :  { %517 = vmatpush.bf16.msra.mxu1 %v1191_v13  ;;  %v906_v43 = vor.u32 %v1148_v38, %v903_v39  ;;  %v1151_v46 = vld [vmem:[%s1757_s0 + $0x24] sm:$0xf]  ;;  %v911_v47 = vld [vmem:[%s1757_s0 + $0x30] sm:$0xf0]  ;;  %v917_v48 = vld [vmem:[%s1757_s0 + $0x28] sm:$0xf]  ;;  %v910_v52 = vor.u32 %v1153_v45, %v909_v44 }
  0x10   :  { %566 = vmatpush.bf16.msra.mxu2 %v1199_v14  ;;  %v1154_v49 = vld [vmem:[%s1757_s0 + $0x34] sm:$0xf0]  ;;  %v1152_v50 = vld [vmem:[%s1757_s0 + $0x2c] sm:$0xf]  ;;  %v919_v51 = vld [vmem:[%s1757_s0 + $0x38] sm:$0xf0]  ;;  %v914_v53 = vor.u32 %v1151_v46, %v911_v47 }
  0x11   :  { %615 = vmatpush.bf16.msra.mxu3 %v1207_v15  ;;  %v918_v54 = vor.u32 %v1154_v49, %v917_v48  ;;  %v922_v55 = vor.u32 %v1152_v50, %v919_v51  ;;  %v925_v56 = vld [vmem:[%s1757_s0 + $0x40] sm:$0xf]  ;;  %v1157_v57 = vld [vmem:[%s1757_s0 + $0x4c] sm:$0xf0]  ;;  %v1155_v58 = vld [vmem:[%s1757_s0 + $0x44] sm:$0xf] }
  0x12   :  { %469 = vmatpush.bf16.msra.mxu0 %v1182_v16  ;;  %v927_v59 = vld [vmem:[%s1757_s0 + $0x50] sm:$0xf0]  ;;  %v933_v60 = vld [vmem:[%s1757_s0 + $0x48] sm:$0xf]  ;;  %v1158_v61 = vld [vmem:[%s1757_s0 + $0x54] sm:$0xf0]  ;;  %v926_v0 = vor.u32 %v1157_v57, %v925_v56 }
  0x13   :  { %518 = vmatpush.bf16.msra.mxu1 %v1190_v17  ;;  %v1156_v62 = vld [vmem:[%s1757_s0 + $0x4c] sm:$0xf]  ;;  %v935_v63 = vld [vmem:[%s1757_s0 + $0x58] sm:$0xf0]  ;;  %v930_v1 = vor.u32 %v1155_v58, %v927_v59  ;;  %v934_v2 = vor.u32 %v1158_v61, %v933_v60  ;;  %v941_v4 = vld [vmem:[%s1757_s0 + $0x60] sm:$0xf] }
  0x14   :  { %567 = vmatpush.bf16.msra.mxu2 %v1198_v18  ;;  %v938_v3 = vor.u32 %v1156_v62, %v935_v63  ;;  %v1161_v5 = vld [vmem:[%s1757_s0 + $0x6c] sm:$0xf0]  ;;  %v1159_v6 = vld [vmem:[%s1757_s0 + $0x64] sm:$0xf]  ;;  %v943_v7 = vld [vmem:[%s1757_s0 + $0x70] sm:$0xf0] }
  0x15   :  { %616 = vmatpush.bf16.msra.mxu3 %v1206_v19  ;;  %v949_v8 = vld [vmem:[%s1757_s0 + $0x68] sm:$0xf]  ;;  %v1162_v9 = vld [vmem:[%s1757_s0 + $0x74] sm:$0xf0]  ;;  %v1160_v10 = vld [vmem:[%s1757_s0 + $0x6c] sm:$0xf]  ;;  %v942_v12 = vor.u32 %v1161_v5, %v941_v4  ;;  %v946_v13 = vor.u32 %v1159_v6, %v943_v7 }
  0x16   :  { %470 = vmatpush.bf16.msra.mxu0 %v1181_v20  ;;  %v951_v11 = vld [vmem:[%s1757_s0 + $0x78] sm:$0xf0]  ;;  %v950_v14 = vor.u32 %v1162_v9, %v949_v8  ;;  %v957_v16 = vld [vmem:[%s1757_s0 + $0x80] sm:$0xf]  ;;  %v1165_v17 = vld [vmem:[%s1757_s0 + $0x8c] sm:$0xf0] }
  0x17   :  { %519 = vmatpush.bf16.msra.mxu1 %v1189_v21  ;;  %v954_v15 = vor.u32 %v1160_v10, %v951_v11  ;;  %v1163_v18 = vld [vmem:[%s1757_s0 + $0x84] sm:$0xf]  ;;  %v959_v19 = vld [vmem:[%s1757_s0 + $0x90] sm:$0xf0]  ;;  %v965_v20 = vld [vmem:[%s1757_s0 + $0x88] sm:$0xf] }
  0x18   :  { %568 = vmatpush.bf16.msra.mxu2 %v1197_v22  ;;  %v1166_v21 = vld [vmem:[%s1757_s0 + $0x94] sm:$0xf0]  ;;  %v1164_v22 = vld [vmem:[%s1757_s0 + $0x8c] sm:$0xf]  ;;  %v981_v32 = vld [vmem:[%s1757_s0 + $0xa8] sm:$0xf] }
  0x19   :  { %617 = vmatpush.bf16.msra.mxu3 %v1205_v23  ;;  %v967_v23 = vld [vmem:[%s1757_s0 + $0x98] sm:$0xf0]  ;;  %v1170_v33 = vld [vmem:[%s1757_s0 + $0xb4] sm:$0xf0]  ;;  %v1168_v34 = vld [vmem:[%s1757_s0 + $0xac] sm:$0xf] }
  0x1a   :  { %471 = vmatpush.bf16.msra.mxu0 %v1180_v24  ;;  %v958_v24 = vor.u32 %v1165_v17, %v957_v16  ;;  %v983_v35 = vld [vmem:[%s1757_s0 + $0xb8] sm:$0xf0]  ;;  %v982_v38 = vor.u32 %v1170_v33, %v981_v32  ;;  %v997_v44 = vld [vmem:[%s1757_s0 + $0xc8] sm:$0xf]  ;;  %v1174_v45 = vld [vmem:[%s1757_s0 + $0xd4] sm:$0xf0] }
  0x1b   :  { %520 = vmatpush.bf16.msra.mxu1 %v1188_v25  ;;  %v962_v25 = vor.u32 %v1163_v18, %v959_v19  ;;  %v986_v39 = vor.u32 %v1168_v34, %v983_v35  ;;  %v1172_v46 = vld [vmem:[%s1757_s0 + $0xcc] sm:$0xf]  ;;  %v999_v47 = vld [vmem:[%s1757_s0 + $0xd8] sm:$0xf0]  ;;  %v998_v50 = vor.u32 %v1174_v45, %v997_v44  ;;  %v1013_v56 = vld [vmem:[%s1757_s0 + $0xe8] sm:$0xf] }
  0x1c   :  { %569 = vmatpush.bf16.msra.mxu2 %v1196_v26  ;;  %v966_v26 = vor.u32 %v1166_v21, %v965_v20  ;;  %v1002_v51 = vor.u32 %v1172_v46, %v999_v47  ;;  %v1178_v57 = vld [vmem:[%s1757_s0 + $0xf4] sm:$0xf0]  ;;  %v1176_v58 = vld [vmem:[%s1757_s0 + $0xec] sm:$0xf]  ;;  %v1015_v59 = vld [vmem:[%s1757_s0 + $0xf8] sm:$0xf0] }
  0x1d   :  { %618 = vmatpush.bf16.msra.mxu3 %v1204_v27  ;;  %v970_v27 = vor.u32 %v1164_v22, %v967_v23  ;;  %v1014_v62 = vor.u32 %v1178_v57, %v1013_v56  ;;  %v1018_v63 = vor.u32 %v1176_v58, %v1015_v59 }
  0x1e   :  { %472 = vmatpush.bf16.msra.mxu0 %v1179_v28  ;;  %v973_v28 = vld [vmem:[%s1757_s0 + $0xa0] sm:$0xf] }
  0x1f   :  { %521 = vmatpush.bf16.msra.mxu1 %v1187_v29  ;;  %v1169_v29 = vld [vmem:[%s1757_s0 + $0xac] sm:$0xf0] }
  0x20   :  { %570 = vmatpush.bf16.msra.mxu2 %v1195_v30  ;;  %v1167_v30 = vld [vmem:[%s1757_s0 + $0xa4] sm:$0xf]  ;;  %v974_v36 = vor.u32 %v1169_v29, %v973_v28 }
  0x21   :  { %619 = vmatpush.bf16.msra.mxu3 %v1203_v31  ;;  %473 = vmatmul.bf16.vlgmr.msra.gmra.mxu0 %v894_v40  ;;  %v975_v31 = vld [vmem:[%s1757_s0 + $0xb0] sm:$0xf0]  ;;  %v989_v40 = vld [vmem:[%s1757_s0 + $0xc0] sm:$0xf] }
  0x22   :  { %522 = vmatmul.bf16.vlgmr.msra.gmra.mxu1 %v898_v41  ;;  %v978_v37 = vor.u32 %v1167_v30, %v975_v31  ;;  %v1173_v41 = vld [vmem:[%s1757_s0 + $0xcc] sm:$0xf0] }
  0x23   :  { %571 = vmatmul.bf16.vlgmr.msra.gmra.mxu2 %v902_v42  ;;  %v1171_v42 = vld [vmem:[%s1757_s0 + $0xc4] sm:$0xf]  ;;  %v990_v48 = vor.u32 %v1173_v41, %v989_v40 }
  0x24   :  { %620 = vmatmul.bf16.vlgmr.msra.gmra.mxu3 %v906_v43  ;;  %v991_v43 = vld [vmem:[%s1757_s0 + $0xd0] sm:$0xf0] }
  0x25   :  { %v994_v49 = vor.u32 %v1171_v42, %v991_v43 }
  0x31   :  { %478 = vmatmul.bf16.gmra.mxu0 %v910_v52  ;;  %v1005_v52 = vld [vmem:[%s1757_s0 + $0xe0] sm:$0xf] }
  0x32   :  { %527 = vmatmul.bf16.gmra.mxu1 %v914_v53  ;;  %v1177_v53 = vld [vmem:[%s1757_s0 + $0xec] sm:$0xf0] }
  0x33   :  { %576 = vmatmul.bf16.gmra.mxu2 %v918_v54  ;;  %v1175_v54 = vld [vmem:[%s1757_s0 + $0xe4] sm:$0xf]  ;;  %v1006_v60 = vor.u32 %v1177_v53, %v1005_v52 }
  0x34   :  { %625 = vmatmul.bf16.gmra.mxu3 %v922_v55  ;;  %v1007_v55 = vld [vmem:[%s1757_s0 + $0xf0] sm:$0xf0] }
  0x35   :  { %v1010_v61 = vor.u32 %v1175_v54, %v1007_v55 }
  0x41   :  { %483 = vmatmul.bf16.gmra.mxu0 %v926_v0 }
  0x42   :  { %532 = vmatmul.bf16.gmra.mxu1 %v930_v1 }
  0x43   :  { %581 = vmatmul.bf16.gmra.mxu2 %v934_v2 }
  0x44   :  { %630 = vmatmul.bf16.gmra.mxu3 %v938_v3 }
  0x51   :  { %488 = vmatmul.bf16.gmra.mxu0 %v942_v12 }
  0x52   :  { %537 = vmatmul.bf16.gmra.mxu1 %v946_v13 }
  0x53   :  { %586 = vmatmul.bf16.gmra.mxu2 %v950_v14 }
  0x54   :  { %635 = vmatmul.bf16.gmra.mxu3 %v954_v15 }
  0x61   :  { %493 = vmatmul.bf16.gmra.mxu0 %v958_v24 }
  0x62   :  { %542 = vmatmul.bf16.gmra.mxu1 %v962_v25 }
  0x63   :  { %591 = vmatmul.bf16.gmra.mxu2 %v966_v26 }
  0x64   :  { %640 = vmatmul.bf16.gmra.mxu3 %v970_v27 }
  0x71   :  { %498 = vmatmul.bf16.gmra.mxu0 %v974_v36 }
  0x72   :  { %547 = vmatmul.bf16.gmra.mxu1 %v978_v37 }
  0x73   :  { %596 = vmatmul.bf16.gmra.mxu2 %v982_v38 }
  0x74   :  { %645 = vmatmul.bf16.gmra.mxu3 %v986_v39 }
  0x81   :  { %503 = vmatmul.bf16.gmra.mxu0 %v990_v48 }
  0x82   :  { %552 = vmatmul.bf16.gmra.mxu1 %v994_v49 }
  0x83   :  { %601 = vmatmul.bf16.gmra.mxu2 %v998_v50 }
  0x84   :  { %650 = vmatmul.bf16.gmra.mxu3 %v1002_v51 }
  0x91   :  { %508 = vmatmul.bf16.gmra.mxu0 %v1006_v60 }
  0x92   :  { %557 = vmatmul.bf16.gmra.mxu1 %v1010_v61 }
  0x93   :  { %606 = vmatmul.bf16.gmra.mxu2 %v1014_v62 }
  0x94   :  { %655 = vmatmul.bf16.gmra.mxu3 %v1018_v63 }
  0x9e   :  { %v474_v0 = vpop.f32.mrf.mxu0 }
  0x9f   :  { %v523_v1 = vpop.f32.mrf.mxu1 }
  0xa0   :  { %v524_v2 = vadd.f32 %v523_v1, %v474_v0 }
  0xa6   :  { %v572_v3 = vpop.f32.mrf.mxu2  ;;  %v476_v6 = vpop.f32.mrf.mxu0 }
  0xa7   :  { %v621_v4 = vpop.f32.mrf.mxu3  ;;  %v573_v5 = vadd.f32 %v572_v3, %v524_v2  ;;  %v525_v7 = vpop.f32.mrf.mxu1 }
  0xa8   :  { %v526_v8 = vadd.f32 %v525_v7, %v476_v6 }
  0xa9   :  { %v1527_v9 = vadd.f32 %v621_v4, %v573_v5 }
  0xab   :  { %v661_v63 = vmul.f32 0.01, %v1527_v9 }
  0xae   :  { %v574_v10 = vpop.f32.mrf.mxu2  ;;  %v479_v13 = vpop.f32.mrf.mxu0 }
  0xaf   :  { %v623_v11 = vpop.f32.mrf.mxu3  ;;  %v575_v12 = vadd.f32 %v574_v10, %v526_v8  ;;  %v528_v14 = vpop.f32.mrf.mxu1 }
  0xb0   :  { %v529_v15 = vadd.f32 %v528_v14, %v479_v13 }
  0xb1   :  { %v624_v16 = vadd.f32 %v623_v11, %v575_v12  ;;  %v1537_v11 = vmax.f32 %v1527_v9, %v661_v63 }
  0xb3   :  { %v662_v61 = vmul.f32 0.01, %v624_v16 }
  0xb5   :  { %v1534_v4 = vmax.f32 %v624_v16, %v662_v61 }
  0xb6   :  { %v577_v17 = vpop.f32.mrf.mxu2  ;;  %v481_v20 = vpop.f32.mrf.mxu0 }
  0xb7   :  { %v626_v18 = vpop.f32.mrf.mxu3  ;;  %v578_v19 = vadd.f32 %v577_v17, %v529_v15  ;;  %v530_v21 = vpop.f32.mrf.mxu1  ;;  %v697_v17 = vsel %vm695_vm0, %v1534_v4, 0.0  ;;  %v735_v16 = vmul.f32 %v1534_v4, %v1534_v4 }
  0xb8   :  { %v531_v22 = vadd.f32 %v530_v21, %v481_v20 }
  0xb9   :  { %v627_v23 = vadd.f32 %v626_v18, %v578_v19 }
  0xbb   :  { %v663_v5 = vmul.f32 0.01, %v627_v23 }
  0xbd   :  { %v1543_v18 = vmax.f32 %v627_v23, %v663_v5 }
  0xbe   :  { %v579_v24 = vpop.f32.mrf.mxu2  ;;  %v484_v27 = vpop.f32.mrf.mxu0 }
  0xbf   :  { %v628_v25 = vpop.f32.mrf.mxu3  ;;  %v580_v26 = vadd.f32 %v579_v24, %v531_v22  ;;  %v533_v28 = vpop.f32.mrf.mxu1  ;;  %v696_v22 = vsel %vm695_vm0, %v1537_v11, 0.0 }
  0xc0   :  { %v534_v29 = vadd.f32 %v533_v28, %v484_v27 }
  0xc1   :  { %v629_v30 = vadd.f32 %v628_v25, %v580_v26  ;;  %v734_v26 = vmul.f32 %v1537_v11, %v1537_v11 }
  0xc3   :  { %v664_v8 = vmul.f32 0.01, %v629_v30 }
  0xc5   :  { %v1545_v19 = vmax.f32 %v629_v30, %v664_v8  ;;  %v751_v30 = vsel %vm695_vm0, %v735_v16, 0.0 }
  0xc6   :  { %v582_v31 = vpop.f32.mrf.mxu2  ;;  %v486_v34 = vpop.f32.mrf.mxu0 }
  0xc7   :  { %v631_v32 = vpop.f32.mrf.mxu3  ;;  %v583_v33 = vadd.f32 %v582_v31, %v534_v29  ;;  %v535_v35 = vpop.f32.mrf.mxu1 }
  0xc8   :  { %v536_v62 = vadd.f32 %v535_v35, %v486_v34 }
  0xc9   :  { %v1529_v36 = vadd.f32 %v631_v32, %v583_v33  ;;  %v698_v32 = vadd.f32 %v697_v17, %v696_v22  ;;  %v736_v33 = vmul.f32 %v1543_v18, %v1543_v18 }
  0xcb   :  { %v665_v20 = vmul.f32 0.01, %v1529_v36 }
  0xce   :  { %v584_v37 = vpop.f32.mrf.mxu2  ;;  %v489_v39 = vpop.f32.mrf.mxu0 }
  0xcf   :  { %v633_v38 = vpop.f32.mrf.mxu3  ;;  %v538_v40 = vpop.f32.mrf.mxu1  ;;  %v585_v1 = vadd.f32 %v584_v37, %v536_v62  ;;  %v699_v37 = vsel %vm695_vm0, %v1543_v18, 0.0 }
  0xd0   :  { %v539_v0 = vadd.f32 %v538_v40, %v489_v39  ;;  %v1560_v39 = vmax.f32 %v1529_v36, %v665_v20  ;;  %v701_v36 = vsel %vm695_vm0, %v1545_v19, 0.0 }
  0xd1   :  { %v634_v14 = vadd.f32 %v633_v38, %v585_v1  ;;  %v737_v38 = vmul.f32 %v1545_v19, %v1545_v19 }
  0xd2   :  { %v703_v5 = vsel %vm695_vm0, %v1560_v39, 0.0 }
  0xd3   :  { %v666_v27 = vmul.f32 0.01, %v634_v14 }
  0xd6   :  { %v587_v41 = vpop.f32.mrf.mxu2  ;;  %v491_v43 = vpop.f32.mrf.mxu0 }
  0xd7   :  { %v636_v42 = vpop.f32.mrf.mxu3  ;;  %v540_v44 = vpop.f32.mrf.mxu1  ;;  %v588_v12 = vadd.f32 %v587_v41, %v539_v0 }
  0xd8   :  { %v541_v10 = vadd.f32 %v540_v44, %v491_v43 }
  0xd9   :  { %v637_v24 = vadd.f32 %v636_v42, %v588_v12 }
  0xdb   :  { %v667_v41 = vmul.f32 0.01, %v637_v24 }
  0xde   :  { %v589_v45 = vpop.f32.mrf.mxu2  ;;  %v494_v47 = vpop.f32.mrf.mxu0 }
  0xdf   :  { %v638_v46 = vpop.f32.mrf.mxu3  ;;  %v543_v48 = vpop.f32.mrf.mxu1  ;;  %v590_v15 = vadd.f32 %v589_v45, %v541_v10  ;;  %v750_v45 = vsel %vm695_vm0, %v734_v26, 0.0 }
  0xe0   :  { %v544_v13 = vadd.f32 %v543_v48, %v494_v47 }
  0xe1   :  { %v639_v28 = vadd.f32 %v638_v46, %v590_v15  ;;  %v1563_v46 = vmax.f32 %v634_v14, %v666_v27 }
  0xe3   :  { %v668_v47 = vmul.f32 0.01, %v639_v28  ;;  %v739_v62 = vmul.f32 %v1563_v46, %v1563_v46  ;;  %v705_v15 = vsel %vm695_vm0, %v1563_v46, 0.0 }
  0xe5   :  { %v1575_v63 = vmax.f32 %v639_v28, %v668_v47 }
  0xe6   :  { %v592_v49 = vpop.f32.mrf.mxu2  ;;  %v496_v51 = vpop.f32.mrf.mxu0 }
  0xe7   :  { %v641_v50 = vpop.f32.mrf.mxu3  ;;  %v545_v52 = vpop.f32.mrf.mxu1  ;;  %v593_v25 = vadd.f32 %v592_v49, %v544_v13  ;;  %v752_v49 = vadd.f32 %v751_v30, %v750_v45 }
  0xe8   :  { %v546_v21 = vadd.f32 %v545_v52, %v496_v51  ;;  %v700_v51 = vadd.f32 %v699_v37, %v698_v32  ;;  %v753_v52 = vsel %vm695_vm0, %v736_v33, 0.0  ;;  %v709_v32 = vsel %vm695_vm0, %v1575_v63, 0.0 }
  0xe9   :  { %v642_v42 = vadd.f32 %v641_v50, %v593_v25  ;;  %v738_v50 = vmul.f32 %v1560_v39, %v1560_v39 }
  0xeb   :  { %v757_v10 = vsel %vm695_vm0, %v738_v50, 0.0 }
  0xee   :  { %v594_v53 = vpop.f32.mrf.mxu2  ;;  %v499_v55 = vpop.f32.mrf.mxu0 }
  0xef   :  { %v643_v54 = vpop.f32.mrf.mxu3  ;;  %v548_v56 = vpop.f32.mrf.mxu1  ;;  %v595_v29 = vadd.f32 %v594_v53, %v546_v21 }
  0xf0   :  { %v549_v9 = vadd.f32 %v548_v56, %v499_v55  ;;  %v755_v55 = vsel %vm695_vm0, %v737_v38, 0.0 }
  0xf1   :  { %v644_v48 = vadd.f32 %v643_v54, %v595_v29  ;;  %v754_v54 = vadd.f32 %v753_v52, %v752_v49 }
  0xf3   :  { %v670_v0 = vmul.f32 0.01, %v644_v48  ;;  %v756_v8 = vadd.f32 %v755_v55, %v754_v54 }
  0xf5   :  { %v1590_v22 = vmax.f32 %v644_v48, %v670_v0  ;;  %v758_v28 = vadd.f32 %v757_v10, %v756_v8 }
  0xf6   :  { %v597_v57 = vpop.f32.mrf.mxu2  ;;  %v501_v59 = vpop.f32.mrf.mxu0 }
  0xf7   :  { %v646_v58 = vpop.f32.mrf.mxu3  ;;  %v550_v60 = vpop.f32.mrf.mxu1  ;;  %v598_v40 = vadd.f32 %v597_v57, %v549_v9  ;;  %v1571_v57 = vmax.f32 %v637_v24, %v667_v41  ;;  %v741_v9 = vmul.f32 %v1575_v63, %v1575_v63  ;;  %v743_v38 = vmul.f32 %v1590_v22, %v1590_v22 }
  0xf8   :  { %v551_v43 = vadd.f32 %v550_v60, %v501_v59  ;;  %v669_v59 = vmul.f32 0.01, %v642_v42  ;;  %v713_v52 = vsel %vm695_vm0, %v1590_v22, 0.0 }
  0xf9   :  { %v647_v56 = vadd.f32 %v646_v58, %v598_v40  ;;  %v740_v17 = vmul.f32 %v1571_v57, %v1571_v57  ;;  %v707_v24 = vsel %vm695_vm0, %v1571_v57, 0.0  ;;  %v763_v37 = vsel %vm695_vm0, %v741_v9, 0.0 }
  0xfa   :  { %v1585_v16 = vmax.f32 %v642_v42, %v669_v59 }
  0xfb   :  { %v671_v12 = vmul.f32 0.01, %v647_v56 }
  0xfc   :  { %v742_v30 = vmul.f32 %v1585_v16, %v1585_v16  ;;  %v711_v42 = vsel %vm695_vm0, %v1585_v16, 0.0 }
  0xfe   :  { %v599_v2 = vpop.f32.mrf.mxu2  ;;  %v504_v6 = vpop.f32.mrf.mxu0 }
  0xff   :  { %v1532_v3 = vpop.f32.mrf.mxu3  ;;  %v553_v7 = vpop.f32.mrf.mxu1  ;;  %v600_v53 = vadd.f32 %v599_v2, %v551_v43 }
 0x100   :  { %v554_v44 = vadd.f32 %v553_v7, %v504_v6  ;;  %v702_v7 = vadd.f32 %v701_v36, %v700_v51  ;;  %v765_v51 = vsel %vm695_vm0, %v742_v30, 0.0 }
 0x101   :  { %v649_v6 = vadd.f32 %v1532_v3, %v600_v53  ;;  %v759_v3 = vsel %vm695_vm0, %v739_v62, 0.0 }
 0x102   :  { %v704_v21 = vadd.f32 %v703_v5, %v702_v7 }
 0x103   :  { %v672_v25 = vmul.f32 0.01, %v649_v6 }
 0x104   :  { %v706_v29 = vadd.f32 %v705_v15, %v704_v21 }
 0x105   :  { %v1606_v43 = vmax.f32 %v649_v6, %v672_v25 }
 0x106   :  { %v602_v31 = vpop.f32.mrf.mxu2  ;;  %v506_v34 = vpop.f32.mrf.mxu0 }
 0x107   :  { %v651_v23 = vpop.f32.mrf.mxu3  ;;  %v555_v35 = vpop.f32.mrf.mxu1  ;;  %v603_v60 = vadd.f32 %v602_v31, %v554_v44  ;;  %v1594_v31 = vmax.f32 %v647_v56, %v671_v12  ;;  %v767_v56 = vsel %vm695_vm0, %v743_v38, 0.0  ;;  %v745_v54 = vmul.f32 %v1606_v43, %v1606_v43 }
 0x108   :  { %v556_v61 = vadd.f32 %v555_v35, %v506_v34  ;;  %v760_v34 = vadd.f32 %v759_v3, %v758_v28  ;;  %v708_v35 = vadd.f32 %v707_v24, %v706_v29  ;;  %v717_v6 = vsel %vm695_vm0, %v1606_v43, 0.0 }
 0x109   :  { %v652_v20 = vadd.f32 %v651_v23, %v603_v60  ;;  %v761_v23 = vsel %vm695_vm0, %v740_v17, 0.0  ;;  %v744_v49 = vmul.f32 %v1594_v31, %v1594_v31 }
 0x10a   :  { %v762_v47 = vadd.f32 %v761_v23, %v760_v34  ;;  %v710_v48 = vadd.f32 %v709_v32, %v708_v35 }
 0x10b   :  { %v673_v33 = vmul.f32 0.01, %v652_v20  ;;  %v769_v5 = vsel %vm695_vm0, %v744_v49, 0.0 }
 0x10c   :  { %v764_v55 = vadd.f32 %v763_v37, %v762_v47  ;;  %v712_v50 = vadd.f32 %v711_v42, %v710_v48 }
 0x10d   :  { %v1613_v53 = vmax.f32 %v652_v20, %v673_v33 }
 0x10e   :  { %v604_v1 = vpop.f32.mrf.mxu2  ;;  %v509_v13 = vpop.f32.mrf.mxu0 }
 0x10f   :  { %v653_v2 = vpop.f32.mrf.mxu3  ;;  %v605_v58 = vadd.f32 %v604_v1, %v556_v61  ;;  %v558_v14 = vpop.f32.mrf.mxu1  ;;  %v715_v61 = vsel %vm695_vm0, %v1594_v31, 0.0  ;;  %v766_v1 = vadd.f32 %v765_v51, %v764_v55  ;;  %v719_v15 = vsel %vm695_vm0, %v1613_v53, 0.0 }
 0x110   :  { %v559_v27 = vadd.f32 %v558_v14, %v509_v13  ;;  %v771_v14 = vsel %vm695_vm0, %v745_v54, 0.0 }
 0x111   :  { %v654_v26 = vadd.f32 %v653_v2, %v605_v58  ;;  %v714_v2 = vadd.f32 %v713_v52, %v712_v50  ;;  %v746_v58 = vmul.f32 %v1613_v53, %v1613_v53  ;;  %v768_v10 = vadd.f32 %v767_v56, %v766_v1 }
 0x113   :  { %v674_v44 = vmul.f32 0.01, %v654_v26  ;;  %v716_v12 = vadd.f32 %v715_v61, %v714_v2  ;;  %v770_v21 = vadd.f32 %v769_v5, %v768_v10  ;;  %v773_v24 = vsel %vm695_vm0, %v746_v58, 0.0 }
 0x115   :  { %v1620_v62 = vmax.f32 %v654_v26, %v674_v44  ;;  %v718_v3 = vadd.f32 %v717_v6, %v716_v12  ;;  %v772_v28 = vadd.f32 %v771_v14, %v770_v21 }
 0x116   :  { %v607_v40 = vpop.f32.mrf.mxu2  ;;  %v511_v59 = vpop.f32.mrf.mxu0 }
 0x117   :  { %v656_v41 = vpop.f32.mrf.mxu3  ;;  %v608_v45 = vadd.f32 %v607_v40, %v559_v27  ;;  %v560_v60 = vpop.f32.mrf.mxu1  ;;  %v747_v17 = vmul.f32 %v1620_v62, %v1620_v62  ;;  %v721_v25 = vsel %vm695_vm0, %v1620_v62, 0.0  ;;  %v720_v29 = vadd.f32 %v719_v15, %v718_v3  ;;  %v693_v15 = vld [vmem:[%s1759_s2] sm:$0x1] }
 0x118   :  { %v561_v8 = vadd.f32 %v560_v60, %v511_v59  ;;  %v774_v33 = vadd.f32 %v773_v24, %v772_v28 }
 0x119   :  { %v657_v36 = vadd.f32 %v656_v41, %v608_v45  ;;  %v775_v23 = vsel %vm695_vm0, %v747_v17, 0.0  ;;  %v722_v34 = vadd.f32 %v721_v25, %v720_v29 }
 0x11a   :  { %v776_v38 = vadd.f32 %v775_v23, %v774_v33 }
 0x11b   :  { %v675_v0 = vmul.f32 0.01, %v657_v36 }
 0x11d   :  { %v1627_v7 = vmax.f32 %v657_v36, %v675_v0 }
 0x11e   :  { %v609_v13 = vpop.f32.mrf.mxu2 }
 0x11f   :  { %v610_v20 = vadd.f32 %v609_v13, %v561_v8  ;;  %v658_v9 = vpop.f32.mrf.mxu3  ;;  %v748_v26 = vmul.f32 %v1627_v7, %v1627_v7  ;;  %v723_v32 = vsel %vm695_vm0, %v1627_v7, 0.0 }
 0x120   :  { %v724_v40 = vadd.f32 %v723_v32, %v722_v34 }
 0x121   :  { %v659_v27 = vadd.f32 %v658_v9, %v610_v20  ;;  %v777_v35 = vsel %vm695_vm0, %v748_v26, 0.0 }
 0x122   :  { %v778_v44 = vadd.f32 %v777_v35, %v776_v38 }
 0x123   :  { %v676_v30 = vmul.f32 0.01, %v659_v27 }
 0x125   :  { %v1643_v37 = vmax.f32 %v659_v27, %v676_v30 }
 0x127   :  { %v725_v41 = vsel %vm695_vm0, %v1643_v37, 0.0  ;;  %v749_v42 = vmul.f32 %v1643_v37, %v1643_v37 }
 0x128   :  { %v726_v45 = vadd.f32 %v725_v41, %v724_v40 }
 0x129   :  { %v779_v47 = vsel %vm695_vm0, %v749_v42, 0.0 }
 0x12a   :  { %v727_v48 = vrot.slane %v726_v45, 4  ;;  %v780_v49 = vadd.f32 %v779_v47, %v778_v44 }
 0x12c   :  { %v728_v51 = vadd.f32 %v727_v48, %v726_v45  ;;  %v781_v52 = vrot.slane %v780_v49, 4 }
 0x12e   :  { %v729_v36 = vrot.slane %v728_v51, 2  ;;  %v782_v55 = vadd.f32 %v781_v52, %v780_v49 }
 0x130   :  { %v730_v50 = vadd.f32 %v729_v36, %v728_v51  ;;  %v783_v56 = vrot.slane %v782_v55, 2 }
 0x132   :  { %v731_v59 = vrot.slane %v730_v50, 1  ;;  %v784_v60 = vadd.f32 %v783_v56, %v782_v55 }
 0x134   :  { %v732_v61 = vadd.f32 %v731_v59, %v730_v50  ;;  %v785_v54 = vrot.slane %v784_v60, 1 }
 0x136   :  { %v1650_v0 = vmul.f32 0.0078125, %v732_v61  ;;  %v786_v1 = vadd.f32 %v785_v54, %v784_v60 }
 0x138   :  { %v787_v2 = vmul.f32 0.0078125, %v786_v1  ;;  %v788_v5 = vmul.f32 %v1650_v0, %v1650_v0  ;;  %v801_v3 = vsub.f32 %v1537_v11, %v1650_v0  ;;  %v802_v9 = vsub.f32 %v1534_v4, %v1650_v0  ;;  %v1211_v11 = vld [vmem:[%s1758_s3] ss:$0 sm:$0xff] }
 0x139   :  { %v803_v24 = vsub.f32 %v1543_v18, %v1650_v0  ;;  %v804_v26 = vsub.f32 %v1545_v19, %v1650_v0  ;;  %v805_v27 = vsub.f32 %v1560_v39, %v1650_v0  ;;  %v806_v4 = vsub.f32 %v1563_v46, %v1650_v0 }
 0x13a   :  { %v789_v6 = vsub.f32 %v787_v2, %v788_v5  ;;  %v807_v18 = vsub.f32 %v1571_v57, %v1650_v0  ;;  %v808_v19 = vsub.f32 %v1575_v63, %v1650_v0  ;;  %v809_v39 = vsub.f32 %v1585_v16, %v1650_v0 }
 0x13b   :  { %v810_v41 = vsub.f32 %v1590_v22, %v1650_v0  ;;  %v811_v46 = vsub.f32 %v1594_v31, %v1650_v0  ;;  %v812_v44 = vsub.f32 %v1606_v43, %v1650_v0  ;;  %v813_v63 = vsub.f32 %v1613_v53, %v1650_v0 }
 0x13c   :  { %v790_v58 = vadd.f32 1e-05, %v789_v6  ;;  %v814_v31 = vsub.f32 %v1620_v62, %v1650_v0  ;;  %v815_v43 = vsub.f32 %v1627_v7, %v1650_v0  ;;  %v816_v61 = vsub.f32 %v1643_v37, %v1650_v0 }
 0x13e   :  { %1212 = vrsqrt.f32 %v790_v58  ;;  %vm797_vm2 = vweird.f32 %v790_v58 }
 0x144   :  { %v1213_v8 = vpop.eup %1212 }
 0x145   :  { %v792_v10 = vmul.f32 %v1213_v8, %v790_v58  ;;  %vm798_vm1 = vweird.f32 %v1213_v8 }
 0x146   :  { %vm799_vm3 = vmor %vm797_vm2, %vm798_vm1 }
 0x147   :  { %v793_v12 = vmul.f32 %v1213_v8, %v792_v10 }
 0x149   :  { %v794_v13 = vmul.f32 0.5, %v793_v12 }
 0x14b   :  { %v795_v14 = vsub.f32 1.5, %v794_v13 }
 0x14d   :  { %v796_v17 = vmul.f32 %v1213_v8, %v795_v14 }
 0x14f   :  { %v800_v20 = vsel %vm799_vm3, %v1213_v8, %v796_v17 }
 0x150   :  { %v817_v21 = vmul.f32 %v800_v20, %v693_v15 }
 0x152   :  { %v818_v25 = vperm.slane %v817_v21, 0 }
 0x154   :  { %v819_v28 = vmul.f32 %v818_v25, %v801_v3  ;;  %v820_v29 = vmul.f32 %v818_v25, %v802_v9  ;;  %v821_v23 = vmul.f32 %v818_v25, %v803_v24  ;;  %v822_v32 = vmul.f32 %v818_v25, %v804_v26 }
 0x155   :  { %v823_v30 = vmul.f32 %v818_v25, %v805_v27  ;;  %v824_v33 = vmul.f32 %v818_v25, %v806_v4  ;;  %v825_v34 = vmul.f32 %v818_v25, %v807_v18  ;;  %v826_v42 = vmul.f32 %v818_v25, %v808_v19 }
 0x156   :  { %v838_v35 = vadd.f32 %v1211_v11, %v819_v28  ;;  %v839_v38 = vadd.f32 %v1211_v11, %v820_v29  ;;  %v840_v40 = vadd.f32 %v1211_v11, %v821_v23  ;;  %v841_v57 = vadd.f32 %v1211_v11, %v822_v32 }
 0x157   :  { %v827_v16 = vmul.f32 %v818_v25, %v809_v39  ;;  %v842_v45 = vadd.f32 %v1211_v11, %v823_v30  ;;  %v828_v47 = vmul.f32 %v818_v25, %v810_v41  ;;  %v829_v48 = vmul.f32 %v818_v25, %v811_v46 }
 0x158   :  { %v843_v49 = vadd.f32 %v1211_v11, %v824_v33  ;;  %v844_v51 = vadd.f32 %v1211_v11, %v825_v34  ;;  %v854_v52 = vpack.c.bf16 %v838_v35, %v838_v35  ;;  %v855_v22 = vpack.c.bf16 %v839_v38, %v839_v38 }
 0x159   :  { %v856_v36 = vpack.c.bf16 %v840_v40, %v840_v40  ;;  %v830_v55 = vmul.f32 %v818_v25, %v812_v44  ;;  %v845_v50 = vadd.f32 %v1211_v11, %v826_v42  ;;  %v857_v56 = vpack.c.bf16 %v841_v57, %v841_v57 }
 0x15a   :  { %v831_v53 = vmul.f32 %v818_v25, %v813_v63  ;;  %v846_v59 = vadd.f32 %v1211_v11, %v827_v16  ;;  %v858_v60 = vpack.c.bf16 %v842_v45, %v842_v45  ;;  %871 = vst.msk [vmem:[%s1760_s4] sm:$0xf] %vm870_vm4, %v854_v52  ;;  %v832_v54 = vmul.f32 %v818_v25, %v814_v31 }
 0x15b   :  { %v847_v1 = vadd.f32 %v1211_v11, %v828_v47  ;;  %v859_v62 = vpack.c.bf16 %v843_v49, %v843_v49  ;;  %872 = vst.msk [vmem:[%s1760_s4 + $0x4] sm:$0xf] %vm870_vm4, %v855_v22  ;;  %v833_v7 = vmul.f32 %v818_v25, %v815_v43  ;;  %v848_v2 = vadd.f32 %v1211_v11, %v829_v48 }
 0x15c   :  { %v860_v5 = vpack.c.bf16 %v844_v51, %v844_v51  ;;  %873 = vst.msk [vmem:[%s1760_s4 + $0x8] sm:$0xf] %vm870_vm4, %v856_v36  ;;  %v834_v6 = vmul.f32 %v818_v25, %v816_v61  ;;  %v849_v58 = vadd.f32 %v1211_v11, %v830_v55  ;;  %v861_v8 = vpack.c.bf16 %v845_v50, %v845_v50 }
 0x15d   :  { %874 = vst.msk [vmem:[%s1760_s4 + $0xc] sm:$0xf] %vm870_vm4, %v857_v56  ;;  %v850_v37 = vadd.f32 %v1211_v11, %v831_v53  ;;  %v862_v0 = vpack.c.bf16 %v846_v59, %v846_v59  ;;  %v851_v10 = vadd.f32 %v1211_v11, %v832_v54  ;;  %v863_v12 = vpack.c.bf16 %v847_v1, %v847_v1 }
 0x15e   :  { %875 = vst.msk [vmem:[%s1760_s4 + $0x10] sm:$0xf] %vm870_vm4, %v858_v60  ;;  %v852_v13 = vadd.f32 %v1211_v11, %v833_v7  ;;  %v864_v14 = vpack.c.bf16 %v848_v2, %v848_v2  ;;  %v853_v15 = vadd.f32 %v1211_v11, %v834_v6  ;;  %v865_v17 = vpack.c.bf16 %v849_v58, %v849_v58 }
 0x15f   :  { %876 = vst.msk [vmem:[%s1760_s4 + $0x14] sm:$0xf] %vm870_vm4, %v859_v62  ;;  %v866_v20 = vpack.c.bf16 %v850_v37, %v850_v37  ;;  %v867_v21 = vpack.c.bf16 %v851_v10, %v851_v10 }
 0x160   :  { %877 = vst.msk [vmem:[%s1760_s4 + $0x18] sm:$0xf] %vm870_vm4, %v860_v5  ;;  %v868_v3 = vpack.c.bf16 %v852_v13, %v852_v13  ;;  %v869_v9 = vpack.c.bf16 %v853_v15, %v853_v15 }
 0x161   :  { %878 = vst.msk [vmem:[%s1760_s4 + $0x1c] sm:$0xf] %vm870_vm4, %v861_v8 }
 0x162   :  { %879 = vst.msk [vmem:[%s1760_s4 + $0x20] sm:$0xf] %vm870_vm4, %v862_v0 }
 0x163   :  { %880 = vst.msk [vmem:[%s1760_s4 + $0x24] sm:$0xf] %vm870_vm4, %v863_v12 }
 0x164   :  { %881 = vst.msk [vmem:[%s1760_s4 + $0x28] sm:$0xf] %vm870_vm4, %v864_v14 }
 0x165   :  { %882 = vst.msk [vmem:[%s1760_s4 + $0x2c] sm:$0xf] %vm870_vm4, %v865_v17 }
 0x166   :  { %883 = vst.msk [vmem:[%s1760_s4 + $0x30] sm:$0xf] %vm870_vm4, %v866_v20 }
 0x167   :  { %884 = vst.msk [vmem:[%s1760_s4 + $0x34] sm:$0xf] %vm870_vm4, %v867_v21 }
 0x168   :  { %885 = vst.msk [vmem:[%s1760_s4 + $0x38] sm:$0xf] %vm870_vm4, %v868_v3 }
 0x169   :  { %886 = vst.msk [vmem:[%s1760_s4 + $0x3c] sm:$0xf] %vm870_vm4, %v869_v9 }

// kernel: discriminator_forward.7
= control target key start
LH: loop header
LB: loop body
LE: loop exit
PB: predicated region body
PF: predicated region fallthrough
CT: control target
= control target key end

     0   :  { %vm867_vm3 = vcmask 130112   ;;  %vm872_vm4 = vcmask 1041409   ;;  %vm875_vm5 = vcmask 123904   ;;  %vm879_vm6 = vcmask 1024   ;;  %s1627_s1 = inlined_call_operand.vmem [shape: bf16[1024,128], index: 1, kind: input, shape index: {}]   ;;  %s1628_s0 = inlined_call_operand.vmem [shape: bf16[32,1024], index: 0, kind: input, shape index: {}]   ;;  %s1629_s3 = inlined_call_operand.vmem [shape: f32[1,128], index: 3, kind: input, shape index: {}]   ;;  %s1630_s2 = inlined_call_operand.vmem [shape: f32[1,128], index: 2, kind: input, shape index: {}]   ;;  %s1631_s4 = inlined_call_operand.vmem [shape: f32[16,128], index: 4, kind: input, shape index: {}]   ;;  %s1632_s5 = inlined_call_operand.vmem [shape: f32[2,1], index: 5, kind: output, shape index: {}]  }
   0x1   :  { %v1228_v0 = vld [vmem:[%s1627_s1 + $0x38] sm:$0xff]  ;;  %v1227_v4 = vld [vmem:[%s1627_s1 + $0x30] sm:$0xff]  ;;  %v1226_v8 = vld [vmem:[%s1627_s1 + $0x28] sm:$0xff] }
   0x2   :  { %v1236_v1 = vld [vmem:[%s1627_s1 + $0x78] sm:$0xff]  ;;  %628 = vmatpush.bf16.msra.mxu0 %v1228_v0  ;;  %v1235_v5 = vld [vmem:[%s1627_s1 + $0x70] sm:$0xff]  ;;  %v1234_v9 = vld [vmem:[%s1627_s1 + $0x68] sm:$0xff] }
   0x3   :  { %v1244_v2 = vld [vmem:[%s1627_s1 + $0xb8] sm:$0xff]  ;;  %647 = vmatpush.bf16.msra.mxu1 %v1236_v1  ;;  %v1243_v6 = vld [vmem:[%s1627_s1 + $0xb0] sm:$0xff]  ;;  %v1242_v10 = vld [vmem:[%s1627_s1 + $0xa8] sm:$0xff] }
   0x4   :  { %v1252_v3 = vld [vmem:[%s1627_s1 + $0xf8] sm:$0xff]  ;;  %666 = vmatpush.bf16.msra.mxu2 %v1244_v2  ;;  %v1251_v7 = vld [vmem:[%s1627_s1 + $0xf0] sm:$0xff]  ;;  %v1250_v11 = vld [vmem:[%s1627_s1 + $0xe8] sm:$0xff] }
   0x5   :  { %685 = vmatpush.bf16.msra.mxu3 %v1252_v3  ;;  %v1225_v12 = vld [vmem:[%s1627_s1 + $0x20] sm:$0xff]  ;;  %v1224_v16 = vld [vmem:[%s1627_s1 + $0x18] sm:$0xff]  ;;  %v1223_v20 = vld [vmem:[%s1627_s1 + $0x10] sm:$0xff] }
   0x6   :  { %629 = vmatpush.bf16.msra.mxu0 %v1227_v4  ;;  %v1233_v13 = vld [vmem:[%s1627_s1 + $0x60] sm:$0xff]  ;;  %v1232_v17 = vld [vmem:[%s1627_s1 + $0x58] sm:$0xff]  ;;  %v1231_v21 = vld [vmem:[%s1627_s1 + $0x50] sm:$0xff] }
   0x7   :  { %648 = vmatpush.bf16.msra.mxu1 %v1235_v5  ;;  %v1241_v14 = vld [vmem:[%s1627_s1 + $0xa0] sm:$0xff]  ;;  %v1240_v18 = vld [vmem:[%s1627_s1 + $0x98] sm:$0xff]  ;;  %v1239_v22 = vld [vmem:[%s1627_s1 + $0x90] sm:$0xff] }
   0x8   :  { %667 = vmatpush.bf16.msra.mxu2 %v1243_v6  ;;  %v1249_v15 = vld [vmem:[%s1627_s1 + $0xe0] sm:$0xff]  ;;  %v1248_v19 = vld [vmem:[%s1627_s1 + $0xd8] sm:$0xff]  ;;  %v1247_v23 = vld [vmem:[%s1627_s1 + $0xd0] sm:$0xff] }
   0x9   :  { %686 = vmatpush.bf16.msra.mxu3 %v1251_v7  ;;  %v1222_v24 = vld [vmem:[%s1627_s1 + $0x8] sm:$0xff]  ;;  %v1221_v28 = vld [vmem:[%s1627_s1] sm:$0xff]  ;;  %v1276_v40 = vld [vmem:[%s1627_s1 + $0x1b8] sm:$0xff] }
   0xa   :  { %630 = vmatpush.bf16.msra.mxu0 %v1226_v8  ;;  %v1230_v25 = vld [vmem:[%s1627_s1 + $0x48] sm:$0xff]  ;;  %v1229_v29 = vld [vmem:[%s1627_s1 + $0x40] sm:$0xff]  ;;  %v1260_v41 = vld [vmem:[%s1627_s1 + $0x138] sm:$0xff] }
   0xb   :  { %649 = vmatpush.bf16.msra.mxu1 %v1234_v9  ;;  %v1238_v26 = vld [vmem:[%s1627_s1 + $0x88] sm:$0xff]  ;;  %v1237_v30 = vld [vmem:[%s1627_s1 + $0x80] sm:$0xff]  ;;  %v1268_v46 = vld [vmem:[%s1627_s1 + $0x178] sm:$0xff] }
   0xc   :  { %668 = vmatpush.bf16.msra.mxu2 %v1242_v10  ;;  %v1246_v27 = vld [vmem:[%s1627_s1 + $0xc8] sm:$0xff]  ;;  %v1245_v31 = vld [vmem:[%s1627_s1 + $0xc0] sm:$0xff]  ;;  %v1284_v47 = vld [vmem:[%s1627_s1 + $0x1f8] sm:$0xff] }
   0xd   :  { %687 = vmatpush.bf16.msra.mxu3 %v1250_v11  ;;  %v887_v32 = vld [vmem:[%s1628_s0] sm:$0xf]  ;;  %v1205_v34 = vld [vmem:[%s1628_s0 + $0x4] sm:$0xf]  ;;  %v895_v36 = vld [vmem:[%s1628_s0 + $0x8] sm:$0xf] }
   0xe   :  { %631 = vmatpush.bf16.msra.mxu0 %v1225_v12  ;;  %v1209_v33 = vld [vmem:[%s1628_s0 + $0x1c] sm:$0xf0]  ;;  %v889_v35 = vld [vmem:[%s1628_s0 + $0x20] sm:$0xf0]  ;;  %v1210_v37 = vld [vmem:[%s1628_s0 + $0x24] sm:$0xf0] }
   0xf   :  { %650 = vmatpush.bf16.msra.mxu1 %v1233_v13  ;;  %v1206_v38 = vld [vmem:[%s1628_s0 + $0xc] sm:$0xf]  ;;  %v888_v42 = vor.u32 %v1209_v33, %v887_v32  ;;  %v892_v43 = vor.u32 %v1205_v34, %v889_v35  ;;  %v896_v44 = vor.u32 %v1210_v37, %v895_v36  ;;  %v1275_v48 = vld [vmem:[%s1627_s1 + $0x1b0] sm:$0xff]  ;;  %v1273_v56 = vld [vmem:[%s1627_s1 + $0x1a0] sm:$0xff] }
  0x10   :  { %669 = vmatpush.bf16.msra.mxu2 %v1241_v14  ;;  %v897_v39 = vld [vmem:[%s1628_s0 + $0x28] sm:$0xf0]  ;;  %v1259_v49 = vld [vmem:[%s1627_s1 + $0x130] sm:$0xff]  ;;  %v1257_v57 = vld [vmem:[%s1627_s1 + $0x120] sm:$0xff] }
  0x11   :  { %688 = vmatpush.bf16.msra.mxu3 %v1249_v15  ;;  %v900_v45 = vor.u32 %v1206_v38, %v897_v39  ;;  %v1267_v50 = vld [vmem:[%s1627_s1 + $0x170] sm:$0xff]  ;;  %v1274_v52 = vld [vmem:[%s1627_s1 + $0x1a8] sm:$0xff]  ;;  %v1265_v58 = vld [vmem:[%s1627_s1 + $0x160] sm:$0xff] }
  0x12   :  { %632 = vmatpush.bf16.msra.mxu0 %v1224_v16  ;;  %v1283_v51 = vld [vmem:[%s1627_s1 + $0x1f0] sm:$0xff]  ;;  %v1258_v53 = vld [vmem:[%s1627_s1 + $0x128] sm:$0xff]  ;;  %v1281_v59 = vld [vmem:[%s1627_s1 + $0x1e0] sm:$0xff] }
  0x13   :  { %651 = vmatpush.bf16.msra.mxu1 %v1232_v17  ;;  %v1266_v54 = vld [vmem:[%s1627_s1 + $0x168] sm:$0xff]  ;;  %v919_v60 = vld [vmem:[%s1628_s0 + $0x40] sm:$0xf]  ;;  %v1213_v62 = vld [vmem:[%s1628_s0 + $0x44] sm:$0xf] }
  0x14   :  { %670 = vmatpush.bf16.msra.mxu2 %v1240_v18  ;;  %v1282_v55 = vld [vmem:[%s1627_s1 + $0x1e8] sm:$0xff]  ;;  %v1217_v61 = vld [vmem:[%s1628_s0 + $0x5c] sm:$0xf0]  ;;  %v921_v63 = vld [vmem:[%s1628_s0 + $0x60] sm:$0xf0] }
  0x15   :  { %689 = vmatpush.bf16.msra.mxu3 %v1248_v19  ;;  %v927_v0 = vld [vmem:[%s1628_s0 + $0x48] sm:$0xf]  ;;  %v1214_v2 = vld [vmem:[%s1628_s0 + $0x4c] sm:$0xf]  ;;  %v1272_v4 = vld [vmem:[%s1627_s1 + $0x198] sm:$0xff]  ;;  %v920_v6 = vor.u32 %v1217_v61, %v919_v60  ;;  %v924_v7 = vor.u32 %v1213_v62, %v921_v63 }
  0x16   :  { %633 = vmatpush.bf16.msra.mxu0 %v1223_v20  ;;  %v1218_v1 = vld [vmem:[%s1628_s0 + $0x64] sm:$0xf0]  ;;  %v929_v3 = vld [vmem:[%s1628_s0 + $0x68] sm:$0xf0]  ;;  %v1256_v5 = vld [vmem:[%s1627_s1 + $0x118] sm:$0xff] }
  0x17   :  { %652 = vmatpush.bf16.msra.mxu1 %v1231_v21  ;;  %v928_v8 = vor.u32 %v1218_v1, %v927_v0  ;;  %v932_v9 = vor.u32 %v1214_v2, %v929_v3  ;;  %v1264_v10 = vld [vmem:[%s1627_s1 + $0x158] sm:$0xff]  ;;  %v1271_v12 = vld [vmem:[%s1627_s1 + $0x190] sm:$0xff]  ;;  %v1270_v16 = vld [vmem:[%s1627_s1 + $0x188] sm:$0xff] }
  0x18   :  { %671 = vmatpush.bf16.msra.mxu2 %v1239_v22  ;;  %v1280_v11 = vld [vmem:[%s1627_s1 + $0x1d8] sm:$0xff]  ;;  %v1255_v13 = vld [vmem:[%s1627_s1 + $0x110] sm:$0xff]  ;;  %v1254_v17 = vld [vmem:[%s1627_s1 + $0x108] sm:$0xff] }
  0x19   :  { %690 = vmatpush.bf16.msra.mxu3 %v1247_v23  ;;  %v1263_v14 = vld [vmem:[%s1627_s1 + $0x150] sm:$0xff]  ;;  %v1262_v18 = vld [vmem:[%s1627_s1 + $0x148] sm:$0xff]  ;;  %v1269_v20 = vld [vmem:[%s1627_s1 + $0x180] sm:$0xff] }
  0x1a   :  { %634 = vmatpush.bf16.msra.mxu0 %v1222_v24  ;;  %v1279_v15 = vld [vmem:[%s1627_s1 + $0x1d0] sm:$0xff]  ;;  %v1278_v19 = vld [vmem:[%s1627_s1 + $0x1c8] sm:$0xff]  ;;  %v1253_v21 = vld [vmem:[%s1627_s1 + $0x100] sm:$0xff] }
  0x1b   :  { %653 = vmatpush.bf16.msra.mxu1 %v1230_v25  ;;  %v1261_v22 = vld [vmem:[%s1627_s1 + $0x140] sm:$0xff]  ;;  %v903_v24 = vld [vmem:[%s1628_s0 + $0x10] sm:$0xf]  ;;  %v1215_v38 = vld [vmem:[%s1628_s0 + $0x54] sm:$0xf] }
  0x1c   :  { %672 = vmatpush.bf16.msra.mxu2 %v1238_v26  ;;  %v1277_v23 = vld [vmem:[%s1627_s1 + $0x1c0] sm:$0xff]  ;;  %v1211_v25 = vld [vmem:[%s1628_s0 + $0x2c] sm:$0xf0]  ;;  %v1207_v26 = vld [vmem:[%s1628_s0 + $0x14] sm:$0xf] }
  0x1d   :  { %691 = vmatpush.bf16.msra.mxu3 %v1246_v27  ;;  %v905_v27 = vld [vmem:[%s1628_s0 + $0x30] sm:$0xf0]  ;;  %v904_v32 = vor.u32 %v1211_v25, %v903_v24  ;;  %v935_v36 = vld [vmem:[%s1628_s0 + $0x50] sm:$0xf] }
  0x1e   :  { %635 = vmatpush.bf16.msra.mxu0 %v1221_v28  ;;  %v911_v28 = vld [vmem:[%s1628_s0 + $0x18] sm:$0xf]  ;;  %v908_v33 = vor.u32 %v1207_v26, %v905_v27  ;;  %v1219_v37 = vld [vmem:[%s1628_s0 + $0x6c] sm:$0xf0]  ;;  %v937_v39 = vld [vmem:[%s1628_s0 + $0x70] sm:$0xf0] }
  0x1f   :  { %654 = vmatpush.bf16.msra.mxu1 %v1229_v29  ;;  %v1212_v29 = vld [vmem:[%s1628_s0 + $0x34] sm:$0xf0] }
  0x20   :  { %673 = vmatpush.bf16.msra.mxu2 %v1237_v30  ;;  %v1208_v30 = vld [vmem:[%s1628_s0 + $0x1c] sm:$0xf]  ;;  %v912_v34 = vor.u32 %v1212_v29, %v911_v28 }
  0x21   :  { %692 = vmatpush.bf16.msra.mxu3 %v1245_v31  ;;  %636 = vmatmul.bf16.vlgmr.msra.gmra.mxu0 %v888_v42  ;;  %v913_v31 = vld [vmem:[%s1628_s0 + $0x38] sm:$0xf0] }
  0x22   :  { %704 = vmatpush.bf16.msrb.mxu0 %v1260_v41  ;;  %655 = vmatmul.bf16.vlgmr.msra.gmra.mxu1 %v892_v43  ;;  %v916_v35 = vor.u32 %v1208_v30, %v913_v31  ;;  %v1220_v41 = vld [vmem:[%s1628_s0 + $0x74] sm:$0xf0]  ;;  %v1216_v42 = vld [vmem:[%s1628_s0 + $0x5c] sm:$0xf] }
  0x23   :  { %674 = vmatmul.bf16.vlgmr.msra.gmra.mxu2 %v896_v44  ;;  %723 = vmatpush.bf16.msrb.mxu1 %v1268_v46  ;;  %v945_v43 = vld [vmem:[%s1628_s0 + $0x78] sm:$0xf0]  ;;  %v936_v44 = vor.u32 %v1219_v37, %v935_v36 }
  0x24   :  { %742 = vmatpush.bf16.msrb.mxu2 %v1276_v40  ;;  %693 = vmatmul.bf16.vlgmr.msra.gmra.mxu3 %v900_v45  ;;  %v943_v40 = vld [vmem:[%s1628_s0 + $0x58] sm:$0xf]  ;;  %v940_v45 = vor.u32 %v1215_v38, %v937_v39 }
  0x25   :  { %761 = vmatpush.bf16.msrb.mxu3 %v1284_v47  ;;  %v944_v46 = vor.u32 %v1220_v41, %v943_v40  ;;  %v948_v47 = vor.u32 %v1216_v42, %v945_v43 }
  0x26   :  { %705 = vmatpush.bf16.msrb.mxu0 %v1259_v49 }
  0x27   :  { %724 = vmatpush.bf16.msrb.mxu1 %v1267_v50 }
  0x28   :  { %743 = vmatpush.bf16.msrb.mxu2 %v1275_v48 }
  0x29   :  { %762 = vmatpush.bf16.msrb.mxu3 %v1283_v51 }
  0x2a   :  { %706 = vmatpush.bf16.msrb.mxu0 %v1258_v53 }
  0x2b   :  { %725 = vmatpush.bf16.msrb.mxu1 %v1266_v54 }
  0x2c   :  { %744 = vmatpush.bf16.msrb.mxu2 %v1274_v52 }
  0x2d   :  { %763 = vmatpush.bf16.msrb.mxu3 %v1282_v55 }
  0x2e   :  { %707 = vmatpush.bf16.msrb.mxu0 %v1257_v57 }
  0x2f   :  { %726 = vmatpush.bf16.msrb.mxu1 %v1265_v58 }
  0x30   :  { %745 = vmatpush.bf16.msrb.mxu2 %v1273_v56 }
  0x31   :  { %764 = vmatpush.bf16.msrb.mxu3 %v1281_v59  ;;  %641 = vmatmul.bf16.gmra.mxu0 %v920_v6 }
  0x32   :  { %708 = vmatpush.bf16.msrb.mxu0 %v1256_v5  ;;  %660 = vmatmul.bf16.gmra.mxu1 %v924_v7 }
  0x33   :  { %679 = vmatmul.bf16.gmra.mxu2 %v928_v8  ;;  %727 = vmatpush.bf16.msrb.mxu1 %v1264_v10 }
  0x34   :  { %746 = vmatpush.bf16.msrb.mxu2 %v1272_v4  ;;  %698 = vmatmul.bf16.gmra.mxu3 %v932_v9 }
  0x35   :  { %765 = vmatpush.bf16.msrb.mxu3 %v1280_v11 }
  0x36   :  { %709 = vmatpush.bf16.msrb.mxu0 %v1255_v13 }
  0x37   :  { %728 = vmatpush.bf16.msrb.mxu1 %v1263_v14 }
  0x38   :  { %747 = vmatpush.bf16.msrb.mxu2 %v1271_v12 }
  0x39   :  { %766 = vmatpush.bf16.msrb.mxu3 %v1279_v15 }
  0x3a   :  { %710 = vmatpush.bf16.msrb.mxu0 %v1254_v17 }
  0x3b   :  { %729 = vmatpush.bf16.msrb.mxu1 %v1262_v18 }
  0x3c   :  { %748 = vmatpush.bf16.msrb.mxu2 %v1270_v16 }
  0x3d   :  { %767 = vmatpush.bf16.msrb.mxu3 %v1278_v19 }
  0x3e   :  { %711 = vmatpush.bf16.msrb.mxu0 %v1253_v21 }
  0x3f   :  { %730 = vmatpush.bf16.msrb.mxu1 %v1261_v22 }
  0x40   :  { %749 = vmatpush.bf16.msrb.mxu2 %v1269_v20 }
  0x41   :  { %768 = vmatpush.bf16.msrb.mxu3 %v1277_v23  ;;  %712 = vmatmul.bf16.vlgmr.msrb.gmra.mxu0 %v904_v32 }
  0x42   :  { %731 = vmatmul.bf16.vlgmr.msrb.gmra.mxu1 %v908_v33 }
  0x43   :  { %750 = vmatmul.bf16.vlgmr.msrb.gmra.mxu2 %v912_v34 }
  0x44   :  { %769 = vmatmul.bf16.vlgmr.msrb.gmra.mxu3 %v916_v35 }
  0x51   :  { %717 = vmatmul.bf16.gmra.mxu0 %v936_v44 }
  0x52   :  { %736 = vmatmul.bf16.gmra.mxu1 %v940_v45 }
  0x53   :  { %755 = vmatmul.bf16.gmra.mxu2 %v944_v46 }
  0x54   :  { %774 = vmatmul.bf16.gmra.mxu3 %v948_v47 }
  0x9e   :  { %v637_v48 = vpop.f32.mrf.mxu0 }
  0x9f   :  { %v656_v49 = vpop.f32.mrf.mxu1 }
  0xa0   :  { %v657_v3 = vadd.f32 %v656_v49, %v637_v48 }
  0xa6   :  { %v675_v50 = vpop.f32.mrf.mxu2  ;;  %v639_v52 = vpop.f32.mrf.mxu0 }
  0xa7   :  { %v694_v51 = vpop.f32.mrf.mxu3  ;;  %v658_v53 = vpop.f32.mrf.mxu1  ;;  %v676_v6 = vadd.f32 %v675_v50, %v657_v3 }
  0xa8   :  { %v659_v2 = vadd.f32 %v658_v53, %v639_v52 }
  0xa9   :  { %v695_v12 = vadd.f32 %v694_v51, %v676_v6 }
  0xae   :  { %v677_v54 = vpop.f32.mrf.mxu2  ;;  %v642_v56 = vpop.f32.mrf.mxu0 }
  0xaf   :  { %v696_v55 = vpop.f32.mrf.mxu3  ;;  %v661_v57 = vpop.f32.mrf.mxu1  ;;  %v678_v4 = vadd.f32 %v677_v54, %v659_v2 }
  0xb0   :  { %v662_v11 = vadd.f32 %v661_v57, %v642_v56 }
  0xb1   :  { %v697_v10 = vadd.f32 %v696_v55, %v678_v4 }
  0xb6   :  { %v680_v58 = vpop.f32.mrf.mxu2  ;;  %v644_v60 = vpop.f32.mrf.mxu0 }
  0xb7   :  { %v699_v59 = vpop.f32.mrf.mxu3  ;;  %v663_v61 = vpop.f32.mrf.mxu1  ;;  %v681_v13 = vadd.f32 %v680_v58, %v662_v11 }
  0xb8   :  { %v664_v21 = vadd.f32 %v663_v61, %v644_v60 }
  0xb9   :  { %v700_v17 = vadd.f32 %v699_v59, %v681_v13 }
  0xbe   :  { %v682_v62 = vpop.f32.mrf.mxu2  ;;  %v713_v0 = vpop.f32.mrf.mxu0 }
  0xbf   :  { %v701_v63 = vpop.f32.mrf.mxu3  ;;  %v732_v1 = vpop.f32.mrf.mxu1  ;;  %v714_v15 = vadd.f32 %v713_v0, %v695_v12  ;;  %v683_v26 = vadd.f32 %v682_v62, %v664_v21 }
  0xc1   :  { %v733_v22 = vadd.f32 %v732_v1, %v714_v15  ;;  %v702_v31 = vadd.f32 %v701_v63, %v683_v26  ;;  %v1285_v26 = vld [vmem:[%s1629_s3] ss:$0 sm:$0xff] }
  0xc6   :  { %v751_v5 = vpop.f32.mrf.mxu2  ;;  %v715_v8 = vpop.f32.mrf.mxu0 }
  0xc7   :  { %v770_v7 = vpop.f32.mrf.mxu3  ;;  %v734_v9 = vpop.f32.mrf.mxu1  ;;  %v716_v14 = vadd.f32 %v715_v8, %v697_v10  ;;  %v752_v27 = vadd.f32 %v751_v5, %v733_v22 }
  0xc9   :  { %v735_v18 = vadd.f32 %v734_v9, %v716_v14  ;;  %v771_v32 = vadd.f32 %v770_v7, %v752_v27 }
  0xcb   :  { %v780_v39 = vmul.f32 0.01, %v771_v32 }
  0xcd   :  { %v784_v45 = vmax.f32 %v771_v32, %v780_v39 }
  0xce   :  { %v753_v16 = vpop.f32.mrf.mxu2  ;;  %v718_v20 = vpop.f32.mrf.mxu0 }
  0xcf   :  { %v772_v19 = vpop.f32.mrf.mxu3  ;;  %v754_v23 = vadd.f32 %v753_v16, %v735_v18  ;;  %v719_v24 = vadd.f32 %v718_v20, %v700_v17  ;;  %v737_v25 = vpop.f32.mrf.mxu1  ;;  %v800_v51 = vmul.f32 %v784_v45, %v784_v45  ;;  %v788_v20 = vld [vmem:[%s1630_s2] sm:$0x1] }
  0xd1   :  { %v773_v28 = vadd.f32 %v772_v19, %v754_v23  ;;  %v738_v29 = vadd.f32 %v737_v25, %v719_v24 }
  0xd3   :  { %v781_v36 = vmul.f32 0.01, %v773_v28 }
  0xd5   :  { %v1606_v42 = vmax.f32 %v773_v28, %v781_v36 }
  0xd6   :  { %v756_v30 = vpop.f32.mrf.mxu2  ;;  %v720_v35 = vpop.f32.mrf.mxu0 }
  0xd7   :  { %v757_v33 = vadd.f32 %v756_v30, %v738_v29  ;;  %v775_v34 = vpop.f32.mrf.mxu3  ;;  %v721_v38 = vadd.f32 %v720_v35, %v702_v31  ;;  %v739_v41 = vpop.f32.mrf.mxu1  ;;  %v801_v49 = vmul.f32 %v1606_v42, %v1606_v42  ;;  %v790_v52 = vadd.f32 %v1606_v42, %v784_v45  ;;  %v844_v30 = vld [vmem:[%s1631_s4] sm:$0xff] }
  0xd9   :  { %v776_v37 = vadd.f32 %v775_v34, %v757_v33  ;;  %v740_v43 = vadd.f32 %v739_v41, %v721_v38  ;;  %v804_v55 = vadd.f32 %v801_v49, %v800_v51  ;;  %v845_v41 = vld [vmem:[%s1631_s4 + $0x8] sm:$0xff] }
  0xdb   :  { %v782_v40 = vmul.f32 0.01, %v776_v37 }
  0xdd   :  { %v786_v46 = vmax.f32 %v776_v37, %v782_v40 }
  0xde   :  { %v758_v44 = vpop.f32.mrf.mxu2 }
  0xdf   :  { %v759_v47 = vadd.f32 %v758_v44, %v740_v43  ;;  %v777_v48 = vpop.f32.mrf.mxu3  ;;  %v802_v53 = vmul.f32 %v786_v46, %v786_v46  ;;  %v791_v56 = vadd.f32 %v790_v52, %v786_v46 }
  0xe1   :  { %v778_v50 = vadd.f32 %v777_v48, %v759_v47  ;;  %v805_v58 = vadd.f32 %v804_v55, %v802_v53 }
  0xe3   :  { %v783_v54 = vmul.f32 0.01, %v778_v50 }
  0xe5   :  { %v787_v57 = vmax.f32 %v778_v50, %v783_v54 }
  0xe7   :  { %v792_v59 = vadd.f32 %v791_v56, %v787_v57  ;;  %v803_v60 = vmul.f32 %v787_v57, %v787_v57 }
  0xe9   :  { %v793_v61 = vrot.slane %v792_v59, 4  ;;  %v806_v62 = vadd.f32 %v805_v58, %v803_v60 }
  0xeb   :  { %v794_v63 = vadd.f32 %v793_v61, %v792_v59  ;;  %v807_v0 = vrot.slane %v806_v62, 4 }
  0xed   :  { %v795_v1 = vrot.slane %v794_v63, 2  ;;  %v808_v2 = vadd.f32 %v807_v0, %v806_v62 }
  0xef   :  { %v796_v3 = vadd.f32 %v795_v1, %v794_v63  ;;  %v809_v4 = vrot.slane %v808_v2, 2 }
  0xf1   :  { %v797_v5 = vrot.slane %v796_v3, 1  ;;  %v810_v6 = vadd.f32 %v809_v4, %v808_v2 }
  0xf3   :  { %v798_v7 = vadd.f32 %v797_v5, %v796_v3  ;;  %v811_v8 = vrot.slane %v810_v6, 1 }
  0xf5   :  { %v799_v9 = vmul.f32 0.03125, %v798_v7  ;;  %v812_v10 = vadd.f32 %v811_v8, %v810_v6 }
  0xf7   :  { %v813_v11 = vmul.f32 0.03125, %v812_v10  ;;  %v814_v12 = vmul.f32 %v799_v9, %v799_v9  ;;  %v829_v24 = vsub.f32 %v786_v46, %v799_v9  ;;  %v827_v27 = vsub.f32 %v784_v45, %v799_v9 }
  0xf8   :  { %v830_v31 = vsub.f32 %v787_v57, %v799_v9  ;;  %v828_v34 = vsub.f32 %v1606_v42, %v799_v9  ;;  %v862_v45 = vlaneseq }
  0xf9   :  { %v815_v13 = vsub.f32 %v813_v11, %v814_v12 }
  0xfa   :  { %v863_v42 = vand.u32 127, %v862_v45 }
  0xfb   :  { %v816_v14 = vadd.f32 1e-05, %v815_v13 }
  0xfc   :  { %v865_v48 = vadd.s32 4294967288, %v863_v42 }
  0xfd   :  { %1286 = vrsqrt.f32 %v816_v14  ;;  %vm823_vm1 = vweird.f32 %v816_v14 }
 0x103   :  { %v1287_v15 = vpop.eup %1286 }
 0x104   :  { %v818_v16 = vmul.f32 %v1287_v15, %v816_v14  ;;  %vm824_vm0 = vweird.f32 %v1287_v15 }
 0x105   :  { %vm825_vm2 = vmor %vm823_vm1, %vm824_vm0 }
 0x106   :  { %v819_v17 = vmul.f32 %v1287_v15, %v818_v16 }
 0x108   :  { %v820_v18 = vmul.f32 0.5, %v819_v17 }
 0x10a   :  { %v821_v19 = vsub.f32 1.5, %v820_v18 }
 0x10c   :  { %v822_v21 = vmul.f32 %v1287_v15, %v821_v19 }
 0x10e   :  { %v826_v22 = vsel %vm825_vm2, %v1287_v15, %v822_v21 }
 0x10f   :  { %v831_v23 = vmul.f32 %v826_v22, %v788_v20 }
 0x111   :  { %v832_v25 = vperm.slane %v831_v23, 0 }
 0x113   :  { %v835_v28 = vmul.f32 %v832_v25, %v829_v24  ;;  %v833_v29 = vmul.f32 %v832_v25, %v827_v27  ;;  %v836_v37 = vmul.f32 %v832_v25, %v830_v31  ;;  %v834_v38 = vmul.f32 %v832_v25, %v828_v34 }
 0x115   :  { %v842_v32 = vadd.f32 %v1285_v26, %v835_v28  ;;  %v840_v33 = vadd.f32 %v1285_v26, %v833_v29  ;;  %v843_v39 = vadd.f32 %v1285_v26, %v836_v37  ;;  %v841_v40 = vadd.f32 %v1285_v26, %v834_v38 }
 0x117   :  { %v848_v35 = vmul.f32 %v844_v30, %v842_v32  ;;  %v846_v36 = vmul.f32 %v844_v30, %v840_v33  ;;  %v849_v43 = vmul.f32 %v845_v41, %v843_v39  ;;  %v847_v44 = vmul.f32 %v845_v41, %v841_v40 }
 0x119   :  { %854 = vadd.xlane.f32.xlu1 %v848_v35  ;;  %850 = vadd.xlane.f32.xlu0 %v846_v36 }
 0x121   :  { %856 = vadd.xlane.f32.xlu1 %v849_v43  ;;  %852 = vadd.xlane.f32.xlu0 %v847_v44 }
 0x18c   :  { %v855_v46 = vpop.xlane.xlu1 %854  ;;  %v851_v47 = vpop.xlane.xlu0 %850 }
 0x18d   :  { %v869_v51 = vperm.slane %v855_v46, %v863_v42  ;;  %v864_v52 = vperm.slane %v851_v47, %v863_v42 }
 0x194   :  { %v857_v49 = vpop.xlane.xlu1 %856  ;;  %v853_v50 = vpop.xlane.xlu0 %852 }
 0x195   :  { %v870_v53 = vperm.slane %v857_v49, %v865_v48  ;;  %v866_v54 = vperm.slane %v853_v50, %v865_v48 }
 0x197   :  { %v868_v55 = vsel %vm867_vm3, %v866_v54, %v864_v52  ;;  %v871_v56 = vsel %vm867_vm3, %v870_v53, %v869_v51 }
 0x198   :  { %v873_v57 = vsel %vm872_vm4, %v871_v56, %v868_v55 }
 0x199   :  { %v876_v58 = vsel %vm875_vm5, %v873_v57, 0.0 }
 0x19a   :  { %877 = vadd.xlane.f32.xlu2 %v876_v58 }
 0x20d   :  { %v878_v59 = vpop.xlane.xlu2 %877 }
 0x20e   :  { %880 = vst.msk [vmem:[%s1632_s5] sm:$0x3] %vm879_vm6, %v878_v59 }

</bundles_post_ra>
